<compile_context>
chip_gen: v5e
topology: v5e:2x2
jax: 0.10.0
libtpu: 0.0.40
codegen_flags: <defaults>
</compile_context>

<pallas_src>
import functools

import jax
import jax.numpy as jnp
from jax import lax
from jax.experimental import pallas as pl
from jax.experimental.pallas import tpu as pltpu

EPS = 1e-5
LANE = 128


def _round_up(x, m):
    return (x + m - 1) // m * m


def _vmem_caps():
    """Scoped-VMEM limit and per-kernel working-set budget, per generation."""
    try:
        cap = int(pltpu.get_tpu_info().vmem_capacity_bytes)
    except Exception:
        cap = 64 << 20                       # assume the smallest (v7x-like)
    limit = min((cap * 3) // 4, 96 << 20)    # 48 MiB on v7x, 96 MiB on v5e/v6e
    budget = min(cap // 5, 20 << 20)         # ~12.8 MiB on v7x, 20 MiB otherwise
    return limit, budget


_VMEM_LIMIT, _VMEM_BUDGET = _vmem_caps()


def _choose_tm(m, k, n, in_bytes, w_bytes, out_bytes):
    """Largest power-of-two M tile whose double-buffered set fits the budget."""
    tm = 1024
    while tm > 8:
        need = (2 * tm * k * in_bytes        # input tile (double buffered)
                + 2 * k * n * w_bytes        # resident weights
                + 2 * tm * n * out_bytes     # output tile (double buffered)
                + tm * n * 4                 # f32 dot result
                + 4 * n * 4)                 # partial stats
        if need <= _VMEM_BUDGET:
            break
        tm //= 2
    return min(tm, _round_up(m, 8))


def _pad_vec(v, n, fill):
    v = v.astype(jnp.float32)
    if v.shape[0] == n:
        return v
    return jnp.concatenate([v, jnp.full((n - v.shape[0],), fill, jnp.float32)])


def _bn_scale_shift(ch_sum, ch_sq, count, gamma, beta):
    """Fold training-mode batch-norm (biased var) into per-channel scale/shift."""
    mean = ch_sum / count
    # NOTE: E[x^2]-E[x]^2 in f32; fine for these sizes (clamped at 0).
    var = jnp.maximum(ch_sq / count - mean * mean, 0.0)
    scale = gamma.astype(jnp.float32) / jnp.sqrt(var + EPS)
    shift = beta.astype(jnp.float32) - mean * scale
    return scale, shift


# --------------------------------------------------------------------------
# Kernel 1: 1x1 conv (matmul) with optional fused BN+ReLU prologue and fused
#           per-block BN-stat partial sums in the epilogue.
# --------------------------------------------------------------------------

def _mm_bn_kernel(*refs, prologue, valid_rows, cdt):
    if prologue:
        x_ref, w_ref, ps_ref, pb_ref, y_ref, sum_ref, sq_ref = refs
    else:
        x_ref, w_ref, y_ref, sum_ref, sq_ref = refs
        ps_ref = pb_ref = None

    x = x_ref[...]
    if prologue:
        # Fused BN affine + ReLU of the previous layer on the loaded tile.
        x = jnp.maximum(x.astype(jnp.float32) * ps_ref[...] + pb_ref[...], 0.0)
        if valid_rows is not None:
            # Padded rows would become relu(shift) != 0 and pollute BN stats.
            rows = (pl.program_id(0) * x.shape[0]
                    + lax.broadcasted_iota(jnp.int32, (x.shape[0], 1), 0))
            x = jnp.where(rows < valid_rows, x, 0.0)

    acc = jnp.dot(x.astype(cdt), w_ref[...], preferred_element_type=jnp.float32)
    y_ref[...] = acc.astype(y_ref.dtype)
    # Per-M-block partial sums (reduced outside) -> grid axis stays "parallel".
    sum_ref[0] = jnp.sum(acc, axis=0, keepdims=True)
    sq_ref[0] = jnp.sum(acc * acc, axis=0, keepdims=True)


def pallas_conv1x1_bn(x, w, *, prologue=None, compute_dtype=jnp.bfloat16,
                      out_dtype=None):
    """x: (M, K), w: (K, N) f32.  Output channels are zero-padded to a multiple
    of 128 (lane-dense stores); the caller keeps / propagates the padded width.
    Returns (y (M, Np) out_dtype, per-channel sum (Np,), sumsq (Np,))."""
    M, K = x.shape
    N = w.shape[1]
    Np = _round_up(N, LANE)
    out_dtype = out_dtype or compute_dtype

    # Full-K resident weights: every bottleneck 1x1 weight (<= 2048x2048 bf16)
    # fits VMEM on all generations, so K is never tiled / re-streamed.
    wc = w.astype(compute_dtype)
    if Np != N:
        wc = jnp.pad(wc, ((0, 0), (0, Np - N)))

    tm = _choose_tm(M, K, Np,
                    jnp.dtype(x.dtype).itemsize,
                    jnp.dtype(compute_dtype).itemsize,
                    jnp.dtype(out_dtype).itemsize)
    M_pad = _round_up(M, tm)
    if M_pad != M:
        x = jnp.pad(x, ((0, M_pad - M), (0, 0)))
    nm = M_pad // tm

    args = [x, wc]
    in_specs = [pl.BlockSpec((tm, K), lambda m: (m, 0)),
                pl.BlockSpec((K, Np), lambda m: (0, 0))]
    if prologue is not None:
        ps, pb = prologue
        args += [ps.astype(jnp.float32)[None, :], pb.astype(jnp.float32)[None, :]]
        in_specs += [pl.BlockSpec((1, K), lambda m: (0, 0)),
                     pl.BlockSpec((1, K), lambda m: (0, 0))]

    kernel = functools.partial(
        _mm_bn_kernel,
        prologue=prologue is not None,
        valid_rows=(M if (M_pad != M and prologue is not None) else None),
        cdt=compute_dtype)

    y, psum, psq = pl.pallas_call(
        kernel,
        out_shape=(jax.ShapeDtypeStruct((M_pad, Np), out_dtype),
                   jax.ShapeDtypeStruct((nm, 1, Np), jnp.float32),
                   jax.ShapeDtypeStruct((nm, 1, Np), jnp.float32)),
        grid=(nm,),
        in_specs=in_specs,
        out_specs=(pl.BlockSpec((tm, Np), lambda m: (m, 0)),
                   pl.BlockSpec((1, 1, Np), lambda m: (m, 0, 0)),
                   pl.BlockSpec((1, 1, Np), lambda m: (m, 0, 0))),
        compiler_params=pltpu.CompilerParams(
            dimension_semantics=("parallel",),
            vmem_limit_bytes=_VMEM_LIMIT),
    )(*args)
    return y[:M], jnp.sum(psum, axis=(0, 1)), jnp.sum(psq, axis=(0, 1))


# --------------------------------------------------------------------------
# Kernel 2: 3x3 grouped/strided conv with fused BN1-affine+ReLU prologue,
#           in-VMEM im2col (single MXU matmul), fused BN2 stats epilogue.
# --------------------------------------------------------------------------

def _conv3x3_kernel(x_ref, w_ref, s_ref, b_ref, y_ref, sum_ref, sq_ref, *,
                    Ho, Wo, Hp, Wp, stride, cdt):
    cig = x_ref.shape[-1]

    # Prologue: relu(x * scale + shift) of the previous BN, then re-zero the
    # 1-px halo (static border mask) so the conv's zero padding is preserved.
    x = x_ref[0, 0].astype(jnp.float32)                       # (Hp, Wp, cig)
    x = jnp.maximum(x * s_ref[0] + b_ref[0], 0.0)
    row = lax.broadcasted_iota(jnp.int32, (Hp, Wp, 1), 0)
    col = lax.broadcasted_iota(jnp.int32, (Hp, Wp, 1), 1)
    interior = (row >= 1) & (row <= Hp - 2) & (col >= 1) & (col <= Wp - 2)
    x = jnp.where(interior, x, 0.0).astype(cdt)

    # im2col in VMEM: concatenate the 9 shifted windows on the channel axis and
    # do ONE matmul with K = 9*cig (instead of 9 tiny K = cig dots).
    taps = []
    for kh in range(3):
        for kw in range(3):
            xs = x[kh:kh + (Ho - 1) * stride + 1,
                   kw:kw + (Wo - 1) * stride + 1, :]
            if stride > 1:
                # TODO(synk): stride>1 window subsample is implemented but not
                # exercised by the demo below; validate before production use.
                xs = xs[::stride, ::stride, :]
            taps.append(xs)
    patch = jnp.concatenate(taps, axis=-1).reshape(Ho * Wo, 9 * cig)
    acc = jnp.dot(patch, w_ref[0], preferred_element_type=jnp.float32)

    y_ref[0, 0] = acc.astype(y_ref.dtype)
    # Per-(group, batch) partial stats; reduced over batch outside -> both grid
    # axes stay "parallel" (megacore-safe).
    sum_ref[0, 0] = jnp.sum(acc, axis=0, keepdims=True)
    sq_ref[0, 0] = jnp.sum(acc * acc, axis=0, keepdims=True)


def pallas_conv3x3_bn(a_nhwc, w_torch, sc_prev, sh_prev, *, stride, groups,
                      compute_dtype, out_dtype):
    """a_nhwc: (N, H, W, mid) *raw* conv1 output (pre-BN); BN1 affine+ReLU is
    applied inside this kernel.  w_torch: (mid, mid//groups, 3, 3).
    Returns (y2 (N*Ho*Wo, mid), sum (mid,), sumsq (mid,), Ho, Wo)."""
    N, H, W, mid = a_nhwc.shape
    cig = mid // groups
    cog = w_torch.shape[0] // groups
    Ho = (H + 2 - 3) // stride + 1
    Wo = (W + 2 - 3) // stride + 1
    Hp, Wp = H + 2, W + 2

    # Spatial zero pad (in the narrow store dtype) + group-major relayout.
    xp = jnp.pad(a_nhwc, ((0, 0), (1, 1), (1, 1), (0, 0)))
    xg = jnp.transpose(xp.reshape(N, Hp, Wp, groups, cig), (3, 0, 1, 2, 4))

    # Weights: (G, 9*cig, cog), row index = (kh*3+kw)*cig + ci.
    wg = w_torch.reshape(groups, cog, cig, 3, 3)
    wg = jnp.transpose(wg, (0, 3, 4, 2, 1)).reshape(groups, 9 * cig, cog)
    wg = wg.astype(compute_dtype)

    sg = sc_prev.astype(jnp.float32).reshape(groups, 1, cig)
    bg = sh_prev.astype(jnp.float32).reshape(groups, 1, cig)

    kernel = functools.partial(_conv3x3_kernel, Ho=Ho, Wo=Wo, Hp=Hp, Wp=Wp,
                               stride=stride, cdt=compute_dtype)
    y, s, sq = pl.pallas_call(
        kernel,
        out_shape=(jax.ShapeDtypeStruct((groups, N, Ho * Wo, cog), out_dtype),
                   jax.ShapeDtypeStruct((groups, N, 1, cog), jnp.float32),
                   jax.ShapeDtypeStruct((groups, N, 1, cog), jnp.float32)),
        grid=(groups, N),
        in_specs=[pl.BlockSpec((1, 1, Hp, Wp, cig), lambda g, n: (g, n, 0, 0, 0)),
                  pl.BlockSpec((1, 9 * cig, cog), lambda g, n: (g, 0, 0)),
                  pl.BlockSpec((1, 1, cig), lambda g, n: (g, 0, 0)),
                  pl.BlockSpec((1, 1, cig), lambda g, n: (g, 0, 0))],
        out_specs=(pl.BlockSpec((1, 1, Ho * Wo, cog), lambda g, n: (g, n, 0, 0)),
                   pl.BlockSpec((1, 1, 1, cog), lambda g, n: (g, n, 0, 0)),
                   pl.BlockSpec((1, 1, 1, cog), lambda g, n: (g, n, 0, 0))),
        compiler_params=pltpu.CompilerParams(
            dimension_semantics=("parallel", "parallel"),
            vmem_limit_bytes=_VMEM_LIMIT),
    )(xg, wg, sg, bg)

    y2 = jnp.transpose(y, (1, 2, 0, 3)).reshape(N * Ho * Wo, groups * cog)
    s = jnp.sum(s, axis=1).reshape(groups * cog)
    sq = jnp.sum(sq, axis=1).reshape(groups * cog)
    return y2, s, sq, Ho, Wo


# --------------------------------------------------------------------------
# Kernel 3: fused BN3 affine + residual BN affine + add + ReLU (lane-dense).
# --------------------------------------------------------------------------

def _residual_out_kernel(y_ref, r_ref, sy_ref, by_ref, sr_ref, br_ref, o_ref):
    y = y_ref[...].astype(jnp.float32) * sy_ref[...] + by_ref[...]
    r = r_ref[...].astype(jnp.float32) * sr_ref[...] + br_ref[...]
    o_ref[...] = jnp.maximum(y + r, 0.0)


def pallas_bn_add_relu(y, sy, by, r, sr, br):
    M, C = y.shape                       # C is already a multiple of 128
    tm = 512
    while tm > 8 and (3 * 2 * tm * C * 4 + 4 * C * 4) > _VMEM_BUDGET:
        tm //= 2
    tm = min(tm, _round_up(M, 8))
    M_pad = _round_up(M, tm)
    if M_pad != M:
        y = jnp.pad(y, ((0, M_pad - M), (0, 0)))
        r = jnp.pad(r, ((0, M_pad - M), (0, 0)))
    rows = [v.astype(jnp.float32)[None, :] for v in (sy, by, sr, br)]

    out = pl.pallas_call(
        _residual_out_kernel,
        out_shape=jax.ShapeDtypeStruct((M_pad, C), jnp.float32),
        grid=(M_pad // tm,),
        in_specs=[pl.BlockSpec((tm, C), lambda i: (i, 0)),
                  pl.BlockSpec((tm, C), lambda i: (i, 0)),
                  pl.BlockSpec((1, C), lambda i: (0, 0)),
                  pl.BlockSpec((1, C), lambda i: (0, 0)),
                  pl.BlockSpec((1, C), lambda i: (0, 0)),
                  pl.BlockSpec((1, C), lambda i: (0, 0))],
        out_specs=pl.BlockSpec((tm, C), lambda i: (i, 0)),
        compiler_params=pltpu.CompilerParams(
            dimension_semantics=("parallel",),
            vmem_limit_bytes=_VMEM_LIMIT),
    )(y, r, *rows)
    return out[:M]


# --------------------------------------------------------------------------
# Block forward
# --------------------------------------------------------------------------

def bottleneck_block(x_nchw, params, *, stride=1, groups=1,
                     compute_dtype=jnp.bfloat16):
    store_dtype = compute_dtype                     # inter-kernel HBM dtype
    N, Cin, H, W = x_nchw.shape
    x_nhwc = jnp.transpose(x_nchw, (0, 2, 3, 1))
    x_flat = x_nhwc.reshape(N * H * W, Cin).astype(store_dtype)

    # conv1 (1x1) + fused BN1 stats (output lane-padded to a multiple of 128).
    w1 = params['w1'][:, :, 0, 0].T                               # (Cin, mid)
    mid = w1.shape[1]
    midp = _round_up(mid, LANE)
    y1, s1, q1 = pallas_conv1x1_bn(x_flat, w1, compute_dtype=compute_dtype,
                                   out_dtype=store_dtype)
    sc1, sh1 = _bn_scale_shift(s1, q1, N * H * W,
                               _pad_vec(params['g1'], midp, 1.0),
                               _pad_vec(params['b1'], midp, 0.0))

    # conv2 (3x3 grouped/strided): BN1 affine + ReLU fused into its prologue
    # (halo re-zeroed in-kernel), BN2 stats fused into its epilogue.
    a1 = y1[:, :mid].reshape(N, H, W, mid)
    y2, s2, q2, Ho, Wo = pallas_conv3x3_bn(
        a1, params['w2'].astype(jnp.float32), sc1[:mid], sh1[:mid],
        stride=stride, groups=groups,
        compute_dtype=compute_dtype, out_dtype=store_dtype)
    M1 = N * Ho * Wo
    sc2, sh2 = _bn_scale_shift(s2, q2, M1, params['g2'], params['b2'])

    # conv3 (1x1) with fused BN2 affine+ReLU prologue + fused BN3 stats.
    w3 = params['w3'][:, :, 0, 0].T                               # (mid, Cout)
    Cout = w3.shape[1]
    outp = _round_up(Cout, LANE)
    y3, s3, q3 = pallas_conv1x1_bn(y2, w3, prologue=(sc2, sh2),
                                   compute_dtype=compute_dtype,
                                   out_dtype=store_dtype)
    sc3, sh3 = _bn_scale_shift(s3, q3, M1,
                               _pad_vec(params['g3'], outp, 1.0),
                               _pad_vec(params['b3'], outp, 0.0))

    # residual path
    if 'wr' in params:
        if stride > 1:
            xs = x_nhwc[:, ::stride, ::stride, :].reshape(M1, Cin)
            xs = xs.astype(store_dtype)
        else:
            xs = x_flat
        wr = params['wr'][:, :, 0, 0].T
        r, sr, qr = pallas_conv1x1_bn(xs, wr, compute_dtype=compute_dtype,
                                      out_dtype=store_dtype)
        scr, shr = _bn_scale_shift(sr, qr, M1,
                                   _pad_vec(params['gr'], outp, 1.0),
                                   _pad_vec(params['br'], outp, 0.0))
    else:
        assert stride == 1 and Cin == Cout, \
            "identity residual requires stride == 1 and Cin == Cout"
        r = x_flat if Cin == outp else jnp.pad(x_flat, ((0, 0), (0, outp - Cin)))
        scr = jnp.ones((outp,), jnp.float32)
        shr = jnp.zeros((outp,), jnp.float32)

    # bn3 affine + residual BN affine + add + relu, fused, lane-dense.
    out = pallas_bn_add_relu(y3, sc3, sh3, r, scr, shr)
    out = out[:, :Cout].reshape(N, Ho, Wo, Cout)
    return jnp.transpose(out, (0, 3, 1, 2))                       # NCHW


# --------------------------------------------------------------------------
# Plain-JAX reference (PyTorch training-mode BN semantics)
# --------------------------------------------------------------------------

def _ref_conv(x_nhwc, w_torch, stride=1, groups=1, padding='VALID'):
    wh = jnp.transpose(w_torch, (2, 3, 1, 0))                     # HWIO
    return lax.conv_general_dilated(
        x_nhwc, wh, (stride, stride), padding,
        dimension_numbers=('NHWC', 'HWIO', 'NHWC'),
        feature_group_count=groups)


def _ref_bn(y, gamma, beta):
    mean = jnp.mean(y, axis=(0, 1, 2))
    var = jnp.var(y, axis=(0, 1, 2))
    return (y - mean) / jnp.sqrt(var + EPS) * gamma + beta


def ref_forward(x_nchw, params, stride=1, groups=1):
    x = jnp.transpose(x_nchw, (0, 2, 3, 1))
    y = jax.nn.relu(_ref_bn(_ref_conv(x, params['w1']),
                            params['g1'], params['b1']))
    y = jax.nn.relu(_ref_bn(_ref_conv(y, params['w2'], stride, groups,
                                      padding=((1, 1), (1, 1))),
                            params['g2'], params['b2']))
    y = _ref_bn(_ref_conv(y, params['w3']), params['g3'], params['b3'])
    if 'wr' in params:
        r = _ref_bn(_ref_conv(x, params['wr'], stride),
                    params['gr'], params['br'])
    else:
        r = x
    return jnp.transpose(jax.nn.relu(y + r), (0, 3, 1, 2))


# --------------------------------------------------------------------------
# main
# --------------------------------------------------------------------------

def _make_params(key, in_c, out_c, groups, expansion=4):
    mid = out_c // expansion
    ks = jax.random.split(key, 13)
    p = {
        'w1': 0.1 * jax.random.normal(ks[0], (mid, in_c, 1, 1), jnp.float32),
        'g1': 1.0 + 0.1 * jax.random.normal(ks[1], (mid,), jnp.float32),
        'b1': 0.1 * jax.random.normal(ks[2], (mid,), jnp.float32),
        'w2': 0.1 * jax.random.normal(ks[3], (mid, mid // groups, 3, 3), jnp.float32),
        'g2': 1.0 + 0.1 * jax.random.normal(ks[4], (mid,), jnp.float32),
        'b2': 0.1 * jax.random.normal(ks[5], (mid,), jnp.float32),
        'w3': 0.1 * jax.random.normal(ks[6], (out_c, mid, 1, 1), jnp.float32),
        'g3': 1.0 + 0.1 * jax.random.normal(ks[7], (out_c,), jnp.float32),
        'b3': 0.1 * jax.random.normal(ks[8], (out_c,), jnp.float32),
    }
    if in_c != out_c:
        p['wr'] = 0.1 * jax.random.normal(ks[9], (out_c, in_c, 1, 1), jnp.float32)
        p['gr'] = 1.0 + 0.1 * jax.random.normal(ks[10], (out_c,), jnp.float32)
        p['br'] = 0.1 * jax.random.normal(ks[11], (out_c,), jnp.float32)
    return p, ks[12]


def _rel_l2(a, b):
    return float(jnp.linalg.norm(a - b) / (jnp.linalg.norm(b) + 1e-12))


if __name__ == "__main__":
    N, H, W = 2, 16, 16

    # ---- Config A: projection residual (ResNet-style), stride=1, groups=1 ----
    in_c, out_c, stride, groups = 8, 32, 1, 1
    params, kx = _make_params(jax.random.PRNGKey(0), in_c, out_c, groups)
    x = jax.random.normal(kx, (N, in_c, H, W), jnp.float32)
    ref = ref_forward(x, params, stride=stride, groups=groups)

    # f32 intermediates/compute: tight-ish check (both paths use default
    # matmul precision, so tolerance accounts for MXU rounding, not layout bugs).
    fwd32 = jax.jit(functools.partial(bottleneck_block, stride=stride,
                                      groups=groups, compute_dtype=jnp.float32))
    out32 = jax.block_until_ready(fwd32(x, params))
    assert out32.shape == (N, out_c, H // stride, W // stride), out32.shape
    rel32 = _rel_l2(out32, ref)
    assert rel32 < 1e-2, rel32

    # bf16 MXU + bf16 HBM intermediates (perf configuration).
    fwd16 = jax.jit(functools.partial(bottleneck_block, stride=stride,
                                      groups=groups, compute_dtype=jnp.bfloat16))
    out16 = jax.block_until_ready(fwd16(x, params))
    rel16 = _rel_l2(out16, ref)
    assert rel16 < 4e-2, rel16

    # ---- Config B: identity residual + grouped 3x3 (ResNeXt-style) ----
    in_c2 = out_c2 = 32
    groups2 = 2
    params2, kx2 = _make_params(jax.random.PRNGKey(1), in_c2, out_c2, groups2)
    x2 = jax.random.normal(kx2, (N, in_c2, H, W), jnp.float32)
    ref2 = ref_forward(x2, params2, stride=1, groups=groups2)
    fwd2 = jax.jit(functools.partial(bottleneck_block, stride=1, groups=groups2,
                                     compute_dtype=jnp.bfloat16))
    out2 = jax.block_until_ready(fwd2(x2, params2))
    assert out2.shape == (N, out_c2, H, W), out2.shape
    rel2 = _rel_l2(out2, ref2)
    assert rel2 < 4e-2, rel2

    print("KERNEL_OK")
</pallas_src>

<mosaic_0001>
module attributes {stable_mosaic.version = 11 : i64} {
  func.func @_mm_bn_kernel(%arg0: i32, %arg1: memref<512x8xf32, #tpu.memory_space<vmem>>, %arg2: memref<8x128xf32, #tpu.memory_space<vmem>>, %arg3: memref<512x128xf32, #tpu.memory_space<vmem>>, %arg4: memref<1x1x128xf32, #tpu.memory_space<vmem>>, %arg5: memref<1x1x128xf32, #tpu.memory_space<vmem>>) attributes {dimension_semantics = [#tpu.dimension_semantics<parallel>], iteration_bounds = array<i64: 1>, scalar_prefetch = 0 : i64, scratch_operands = 0 : i64, tpu.core_type = #tpu.core_type<tc>, window_params = [{transform_indices = @transform_0, window_bounds = array<i64: 512, 8>}, {pipeline_mode = #tpu.pipeline_mode<synchronous>, transform_indices = @transform_1, window_bounds = array<i64: 8, 128>}, {transform_indices = @transform_2, window_bounds = array<i64: 512, 128>}, {transform_indices = @transform_3, window_bounds = array<i64: 1, 1, 128>}, {transform_indices = @transform_4, window_bounds = array<i64: 1, 1, 128>}]} {
    %c0 = arith.constant 0 : index
    %c0_0 = arith.constant 0 : index
    %0 = vector.load %arg1[%c0, %c0_0] : memref<512x8xf32, #tpu.memory_space<vmem>>, vector<512x8xf32>
    %c0_1 = arith.constant 0 : index
    %c0_2 = arith.constant 0 : index
    %1 = vector.load %arg2[%c0_1, %c0_2] : memref<8x128xf32, #tpu.memory_space<vmem>>, vector<8x128xf32>
    %cst = arith.constant dense<0.000000e+00> : vector<512x128xf32>
    %2 = tpu.matmul %0, %1, %cst {dimension_numbers = #tpu.dot_dimension_numbers<[1], [0], [0], [1], [0, 0, 1, 1], [], []>} : vector<512x8xf32>, vector<8x128xf32>, vector<512x128xf32> -> vector<512x128xf32>
    %c0_3 = arith.constant 0 : index
    %c0_4 = arith.constant 0 : index
    %3 = vector.load %arg3[%c0_3, %c0_4] : memref<512x128xf32, #tpu.memory_space<vmem>>, vector<512x128xf32>
    tpu.vector_store %arg3[%c0_3, %c0_4], %2 {strides = array<i32>} : memref<512x128xf32, #tpu.memory_space<vmem>>, vector<512x128xf32>,
    %cst_5 = arith.constant dense<0.000000e+00> : vector<128xf32>
    %4 = vector.multi_reduction <add>, %2, %cst_5 [0] : vector<512x128xf32> to vector<128xf32>
    %5 = vector.shape_cast %4 : vector<128xf32> to vector<1x128xf32>
    %c0_6 = arith.constant 0 : index
    %c0_7 = arith.constant 0 : index
    %c0_8 = arith.constant 0 : index
    %6 = vector.load %arg4[%c0_6, %c0_7, %c0_8] : memref<1x1x128xf32, #tpu.memory_space<vmem>>, vector<1x1x128xf32>
    %7 = vector.shape_cast %6 : vector<1x1x128xf32> to vector<1x128xf32>
    %8 = vector.shape_cast %5 : vector<1x128xf32> to vector<1x1x128xf32>
    tpu.vector_store %arg4[%c0_6, %c0_7, %c0_8], %8 {strides = array<i32>} : memref<1x1x128xf32, #tpu.memory_space<vmem>>, vector<1x1x128xf32>,
    %9 = arith.mulf %2, %2 : vector<512x128xf32>
    %cst_9 = arith.constant dense<0.000000e+00> : vector<128xf32>
    %10 = vector.multi_reduction <add>, %9, %cst_9 [0] : vector<512x128xf32> to vector<128xf32>
    %11 = vector.shape_cast %10 : vector<128xf32> to vector<1x128xf32>
    %c0_10 = arith.constant 0 : index
    %c0_11 = arith.constant 0 : index
    %c0_12 = arith.constant 0 : index
    %12 = vector.load %arg5[%c0_10, %c0_11, %c0_12] : memref<1x1x128xf32, #tpu.memory_space<vmem>>, vector<1x1x128xf32>
    %13 = vector.shape_cast %12 : vector<1x1x128xf32> to vector<1x128xf32>
    %14 = vector.shape_cast %11 : vector<1x128xf32> to vector<1x1x128xf32>
    tpu.vector_store %arg5[%c0_10, %c0_11, %c0_12], %14 {strides = array<i32>} : memref<1x1x128xf32, #tpu.memory_space<vmem>>, vector<1x1x128xf32>,
    return
  }
  func.func @transform_0(%arg0: i32) -> (i32, i32) {
    %c0_i32 = arith.constant 0 : i32
    %c0_i32_0 = arith.constant 0 : i32
    return %arg0, %c0_i32 : i32, i32
  }
  func.func @transform_1(%arg0: i32) -> (i32, i32) {
    %c0_i32 = arith.constant 0 : i32
    %c0_i32_0 = arith.constant 0 : i32
    %c0_i32_1 = arith.constant 0 : i32
    return %c0_i32, %c0_i32_0 : i32, i32
  }
  func.func @transform_2(%arg0: i32) -> (i32, i32) {
    %c0_i32 = arith.constant 0 : i32
    %c0_i32_0 = arith.constant 0 : i32
    return %arg0, %c0_i32 : i32, i32
  }
  func.func @transform_3(%arg0: i32) -> (i32, i32, i32) {
    %c0_i32 = arith.constant 0 : i32
    %c0_i32_0 = arith.constant 0 : i32
    %c0_i32_1 = arith.constant 0 : i32
    return %arg0, %c0_i32, %c0_i32_0 : i32, i32, i32
  }
  func.func @transform_4(%arg0: i32) -> (i32, i32, i32) {
    %c0_i32 = arith.constant 0 : i32
    %c0_i32_0 = arith.constant 0 : i32
    %c0_i32_1 = arith.constant 0 : i32
    return %arg0, %c0_i32, %c0_i32_0 : i32, i32, i32
  }
}

module attributes {stable_mosaic.version = 11 : i64} {
  func.func @_conv3x3_kernel(%arg0: i32, %arg1: i32, %arg2: memref<1x1x18x18x8xf32, #tpu.memory_space<vmem>>, %arg3: memref<1x72x8xf32, #tpu.memory_space<vmem>>, %arg4: memref<1x1x8xf32, #tpu.memory_space<vmem>>, %arg5: memref<1x1x8xf32, #tpu.memory_space<vmem>>, %arg6: memref<1x1x256x8xf32, #tpu.memory_space<vmem>>, %arg7: memref<1x1x1x8xf32, #tpu.memory_space<vmem>>, %arg8: memref<1x1x1x8xf32, #tpu.memory_space<vmem>>) attributes {dimension_semantics = [#tpu.dimension_semantics<parallel>, #tpu.dimension_semantics<parallel>], iteration_bounds = array<i64: 1, 2>, scalar_prefetch = 0 : i64, scratch_operands = 0 : i64, tpu.core_type = #tpu.core_type<tc>, window_params = [{transform_indices = @transform_0, window_bounds = array<i64: 1, 1, 18, 18, 8>}, {transform_indices = @transform_1, window_bounds = array<i64: 1, 72, 8>}, {transform_indices = @transform_2, window_bounds = array<i64: 1, 1, 8>}, {transform_indices = @transform_3, window_bounds = array<i64: 1, 1, 8>}, {transform_indices = @transform_4, window_bounds = array<i64: 1, 1, 256, 8>}, {transform_indices = @transform_5, window_bounds = array<i64: 1, 1, 1, 8>}, {transform_indices = @transform_6, window_bounds = array<i64: 1, 1, 1, 8>}]} {
    %c0 = arith.constant 0 : index
    %c0_0 = arith.constant 0 : index
    %c0_1 = arith.constant 0 : index
    %c0_2 = arith.constant 0 : index
    %c0_3 = arith.constant 0 : index
    %0 = vector.load %arg2[%c0, %c0_0, %c0_1, %c0_2, %c0_3] : memref<1x1x18x18x8xf32, #tpu.memory_space<vmem>>, vector<1x1x18x18x8xf32>
    %1 = vector.shape_cast %0 : vector<1x1x18x18x8xf32> to vector<18x18x8xf32>
    %c0_4 = arith.constant 0 : index
    %c0_5 = arith.constant 0 : index
    %c0_6 = arith.constant 0 : index
    %2 = vector.load %arg4[%c0_4, %c0_5, %c0_6] : memref<1x1x8xf32, #tpu.memory_space<vmem>>, vector<1x1x8xf32>
    %3 = vector.shape_cast %2 : vector<1x1x8xf32> to vector<1x8xf32>
    %4 = vector.shape_cast %3 : vector<1x8xf32> to vector<1x1x8xf32>
    %5 = vector.broadcast %4 : vector<1x1x8xf32> to vector<18x18x8xf32>
    %6 = arith.mulf %1, %5 : vector<18x18x8xf32>
    %c0_7 = arith.constant 0 : index
    %c0_8 = arith.constant 0 : index
    %c0_9 = arith.constant 0 : index
    %7 = vector.load %arg5[%c0_7, %c0_8, %c0_9] : memref<1x1x8xf32, #tpu.memory_space<vmem>>, vector<1x1x8xf32>
    %8 = vector.shape_cast %7 : vector<1x1x8xf32> to vector<1x8xf32>
    %9 = vector.shape_cast %8 : vector<1x8xf32> to vector<1x1x8xf32>
    %10 = vector.broadcast %9 : vector<1x1x8xf32> to vector<18x18x8xf32>
    %11 = arith.addf %6, %10 : vector<18x18x8xf32>
    %cst = arith.constant 0.000000e+00 : f32
    %12 = vector.broadcast %cst : f32 to vector<18x18x8xf32>
    %13 = arith.maximumf %11, %12 : vector<18x18x8xf32>
    %14 = tpu.iota {dimensions = array<i32: 0>} : vector<18x18x1xi32>
    %15 = tpu.iota {dimensions = array<i32: 1>} : vector<18x18x1xi32>
    %c1_i32 = arith.constant 1 : i32
    %16 = vector.broadcast %c1_i32 : i32 to vector<18x18x1xi32>
    %17 = arith.cmpi sge, %14, %16 : vector<18x18x1xi32>
    %c16_i32 = arith.constant 16 : i32
    %18 = vector.broadcast %c16_i32 : i32 to vector<18x18x1xi32>
    %19 = arith.cmpi sle, %14, %18 : vector<18x18x1xi32>
    %20 = arith.andi %17, %19 : vector<18x18x1xi1>
    %c1_i32_10 = arith.constant 1 : i32
    %21 = vector.broadcast %c1_i32_10 : i32 to vector<18x18x1xi32>
    %22 = arith.cmpi sge, %15, %21 : vector<18x18x1xi32>
    %23 = arith.andi %20, %22 : vector<18x18x1xi1>
    %c16_i32_11 = arith.constant 16 : i32
    %24 = vector.broadcast %c16_i32_11 : i32 to vector<18x18x1xi32>
    %25 = arith.cmpi sle, %15, %24 : vector<18x18x1xi32>
    %26 = arith.andi %23, %25 : vector<18x18x1xi1>
    %cst_12 = arith.constant 0.000000e+00 : f32
    %27 = vector.shape_cast %26 : vector<18x18x1xi1> to vector<18x18x1xi1>
    %28 = vector.broadcast %27 : vector<18x18x1xi1> to vector<18x18x8xi1>
    %29 = vector.broadcast %cst_12 : f32 to vector<18x18x8xf32>
    %30 = arith.select %28, %13, %29 : vector<18x18x8xi1>, vector<18x18x8xf32>
    %31 = vector.extract_strided_slice %30 {offsets = [0, 0, 0], sizes = [16, 16, 8], strides = [1, 1, 1]} : vector<18x18x8xf32> to vector<16x16x8xf32>
    %32 = vector.extract_strided_slice %30 {offsets = [0, 1, 0], sizes = [16, 16, 8], strides = [1, 1, 1]} : vector<18x18x8xf32> to vector<16x16x8xf32>
    %33 = vector.extract_strided_slice %30 {offsets = [0, 2, 0], sizes = [16, 16, 8], strides = [1, 1, 1]} : vector<18x18x8xf32> to vector<16x16x8xf32>
    %34 = vector.extract_strided_slice %30 {offsets = [1, 0, 0], sizes = [16, 16, 8], strides = [1, 1, 1]} : vector<18x18x8xf32> to vector<16x16x8xf32>
    %35 = vector.extract_strided_slice %30 {offsets = [1, 1, 0], sizes = [16, 16, 8], strides = [1, 1, 1]} : vector<18x18x8xf32> to vector<16x16x8xf32>
    %36 = vector.extract_strided_slice %30 {offsets = [1, 2, 0], sizes = [16, 16, 8], strides = [1, 1, 1]} : vector<18x18x8xf32> to vector<16x16x8xf32>
    %37 = vector.extract_strided_slice %30 {offsets = [2, 0, 0], sizes = [16, 16, 8], strides = [1, 1, 1]} : vector<18x18x8xf32> to vector<16x16x8xf32>
    %38 = vector.extract_strided_slice %30 {offsets = [2, 1, 0], sizes = [16, 16, 8], strides = [1, 1, 1]} : vector<18x18x8xf32> to vector<16x16x8xf32>
    %39 = vector.extract_strided_slice %30 {offsets = [2, 2, 0], sizes = [16, 16, 8], strides = [1, 1, 1]} : vector<18x18x8xf32> to vector<16x16x8xf32>
    %40 = tpu.concatenate %31, %32, %33, %34, %35, %36, %37, %38, %39 in 2 : vector<16x16x8xf32>, vector<16x16x8xf32>, vector<16x16x8xf32>, vector<16x16x8xf32>, vector<16x16x8xf32>, vector<16x16x8xf32>, vector<16x16x8xf32>, vector<16x16x8xf32>, vector<16x16x8xf32> -> vector<16x16x72xf32>
    %41 = vector.shape_cast %40 : vector<16x16x72xf32> to vector<256x72xf32>
    %c0_13 = arith.constant 0 : index
    %c0_14 = arith.constant 0 : index
    %c0_15 = arith.constant 0 : index
    %42 = vector.load %arg3[%c0_13, %c0_14, %c0_15] : memref<1x72x8xf32, #tpu.memory_space<vmem>>, vector<1x72x8xf32>
    %43 = vector.shape_cast %42 : vector<1x72x8xf32> to vector<72x8xf32>
    %cst_16 = arith.constant dense<0.000000e+00> : vector<256x8xf32>
    %44 = tpu.matmul %41, %43, %cst_16 {dimension_numbers = #tpu.dot_dimension_numbers<[1], [0], [0], [1], [0, 0, 1, 1], [], []>} : vector<256x72xf32>, vector<72x8xf32>, vector<256x8xf32> -> vector<256x8xf32>
    %c0_17 = arith.constant 0 : index
    %c0_18 = arith.constant 0 : index
    %c0_19 = arith.constant 0 : index
    %c0_20 = arith.constant 0 : index
    %45 = vector.load %arg6[%c0_17, %c0_18, %c0_19, %c0_20] : memref<1x1x256x8xf32, #tpu.memory_space<vmem>>, vector<1x1x256x8xf32>
    %46 = vector.shape_cast %45 : vector<1x1x256x8xf32> to vector<256x8xf32>
    %47 = vector.shape_cast %44 : vector<256x8xf32> to vector<1x1x256x8xf32>
    tpu.vector_store %arg6[%c0_17, %c0_18, %c0_19, %c0_20], %47 {strides = array<i32>} : memref<1x1x256x8xf32, #tpu.memory_space<vmem>>, vector<1x1x256x8xf32>,
    %cst_21 = arith.constant dense<0.000000e+00> : vector<8xf32>
    %48 = vector.multi_reduction <add>, %44, %cst_21 [0] : vector<256x8xf32> to vector<8xf32>
    %49 = vector.shape_cast %48 : vector<8xf32> to vector<1x8xf32>
    %c0_22 = arith.constant 0 : index
    %c0_23 = arith.constant 0 : index
    %c0_24 = arith.constant 0 : index
    %c0_25 = arith.constant 0 : index
    %50 = vector.load %arg7[%c0_22, %c0_23, %c0_24, %c0_25] : memref<1x1x1x8xf32, #tpu.memory_space<vmem>>, vector<1x1x1x8xf32>
    %51 = vector.shape_cast %50 : vector<1x1x1x8xf32> to vector<1x8xf32>
    %52 = vector.shape_cast %49 : vector<1x8xf32> to vector<1x1x1x8xf32>
    tpu.vector_store %arg7[%c0_22, %c0_23, %c0_24, %c0_25], %52 {strides = array<i32>} : memref<1x1x1x8xf32, #tpu.memory_space<vmem>>, vector<1x1x1x8xf32>,
    %53 = arith.mulf %44, %44 : vector<256x8xf32>
    %cst_26 = arith.constant dense<0.000000e+00> : vector<8xf32>
    %54 = vector.multi_reduction <add>, %53, %cst_26 [0] : vector<256x8xf32> to vector<8xf32>
    %55 = vector.shape_cast %54 : vector<8xf32> to vector<1x8xf32>
    %c0_27 = arith.constant 0 : index
    %c0_28 = arith.constant 0 : index
    %c0_29 = arith.constant 0 : index
    %c0_30 = arith.constant 0 : index
    %56 = vector.load %arg8[%c0_27, %c0_28, %c0_29, %c0_30] : memref<1x1x1x8xf32, #tpu.memory_space<vmem>>, vector<1x1x1x8xf32>
    %57 = vector.shape_cast %56 : vector<1x1x1x8xf32> to vector<1x8xf32>
    %58 = vector.shape_cast %55 : vector<1x8xf32> to vector<1x1x1x8xf32>
    tpu.vector_store %arg8[%c0_27, %c0_28, %c0_29, %c0_30], %58 {strides = array<i32>} : memref<1x1x1x8xf32, #tpu.memory_space<vmem>>, vector<1x1x1x8xf32>,
    return
  }
  func.func @transform_0(%arg0: i32, %arg1: i32) -> (i32, i32, i32, i32, i32) {
    %c0_i32 = arith.constant 0 : i32
    %c0_i32_0 = arith.constant 0 : i32
    %c0_i32_1 = arith.constant 0 : i32
    %c0_i32_2 = arith.constant 0 : i32
    return %arg0, %arg1, %c0_i32, %c0_i32_0, %c0_i32_1 : i32, i32, i32, i32, i32
  }
  func.func @transform_1(%arg0: i32, %arg1: i32) -> (i32, i32, i32) {
    %c0_i32 = arith.constant 0 : i32
    %c0_i32_0 = arith.constant 0 : i32
    %c0_i32_1 = arith.constant 0 : i32
    return %arg0, %c0_i32, %c0_i32_0 : i32, i32, i32
  }
  func.func @transform_2(%arg0: i32, %arg1: i32) -> (i32, i32, i32) {
    %c0_i32 = arith.constant 0 : i32
    %c0_i32_0 = arith.constant 0 : i32
    %c0_i32_1 = arith.constant 0 : i32
    return %arg0, %c0_i32, %c0_i32_0 : i32, i32, i32
  }
  func.func @transform_3(%arg0: i32, %arg1: i32) -> (i32, i32, i32) {
    %c0_i32 = arith.constant 0 : i32
    %c0_i32_0 = arith.constant 0 : i32
    %c0_i32_1 = arith.constant 0 : i32
    return %arg0, %c0_i32, %c0_i32_0 : i32, i32, i32
  }
  func.func @transform_4(%arg0: i32, %arg1: i32) -> (i32, i32, i32, i32) {
    %c0_i32 = arith.constant 0 : i32
    %c0_i32_0 = arith.constant 0 : i32
    %c0_i32_1 = arith.constant 0 : i32
    return %arg0, %arg1, %c0_i32, %c0_i32_0 : i32, i32, i32, i32
  }
  func.func @transform_5(%arg0: i32, %arg1: i32) -> (i32, i32, i32, i32) {
    %c0_i32 = arith.constant 0 : i32
    %c0_i32_0 = arith.constant 0 : i32
    %c0_i32_1 = arith.constant 0 : i32
    return %arg0, %arg1, %c0_i32, %c0_i32_0 : i32, i32, i32, i32
  }
  func.func @transform_6(%arg0: i32, %arg1: i32) -> (i32, i32, i32, i32) {
    %c0_i32 = arith.constant 0 : i32
    %c0_i32_0 = arith.constant 0 : i32
    %c0_i32_1 = arith.constant 0 : i32
    return %arg0, %arg1, %c0_i32, %c0_i32_0 : i32, i32, i32, i32
  }
}

module attributes {stable_mosaic.version = 11 : i64} {
  func.func @_mm_bn_kernel(%arg0: i32, %arg1: memref<512x8xf32, #tpu.memory_space<vmem>>, %arg2: memref<8x128xf32, #tpu.memory_space<vmem>>, %arg3: memref<1x8xf32, #tpu.memory_space<vmem>>, %arg4: memref<1x8xf32, #tpu.memory_space<vmem>>, %arg5: memref<512x128xf32, #tpu.memory_space<vmem>>, %arg6: memref<1x1x128xf32, #tpu.memory_space<vmem>>, %arg7: memref<1x1x128xf32, #tpu.memory_space<vmem>>) attributes {dimension_semantics = [#tpu.dimension_semantics<parallel>], iteration_bounds = array<i64: 1>, scalar_prefetch = 0 : i64, scratch_operands = 0 : i64, tpu.core_type = #tpu.core_type<tc>, window_params = [{transform_indices = @transform_0, window_bounds = array<i64: 512, 8>}, {pipeline_mode = #tpu.pipeline_mode<synchronous>, transform_indices = @transform_1, window_bounds = array<i64: 8, 128>}, {pipeline_mode = #tpu.pipeline_mode<synchronous>, transform_indices = @transform_2, window_bounds = array<i64: 1, 8>}, {pipeline_mode = #tpu.pipeline_mode<synchronous>, transform_indices = @transform_3, window_bounds = array<i64: 1, 8>}, {transform_indices = @transform_4, window_bounds = array<i64: 512, 128>}, {transform_indices = @transform_5, window_bounds = array<i64: 1, 1, 128>}, {transform_indices = @transform_6, window_bounds = array<i64: 1, 1, 128>}]} {
    %c0 = arith.constant 0 : index
    %c0_0 = arith.constant 0 : index
    %0 = vector.load %arg1[%c0, %c0_0] : memref<512x8xf32, #tpu.memory_space<vmem>>, vector<512x8xf32>
    %c0_1 = arith.constant 0 : index
    %c0_2 = arith.constant 0 : index
    %1 = vector.load %arg3[%c0_1, %c0_2] : memref<1x8xf32, #tpu.memory_space<vmem>>, vector<1x8xf32>
    %2 = vector.broadcast %1 : vector<1x8xf32> to vector<512x8xf32>
    %3 = arith.mulf %0, %2 : vector<512x8xf32>
    %c0_3 = arith.constant 0 : index
    %c0_4 = arith.constant 0 : index
    %4 = vector.load %arg4[%c0_3, %c0_4] : memref<1x8xf32, #tpu.memory_space<vmem>>, vector<1x8xf32>
    %5 = vector.broadcast %4 : vector<1x8xf32> to vector<512x8xf32>
    %6 = arith.addf %3, %5 : vector<512x8xf32>
    %cst = arith.constant 0.000000e+00 : f32
    %7 = vector.broadcast %cst : f32 to vector<512x8xf32>
    %8 = arith.maximumf %6, %7 : vector<512x8xf32>
    %c0_5 = arith.constant 0 : index
    %c0_6 = arith.constant 0 : index
    %9 = vector.load %arg2[%c0_5, %c0_6] : memref<8x128xf32, #tpu.memory_space<vmem>>, vector<8x128xf32>
    %cst_7 = arith.constant dense<0.000000e+00> : vector<512x128xf32>
    %10 = tpu.matmul %8, %9, %cst_7 {dimension_numbers = #tpu.dot_dimension_numbers<[1], [0], [0], [1], [0, 0, 1, 1], [], []>} : vector<512x8xf32>, vector<8x128xf32>, vector<512x128xf32> -> vector<512x128xf32>
    %c0_8 = arith.constant 0 : index
    %c0_9 = arith.constant 0 : index
    %11 = vector.load %arg5[%c0_8, %c0_9] : memref<512x128xf32, #tpu.memory_space<vmem>>, vector<512x128xf32>
    tpu.vector_store %arg5[%c0_8, %c0_9], %10 {strides = array<i32>} : memref<512x128xf32, #tpu.memory_space<vmem>>, vector<512x128xf32>,
    %cst_10 = arith.constant dense<0.000000e+00> : vector<128xf32>
    %12 = vector.multi_reduction <add>, %10, %cst_10 [0] : vector<512x128xf32> to vector<128xf32>
    %13 = vector.shape_cast %12 : vector<128xf32> to vector<1x128xf32>
    %c0_11 = arith.constant 0 : index
    %c0_12 = arith.constant 0 : index
    %c0_13 = arith.constant 0 : index
    %14 = vector.load %arg6[%c0_11, %c0_12, %c0_13] : memref<1x1x128xf32, #tpu.memory_space<vmem>>, vector<1x1x128xf32>
    %15 = vector.shape_cast %14 : vector<1x1x128xf32> to vector<1x128xf32>
    %16 = vector.shape_cast %13 : vector<1x128xf32> to vector<1x1x128xf32>
    tpu.vector_store %arg6[%c0_11, %c0_12, %c0_13], %16 {strides = array<i32>} : memref<1x1x128xf32, #tpu.memory_space<vmem>>, vector<1x1x128xf32>,
    %17 = arith.mulf %10, %10 : vector<512x128xf32>
    %cst_14 = arith.constant dense<0.000000e+00> : vector<128xf32>
    %18 = vector.multi_reduction <add>, %17, %cst_14 [0] : vector<512x128xf32> to vector<128xf32>
    %19 = vector.shape_cast %18 : vector<128xf32> to vector<1x128xf32>
    %c0_15 = arith.constant 0 : index
    %c0_16 = arith.constant 0 : index
    %c0_17 = arith.constant 0 : index
    %20 = vector.load %arg7[%c0_15, %c0_16, %c0_17] : memref<1x1x128xf32, #tpu.memory_space<vmem>>, vector<1x1x128xf32>
    %21 = vector.shape_cast %20 : vector<1x1x128xf32> to vector<1x128xf32>
    %22 = vector.shape_cast %19 : vector<1x128xf32> to vector<1x1x128xf32>
    tpu.vector_store %arg7[%c0_15, %c0_16, %c0_17], %22 {strides = array<i32>} : memref<1x1x128xf32, #tpu.memory_space<vmem>>, vector<1x1x128xf32>,
    return
  }
  func.func @transform_0(%arg0: i32) -> (i32, i32) {
    %c0_i32 = arith.constant 0 : i32
    %c0_i32_0 = arith.constant 0 : i32
    return %arg0, %c0_i32 : i32, i32
  }
  func.func @transform_1(%arg0: i32) -> (i32, i32) {
    %c0_i32 = arith.constant 0 : i32
    %c0_i32_0 = arith.constant 0 : i32
    %c0_i32_1 = arith.constant 0 : i32
    return %c0_i32, %c0_i32_0 : i32, i32
  }
  func.func @transform_2(%arg0: i32) -> (i32, i32) {
    %c0_i32 = arith.constant 0 : i32
    %c0_i32_0 = arith.constant 0 : i32
    %c0_i32_1 = arith.constant 0 : i32
    return %c0_i32, %c0_i32_0 : i32, i32
  }
  func.func @transform_3(%arg0: i32) -> (i32, i32) {
    %c0_i32 = arith.constant 0 : i32
    %c0_i32_0 = arith.constant 0 : i32
    %c0_i32_1 = arith.constant 0 : i32
    return %c0_i32, %c0_i32_0 : i32, i32
  }
  func.func @transform_4(%arg0: i32) -> (i32, i32) {
    %c0_i32 = arith.constant 0 : i32
    %c0_i32_0 = arith.constant 0 : i32
    return %arg0, %c0_i32 : i32, i32
  }
  func.func @transform_5(%arg0: i32) -> (i32, i32, i32) {
    %c0_i32 = arith.constant 0 : i32
    %c0_i32_0 = arith.constant 0 : i32
    %c0_i32_1 = arith.constant 0 : i32
    return %arg0, %c0_i32, %c0_i32_0 : i32, i32, i32
  }
  func.func @transform_6(%arg0: i32) -> (i32, i32, i32) {
    %c0_i32 = arith.constant 0 : i32
    %c0_i32_0 = arith.constant 0 : i32
    %c0_i32_1 = arith.constant 0 : i32
    return %arg0, %c0_i32, %c0_i32_0 : i32, i32, i32
  }
}

module attributes {stable_mosaic.version = 11 : i64} {
  func.func @_residual_out_kernel(%arg0: i32, %arg1: memref<512x128xf32, #tpu.memory_space<vmem>>, %arg2: memref<512x128xf32, #tpu.memory_space<vmem>>, %arg3: memref<1x128xf32, #tpu.memory_space<vmem>>, %arg4: memref<1x128xf32, #tpu.memory_space<vmem>>, %arg5: memref<1x128xf32, #tpu.memory_space<vmem>>, %arg6: memref<1x128xf32, #tpu.memory_space<vmem>>, %arg7: memref<512x128xf32, #tpu.memory_space<vmem>>) attributes {dimension_semantics = [#tpu.dimension_semantics<parallel>], iteration_bounds = array<i64: 1>, scalar_prefetch = 0 : i64, scratch_operands = 0 : i64, tpu.core_type = #tpu.core_type<tc>, window_params = [{transform_indices = @transform_0, window_bounds = array<i64: 512, 128>}, {transform_indices = @transform_1, window_bounds = array<i64: 512, 128>}, {pipeline_mode = #tpu.pipeline_mode<synchronous>, transform_indices = @transform_2, window_bounds = array<i64: 1, 128>}, {pipeline_mode = #tpu.pipeline_mode<synchronous>, transform_indices = @transform_3, window_bounds = array<i64: 1, 128>}, {pipeline_mode = #tpu.pipeline_mode<synchronous>, transform_indices = @transform_4, window_bounds = array<i64: 1, 128>}, {pipeline_mode = #tpu.pipeline_mode<synchronous>, transform_indices = @transform_5, window_bounds = array<i64: 1, 128>}, {transform_indices = @transform_6, window_bounds = array<i64: 512, 128>}]} {
    %c0 = arith.constant 0 : index
    %c0_0 = arith.constant 0 : index
    %0 = vector.load %arg1[%c0, %c0_0] : memref<512x128xf32, #tpu.memory_space<vmem>>, vector<512x128xf32>
    %c0_1 = arith.constant 0 : index
    %c0_2 = arith.constant 0 : index
    %1 = vector.load %arg3[%c0_1, %c0_2] : memref<1x128xf32, #tpu.memory_space<vmem>>, vector<1x128xf32>
    %2 = vector.broadcast %1 : vector<1x128xf32> to vector<512x128xf32>
    %3 = arith.mulf %0, %2 : vector<512x128xf32>
    %c0_3 = arith.constant 0 : index
    %c0_4 = arith.constant 0 : index
    %4 = vector.load %arg4[%c0_3, %c0_4] : memref<1x128xf32, #tpu.memory_space<vmem>>, vector<1x128xf32>
    %5 = vector.broadcast %4 : vector<1x128xf32> to vector<512x128xf32>
    %6 = arith.addf %3, %5 : vector<512x128xf32>
    %c0_5 = arith.constant 0 : index
    %c0_6 = arith.constant 0 : index
    %7 = vector.load %arg2[%c0_5, %c0_6] : memref<512x128xf32, #tpu.memory_space<vmem>>, vector<512x128xf32>
    %c0_7 = arith.constant 0 : index
    %c0_8 = arith.constant 0 : index
    %8 = vector.load %arg5[%c0_7, %c0_8] : memref<1x128xf32, #tpu.memory_space<vmem>>, vector<1x128xf32>
    %9 = vector.broadcast %8 : vector<1x128xf32> to vector<512x128xf32>
    %10 = arith.mulf %7, %9 : vector<512x128xf32>
    %c0_9 = arith.constant 0 : index
    %c0_10 = arith.constant 0 : index
    %11 = vector.load %arg6[%c0_9, %c0_10] : memref<1x128xf32, #tpu.memory_space<vmem>>, vector<1x128xf32>
    %12 = vector.broadcast %11 : vector<1x128xf32> to vector<512x128xf32>
    %13 = arith.addf %10, %12 : vector<512x128xf32>
    %14 = arith.addf %6, %13 : vector<512x128xf32>
    %cst = arith.constant 0.000000e+00 : f32
    %15 = vector.broadcast %cst : f32 to vector<512x128xf32>
    %16 = arith.maximumf %14, %15 : vector<512x128xf32>
    %c0_11 = arith.constant 0 : index
    %c0_12 = arith.constant 0 : index
    %17 = vector.load %arg7[%c0_11, %c0_12] : memref<512x128xf32, #tpu.memory_space<vmem>>, vector<512x128xf32>
    tpu.vector_store %arg7[%c0_11, %c0_12], %16 {strides = array<i32>} : memref<512x128xf32, #tpu.memory_space<vmem>>, vector<512x128xf32>,
    return
  }
  func.func @transform_0(%arg0: i32) -> (i32, i32) {
    %c0_i32 = arith.constant 0 : i32
    %c0_i32_0 = arith.constant 0 : i32
    return %arg0, %c0_i32 : i32, i32
  }
  func.func @transform_1(%arg0: i32) -> (i32, i32) {
    %c0_i32 = arith.constant 0 : i32
    %c0_i32_0 = arith.constant 0 : i32
    return %arg0, %c0_i32 : i32, i32
  }
  func.func @transform_2(%arg0: i32) -> (i32, i32) {
    %c0_i32 = arith.constant 0 : i32
    %c0_i32_0 = arith.constant 0 : i32
    %c0_i32_1 = arith.constant 0 : i32
    return %c0_i32, %c0_i32_0 : i32, i32
  }
  func.func @transform_3(%arg0: i32) -> (i32, i32) {
    %c0_i32 = arith.constant 0 : i32
    %c0_i32_0 = arith.constant 0 : i32
    %c0_i32_1 = arith.constant 0 : i32
    return %c0_i32, %c0_i32_0 : i32, i32
  }
  func.func @transform_4(%arg0: i32) -> (i32, i32) {
    %c0_i32 = arith.constant 0 : i32
    %c0_i32_0 = arith.constant 0 : i32
    %c0_i32_1 = arith.constant 0 : i32
    return %c0_i32, %c0_i32_0 : i32, i32
  }
  func.func @transform_5(%arg0: i32) -> (i32, i32) {
    %c0_i32 = arith.constant 0 : i32
    %c0_i32_0 = arith.constant 0 : i32
    %c0_i32_1 = arith.constant 0 : i32
    return %c0_i32, %c0_i32_0 : i32, i32
  }
  func.func @transform_6(%arg0: i32) -> (i32, i32) {
    %c0_i32 = arith.constant 0 : i32
    %c0_i32_0 = arith.constant 0 : i32
    return %arg0, %c0_i32 : i32, i32
  }
}

</mosaic_0001>

<bundles_post_ra>
// kernel: bottleneck_block.5
= control target key start
LH: loop header
LB: loop body
LE: loop exit
PB: predicated region body
PF: predicated region fallthrough
CT: control target
= control target key end

     0   :  { %vm79_vm0 = vcmask 64512   ;;  %s1592_s1 = inlined_call_operand.vmem [shape: f32[8,128], index: 1, kind: input, shape index: {}]   ;;  %s1593_s0 = inlined_call_operand.vmem [shape: f32[512,8], index: 0, kind: input, shape index: {}]   ;;  %s1594_s2 = inlined_call_operand.vmem [shape: f32[512,128], index: 2, kind: output, shape index: {0}]   ;;  %s1595_s3 = inlined_call_operand.vmem [shape: f32[1,1,128], index: 3, kind: output, shape index: {1}]   ;;  %s1596_s4 = inlined_call_operand.vmem [shape: f32[1,1,128], index: 4, kind: output, shape index: {2}]  }
   0x1   :  { %v78_v0 = vld [vmem:[%s1592_s1] sm:$0xff]  ;;  %v15_v3 = vld [vmem:[%s1593_s0 + $0x8] sm:$0xff]  ;;  %v16_v5 = vld [vmem:[%s1593_s0 + $0x10] sm:$0xff] }
   0x2   :  { %v14_v1 = vld [vmem:[%s1593_s0] sm:$0xff]  ;;  %287 = vmatpush.msra.mxu0 %v78_v0  ;;  %825 = vmatpush.msra.mxu1 %v78_v0  ;;  %v31_v4 = vld [vmem:[%s1593_s0 + $0x88] sm:$0xff]  ;;  %v32_v6 = vld [vmem:[%s1593_s0 + $0x90] sm:$0xff] }
   0x3   :  { %761 = vmatmul.msk.f32.vlgmr.msra.gmra.mxu0 %vm79_vm0, %v14_v1  ;;  %v30_v2 = vld [vmem:[%s1593_s0 + $0x80] sm:$0xff]  ;;  %826 = vmatpush.msra.mxu2 %v78_v0  ;;  %v17_v7 = vld [vmem:[%s1593_s0 + $0x18] sm:$0xff]  ;;  %v47_v12 = vld [vmem:[%s1593_s0 + $0x108] sm:$0xff] }
   0x4   :  { %777 = vmatmul.msk.f32.vlgmr.msra.gmra.mxu1 %vm79_vm0, %v30_v2  ;;  %827 = vmatpush.msra.mxu3 %v78_v0  ;;  %v33_v8 = vld [vmem:[%s1593_s0 + $0x98] sm:$0xff]  ;;  %v46_v9 = vld [vmem:[%s1593_s0 + $0x100] sm:$0xff]  ;;  %v19_v13 = vld [vmem:[%s1593_s0 + $0x28] sm:$0xff] }
   0x5   :  { %793 = vmatmul.msk.f32.vlgmr.msra.gmra.mxu2 %vm79_vm0, %v46_v9  ;;  %v18_v10 = vld [vmem:[%s1593_s0 + $0x20] sm:$0xff]  ;;  %v35_v14 = vld [vmem:[%s1593_s0 + $0xa8] sm:$0xff]  ;;  %v48_v15 = vld [vmem:[%s1593_s0 + $0x110] sm:$0xff] }
   0x6   :  { %v34_v11 = vld [vmem:[%s1593_s0 + $0xa0] sm:$0xff]  ;;  %v20_v16 = vld [vmem:[%s1593_s0 + $0x30] sm:$0xff]  ;;  %v49_v18 = vld [vmem:[%s1593_s0 + $0x118] sm:$0xff] }
   0x7   :  { %v36_v17 = vld [vmem:[%s1593_s0 + $0xb0] sm:$0xff]  ;;  %v21_v19 = vld [vmem:[%s1593_s0 + $0x38] sm:$0xff]  ;;  %v50_v21 = vld [vmem:[%s1593_s0 + $0x120] sm:$0xff] }
   0x8   :  { %v37_v20 = vld [vmem:[%s1593_s0 + $0xb8] sm:$0xff]  ;;  %v62_v22 = vld [vmem:[%s1593_s0 + $0x180] sm:$0xff]  ;;  %v51_v25 = vld [vmem:[%s1593_s0 + $0x128] sm:$0xff] }
   0x9   :  { %809 = vmatmul.msk.f32.vlgmr.msra.gmra.mxu3 %vm79_vm0, %v62_v22  ;;  %v22_v23 = vld [vmem:[%s1593_s0 + $0x40] sm:$0xff]  ;;  %v63_v26 = vld [vmem:[%s1593_s0 + $0x188] sm:$0xff]  ;;  %v52_v29 = vld [vmem:[%s1593_s0 + $0x130] sm:$0xff] }
   0xa   :  { %v38_v24 = vld [vmem:[%s1593_s0 + $0xc0] sm:$0xff]  ;;  %v23_v27 = vld [vmem:[%s1593_s0 + $0x48] sm:$0xff]  ;;  %v64_v30 = vld [vmem:[%s1593_s0 + $0x190] sm:$0xff] }
   0xb   :  { %762 = vmatmul.msk.f32.gmra.mxu0 %vm79_vm0, %v15_v3  ;;  %v39_v28 = vld [vmem:[%s1593_s0 + $0xc8] sm:$0xff]  ;;  %v24_v31 = vld [vmem:[%s1593_s0 + $0x50] sm:$0xff]  ;;  %v53_v33 = vld [vmem:[%s1593_s0 + $0x138] sm:$0xff] }
   0xc   :  { %778 = vmatmul.msk.f32.gmra.mxu1 %vm79_vm0, %v31_v4  ;;  %v40_v32 = vld [vmem:[%s1593_s0 + $0xd0] sm:$0xff]  ;;  %v65_v34 = vld [vmem:[%s1593_s0 + $0x198] sm:$0xff]  ;;  %v54_v37 = vld [vmem:[%s1593_s0 + $0x140] sm:$0xff] }
   0xd   :  { %794 = vmatmul.msk.f32.gmra.mxu2 %vm79_vm0, %v47_v12  ;;  %v25_v35 = vld [vmem:[%s1593_s0 + $0x58] sm:$0xff]  ;;  %v66_v38 = vld [vmem:[%s1593_s0 + $0x1a0] sm:$0xff]  ;;  %v55_v41 = vld [vmem:[%s1593_s0 + $0x148] sm:$0xff] }
   0xe   :  { %v41_v36 = vld [vmem:[%s1593_s0 + $0xd8] sm:$0xff]  ;;  %v26_v39 = vld [vmem:[%s1593_s0 + $0x60] sm:$0xff]  ;;  %v67_v42 = vld [vmem:[%s1593_s0 + $0x1a8] sm:$0xff] }
   0xf   :  { %v42_v40 = vld [vmem:[%s1593_s0 + $0xe0] sm:$0xff]  ;;  %v27_v43 = vld [vmem:[%s1593_s0 + $0x68] sm:$0xff]  ;;  %v56_v45 = vld [vmem:[%s1593_s0 + $0x150] sm:$0xff] }
  0x10   :  { %v43_v44 = vld [vmem:[%s1593_s0 + $0xe8] sm:$0xff]  ;;  %v68_v46 = vld [vmem:[%s1593_s0 + $0x1b0] sm:$0xff]  ;;  %v57_v49 = vld [vmem:[%s1593_s0 + $0x158] sm:$0xff] }
  0x11   :  { %810 = vmatmul.msk.f32.gmra.mxu3 %vm79_vm0, %v63_v26  ;;  %v28_v47 = vld [vmem:[%s1593_s0 + $0x70] sm:$0xff]  ;;  %v69_v50 = vld [vmem:[%s1593_s0 + $0x1b8] sm:$0xff]  ;;  %v58_v53 = vld [vmem:[%s1593_s0 + $0x160] sm:$0xff] }
  0x12   :  { %v44_v48 = vld [vmem:[%s1593_s0 + $0xf0] sm:$0xff]  ;;  %v29_v51 = vld [vmem:[%s1593_s0 + $0x78] sm:$0xff]  ;;  %v70_v54 = vld [vmem:[%s1593_s0 + $0x1c0] sm:$0xff] }
  0x13   :  { %763 = vmatmul.msk.f32.gmra.mxu0 %vm79_vm0, %v16_v5  ;;  %v45_v52 = vld [vmem:[%s1593_s0 + $0xf8] sm:$0xff]  ;;  %v59_v57 = vld [vmem:[%s1593_s0 + $0x168] sm:$0xff]  ;;  %v60_v1 = vld [vmem:[%s1593_s0 + $0x170] sm:$0xff] }
  0x14   :  { %779 = vmatmul.msk.f32.gmra.mxu1 %vm79_vm0, %v32_v6  ;;  %v71_v58 = vld [vmem:[%s1593_s0 + $0x1c8] sm:$0xff]  ;;  %v72_v2 = vld [vmem:[%s1593_s0 + $0x1d0] sm:$0xff]  ;;  %v73_v9 = vld [vmem:[%s1593_s0 + $0x1d8] sm:$0xff] }
  0x15   :  { %795 = vmatmul.msk.f32.gmra.mxu2 %vm79_vm0, %v48_v15  ;;  %v74_v15 = vld [vmem:[%s1593_s0 + $0x1e0] sm:$0xff]  ;;  %v75_v22 = vld [vmem:[%s1593_s0 + $0x1e8] sm:$0xff]  ;;  %v76_v26 = vld [vmem:[%s1593_s0 + $0x1f0] sm:$0xff] }
  0x19   :  { %811 = vmatmul.msk.f32.gmra.mxu3 %vm79_vm0, %v64_v30  ;;  %v77_v30 = vld [vmem:[%s1593_s0 + $0x1f8] sm:$0xff] }
  0x1b   :  { %764 = vmatmul.msk.f32.gmra.mxu0 %vm79_vm0, %v17_v7 }
  0x1c   :  { %780 = vmatmul.msk.f32.gmra.mxu1 %vm79_vm0, %v33_v8  ;;  %v61_v8 = vld [vmem:[%s1593_s0 + $0x178] sm:$0xff] }
  0x1d   :  { %796 = vmatmul.msk.f32.gmra.mxu2 %vm79_vm0, %v49_v18 }
  0x21   :  { %812 = vmatmul.msk.f32.gmra.mxu3 %vm79_vm0, %v65_v34 }
  0x23   :  { %765 = vmatmul.msk.f32.gmra.mxu0 %vm79_vm0, %v18_v10 }
  0x24   :  { %781 = vmatmul.msk.f32.gmra.mxu1 %vm79_vm0, %v34_v11 }
  0x25   :  { %797 = vmatmul.msk.f32.gmra.mxu2 %vm79_vm0, %v50_v21 }
  0x29   :  { %813 = vmatmul.msk.f32.gmra.mxu3 %vm79_vm0, %v66_v38 }
  0x2b   :  { %766 = vmatmul.msk.f32.gmra.mxu0 %vm79_vm0, %v19_v13 }
  0x2c   :  { %782 = vmatmul.msk.f32.gmra.mxu1 %vm79_vm0, %v35_v14 }
  0x2d   :  { %798 = vmatmul.msk.f32.gmra.mxu2 %vm79_vm0, %v51_v25 }
  0x31   :  { %814 = vmatmul.msk.f32.gmra.mxu3 %vm79_vm0, %v67_v42 }
  0x33   :  { %767 = vmatmul.msk.f32.gmra.mxu0 %vm79_vm0, %v20_v16 }
  0x34   :  { %783 = vmatmul.msk.f32.gmra.mxu1 %vm79_vm0, %v36_v17 }
  0x35   :  { %799 = vmatmul.msk.f32.gmra.mxu2 %vm79_vm0, %v52_v29 }
  0x39   :  { %815 = vmatmul.msk.f32.gmra.mxu3 %vm79_vm0, %v68_v46 }
  0x3b   :  { %768 = vmatmul.msk.f32.gmra.mxu0 %vm79_vm0, %v21_v19 }
  0x3c   :  { %784 = vmatmul.msk.f32.gmra.mxu1 %vm79_vm0, %v37_v20 }
  0x3d   :  { %800 = vmatmul.msk.f32.gmra.mxu2 %vm79_vm0, %v53_v33 }
  0x41   :  { %816 = vmatmul.msk.f32.gmra.mxu3 %vm79_vm0, %v69_v50 }
  0x43   :  { %769 = vmatmul.msk.f32.gmra.mxu0 %vm79_vm0, %v22_v23 }
  0x44   :  { %785 = vmatmul.msk.f32.gmra.mxu1 %vm79_vm0, %v38_v24 }
  0x45   :  { %801 = vmatmul.msk.f32.gmra.mxu2 %vm79_vm0, %v54_v37 }
  0x49   :  { %817 = vmatmul.msk.f32.gmra.mxu3 %vm79_vm0, %v70_v54 }
  0x4b   :  { %770 = vmatmul.msk.f32.gmra.mxu0 %vm79_vm0, %v23_v27 }
  0x4c   :  { %786 = vmatmul.msk.f32.gmra.mxu1 %vm79_vm0, %v39_v28 }
  0x4d   :  { %802 = vmatmul.msk.f32.gmra.mxu2 %vm79_vm0, %v55_v41 }
  0x51   :  { %818 = vmatmul.msk.f32.gmra.mxu3 %vm79_vm0, %v71_v58 }
  0x53   :  { %771 = vmatmul.msk.f32.gmra.mxu0 %vm79_vm0, %v24_v31 }
  0x54   :  { %787 = vmatmul.msk.f32.gmra.mxu1 %vm79_vm0, %v40_v32 }
  0x55   :  { %803 = vmatmul.msk.f32.gmra.mxu2 %vm79_vm0, %v56_v45 }
  0x59   :  { %819 = vmatmul.msk.f32.gmra.mxu3 %vm79_vm0, %v72_v2 }
  0x5b   :  { %772 = vmatmul.msk.f32.gmra.mxu0 %vm79_vm0, %v25_v35 }
  0x5c   :  { %788 = vmatmul.msk.f32.gmra.mxu1 %vm79_vm0, %v41_v36 }
  0x5d   :  { %804 = vmatmul.msk.f32.gmra.mxu2 %vm79_vm0, %v57_v49 }
  0x61   :  { %820 = vmatmul.msk.f32.gmra.mxu3 %vm79_vm0, %v73_v9 }
  0x63   :  { %773 = vmatmul.msk.f32.gmra.mxu0 %vm79_vm0, %v26_v39 }
  0x64   :  { %789 = vmatmul.msk.f32.gmra.mxu1 %vm79_vm0, %v42_v40 }
  0x65   :  { %805 = vmatmul.msk.f32.gmra.mxu2 %vm79_vm0, %v58_v53 }
  0x69   :  { %821 = vmatmul.msk.f32.gmra.mxu3 %vm79_vm0, %v74_v15 }
  0x6b   :  { %774 = vmatmul.msk.f32.gmra.mxu0 %vm79_vm0, %v27_v43 }
  0x6c   :  { %790 = vmatmul.msk.f32.gmra.mxu1 %vm79_vm0, %v43_v44 }
  0x6d   :  { %806 = vmatmul.msk.f32.gmra.mxu2 %vm79_vm0, %v59_v57 }
  0x71   :  { %822 = vmatmul.msk.f32.gmra.mxu3 %vm79_vm0, %v75_v22 }
  0x73   :  { %775 = vmatmul.msk.f32.gmra.mxu0 %vm79_vm0, %v28_v47 }
  0x74   :  { %791 = vmatmul.msk.f32.gmra.mxu1 %vm79_vm0, %v44_v48 }
  0x75   :  { %807 = vmatmul.msk.f32.gmra.mxu2 %vm79_vm0, %v60_v1 }
  0x79   :  { %823 = vmatmul.msk.f32.gmra.mxu3 %vm79_vm0, %v76_v26 }
  0x7b   :  { %776 = vmatmul.msk.f32.gmra.mxu0 %vm79_vm0, %v29_v51 }
  0x7c   :  { %792 = vmatmul.msk.f32.gmra.mxu1 %vm79_vm0, %v45_v52 }
  0x7d   :  { %808 = vmatmul.msk.f32.gmra.mxu2 %vm79_vm0, %v61_v8 }
  0x80   :  { %v289_v55 = vpop.f32.mrf.mxu0 }
  0x81   :  { %481 = vst [vmem:[%s1594_s2] sm:$0xff] %v289_v55  ;;  %v1075_v56 = vpop.f32.mrf.mxu1  ;;  %v615_v60 = vmul.f32 %v289_v55, %v289_v55  ;;  %824 = vmatmul.msk.f32.gmra.mxu3 %vm79_vm0, %v77_v30 }
  0x82   :  { %497 = vst [vmem:[%s1594_s2 + $0x80] sm:$0xff] %v1075_v56 }
  0x88   :  { %v292_v59 = vpop.f32.mrf.mxu0  ;;  %v1136_v17 = vpop.f32.mrf.mxu2 }
  0x89   :  { %482 = vst [vmem:[%s1594_s2 + $0x8] sm:$0xff] %v292_v59  ;;  %v545_v61 = vadd.f32 %v292_v59, %v289_v55  ;;  %v616_v62 = vmul.f32 %v292_v59, %v292_v59  ;;  %v1092_v63 = vpop.f32.mrf.mxu1 }
  0x8a   :  { %498 = vst [vmem:[%s1594_s2 + $0x88] sm:$0xff] %v1092_v63 }
  0x8b   :  { %v679_v0 = vadd.f32 %v616_v62, %v615_v60  ;;  %513 = vst [vmem:[%s1594_s2 + $0x100] sm:$0xff] %v1136_v17 }
  0x8c   :  { %v1222_v37 = vpop.f32.mrf.mxu3 }
  0x8d   :  { %529 = vst [vmem:[%s1594_s2 + $0x180] sm:$0xff] %v1222_v37 }
  0x90   :  { %v295_v3 = vpop.f32.mrf.mxu0  ;;  %v1161_v24 = vpop.f32.mrf.mxu2 }
  0x91   :  { %483 = vst [vmem:[%s1594_s2 + $0x10] sm:$0xff] %v295_v3  ;;  %v546_v4 = vadd.f32 %v545_v61, %v295_v3  ;;  %v617_v5 = vmul.f32 %v295_v3, %v295_v3  ;;  %v1109_v6 = vpop.f32.mrf.mxu1 }
  0x92   :  { %499 = vst [vmem:[%s1594_s2 + $0x90] sm:$0xff] %v1109_v6 }
  0x93   :  { %v680_v7 = vadd.f32 %v679_v0, %v617_v5  ;;  %514 = vst [vmem:[%s1594_s2 + $0x108] sm:$0xff] %v1161_v24 }
  0x94   :  { %v1243_v41 = vpop.f32.mrf.mxu3 }
  0x95   :  { %530 = vst [vmem:[%s1594_s2 + $0x188] sm:$0xff] %v1243_v41 }
  0x98   :  { %v298_v10 = vpop.f32.mrf.mxu0  ;;  %v1181_v28 = vpop.f32.mrf.mxu2 }
  0x99   :  { %484 = vst [vmem:[%s1594_s2 + $0x18] sm:$0xff] %v298_v10  ;;  %v547_v11 = vadd.f32 %v546_v4, %v298_v10  ;;  %v618_v12 = vmul.f32 %v298_v10, %v298_v10  ;;  %v1126_v13 = vpop.f32.mrf.mxu1 }
  0x9a   :  { %500 = vst [vmem:[%s1594_s2 + $0x98] sm:$0xff] %v1126_v13 }
  0x9b   :  { %v681_v14 = vadd.f32 %v680_v7, %v618_v12  ;;  %515 = vst [vmem:[%s1594_s2 + $0x110] sm:$0xff] %v1181_v28 }
  0x9c   :  { %v1264_v45 = vpop.f32.mrf.mxu3 }
  0x9d   :  { %531 = vst [vmem:[%s1594_s2 + $0x190] sm:$0xff] %v1264_v45 }
  0xa0   :  { %v301_v16 = vpop.f32.mrf.mxu0  ;;  %v1200_v32 = vpop.f32.mrf.mxu2 }
  0xa1   :  { %485 = vst [vmem:[%s1594_s2 + $0x20] sm:$0xff] %v301_v16  ;;  %v1141_v18 = vadd.f32 %v547_v11, %v301_v16  ;;  %v619_v19 = vmul.f32 %v301_v16, %v301_v16  ;;  %v1143_v20 = vpop.f32.mrf.mxu1 }
  0xa2   :  { %501 = vst [vmem:[%s1594_s2 + $0xa0] sm:$0xff] %v1143_v20 }
  0xa3   :  { %v1149_v21 = vadd.f32 %v681_v14, %v619_v19  ;;  %516 = vst [vmem:[%s1594_s2 + $0x118] sm:$0xff] %v1200_v32 }
  0xa4   :  { %v1285_v49 = vpop.f32.mrf.mxu3 }
  0xa5   :  { %532 = vst [vmem:[%s1594_s2 + $0x198] sm:$0xff] %v1285_v49 }
  0xa8   :  { %v1159_v23 = vpop.f32.mrf.mxu0  ;;  %v1215_v35 = vpop.f32.mrf.mxu2 }
  0xa9   :  { %486 = vst [vmem:[%s1594_s2 + $0x28] sm:$0xff] %v1159_v23  ;;  %v1167_v25 = vpop.f32.mrf.mxu1  ;;  %v620_v54 = vmul.f32 %v1159_v23, %v1159_v23  ;;  %v549_v55 = vadd.f32 %v1141_v18, %v1159_v23 }
  0xaa   :  { %502 = vst [vmem:[%s1594_s2 + $0xa8] sm:$0xff] %v1167_v25 }
  0xab   :  { %517 = vst [vmem:[%s1594_s2 + $0x120] sm:$0xff] %v1215_v35  ;;  %v683_v58 = vadd.f32 %v1149_v21, %v620_v54 }
  0xac   :  { %v1306_v53 = vpop.f32.mrf.mxu3 }
  0xad   :  { %533 = vst [vmem:[%s1594_s2 + $0x1a0] sm:$0xff] %v1306_v53 }
  0xb0   :  { %v307_v27 = vpop.f32.mrf.mxu0  ;;  %v1236_v39 = vpop.f32.mrf.mxu2 }
  0xb1   :  { %487 = vst [vmem:[%s1594_s2 + $0x30] sm:$0xff] %v307_v27  ;;  %v1186_v29 = vpop.f32.mrf.mxu1  ;;  %v621_v57 = vmul.f32 %v307_v27, %v307_v27  ;;  %v550_v59 = vadd.f32 %v549_v55, %v307_v27 }
  0xb2   :  { %503 = vst [vmem:[%s1594_s2 + $0xb0] sm:$0xff] %v1186_v29 }
  0xb3   :  { %518 = vst [vmem:[%s1594_s2 + $0x128] sm:$0xff] %v1236_v39  ;;  %v684_v0 = vadd.f32 %v683_v58, %v621_v57 }
  0xb4   :  { %v1332_v4 = vpop.f32.mrf.mxu3 }
  0xb5   :  { %534 = vst [vmem:[%s1594_s2 + $0x1a8] sm:$0xff] %v1332_v4 }
  0xb8   :  { %v310_v31 = vpop.f32.mrf.mxu0  ;;  %v1257_v43 = vpop.f32.mrf.mxu2 }
  0xb9   :  { %488 = vst [vmem:[%s1594_s2 + $0x38] sm:$0xff] %v310_v31  ;;  %v1205_v33 = vpop.f32.mrf.mxu1  ;;  %v622_v60 = vmul.f32 %v310_v31, %v310_v31  ;;  %v551_v1 = vadd.f32 %v550_v59, %v310_v31 }
  0xba   :  { %504 = vst [vmem:[%s1594_s2 + $0xb8] sm:$0xff] %v1205_v33 }
  0xbb   :  { %519 = vst [vmem:[%s1594_s2 + $0x130] sm:$0xff] %v1257_v43  ;;  %v685_v5 = vadd.f32 %v684_v0, %v622_v60 }
  0xbc   :  { %v1353_v26 = vpop.f32.mrf.mxu3 }
  0xbd   :  { %535 = vst [vmem:[%s1594_s2 + $0x1b0] sm:$0xff] %v1353_v26 }
  0xc0   :  { %v313_v34 = vpop.f32.mrf.mxu0  ;;  %v1278_v47 = vpop.f32.mrf.mxu2 }
  0xc1   :  { %489 = vst [vmem:[%s1594_s2 + $0x40] sm:$0xff] %v313_v34  ;;  %v1220_v36 = vpop.f32.mrf.mxu1  ;;  %v623_v2 = vmul.f32 %v313_v34, %v313_v34  ;;  %v552_v7 = vadd.f32 %v551_v1, %v313_v34 }
  0xc2   :  { %505 = vst [vmem:[%s1594_s2 + $0xc0] sm:$0xff] %v1220_v36 }
  0xc3   :  { %520 = vst [vmem:[%s1594_s2 + $0x138] sm:$0xff] %v1278_v47  ;;  %v686_v9 = vadd.f32 %v685_v5, %v623_v2  ;;  %v632_v5 = vmul.f32 %v1092_v63, %v1092_v63 }
  0xc4   :  { %v1374_v0 = vpop.f32.mrf.mxu3 }
  0xc5   :  { %536 = vst [vmem:[%s1594_s2 + $0x1b8] sm:$0xff] %v1374_v0 }
  0xc8   :  { %v316_v38 = vpop.f32.mrf.mxu0  ;;  %v1299_v51 = vpop.f32.mrf.mxu2 }
  0xc9   :  { %490 = vst [vmem:[%s1594_s2 + $0x48] sm:$0xff] %v316_v38  ;;  %v1241_v40 = vpop.f32.mrf.mxu1  ;;  %v624_v8 = vmul.f32 %v316_v38, %v316_v38  ;;  %v553_v10 = vadd.f32 %v552_v7, %v316_v38 }
  0xca   :  { %506 = vst [vmem:[%s1594_s2 + $0xc8] sm:$0xff] %v1241_v40 }
  0xcb   :  { %521 = vst [vmem:[%s1594_s2 + $0x140] sm:$0xff] %v1299_v51  ;;  %v687_v12 = vadd.f32 %v686_v9, %v624_v8 }
  0xd0   :  { %v319_v42 = vpop.f32.mrf.mxu0  ;;  %v1325_v62 = vpop.f32.mrf.mxu2 }
  0xd1   :  { %491 = vst [vmem:[%s1594_s2 + $0x50] sm:$0xff] %v319_v42  ;;  %v1262_v44 = vpop.f32.mrf.mxu1  ;;  %v625_v11 = vmul.f32 %v319_v42, %v319_v42  ;;  %v554_v14 = vadd.f32 %v553_v10, %v319_v42 }
  0xd2   :  { %507 = vst [vmem:[%s1594_s2 + $0xd0] sm:$0xff] %v1262_v44 }
  0xd3   :  { %522 = vst [vmem:[%s1594_s2 + $0x148] sm:$0xff] %v1325_v62  ;;  %v688_v19 = vadd.f32 %v687_v12, %v625_v11  ;;  %v634_v12 = vmul.f32 %v1126_v13, %v1126_v13 }
  0xd8   :  { %v322_v46 = vpop.f32.mrf.mxu0  ;;  %v1346_v18 = vpop.f32.mrf.mxu2 }
  0xd9   :  { %492 = vst [vmem:[%s1594_s2 + $0x58] sm:$0xff] %v322_v46  ;;  %v1283_v48 = vpop.f32.mrf.mxu1  ;;  %v626_v15 = vmul.f32 %v322_v46, %v322_v46  ;;  %v555_v21 = vadd.f32 %v554_v14, %v322_v46 }
  0xda   :  { %508 = vst [vmem:[%s1594_s2 + $0xd8] sm:$0xff] %v1283_v48 }
  0xdb   :  { %v689_v27 = vadd.f32 %v688_v19, %v626_v15  ;;  %523 = vst [vmem:[%s1594_s2 + $0x150] sm:$0xff] %v1346_v18 }
  0xe0   :  { %v325_v50 = vpop.f32.mrf.mxu0  ;;  %v1367_v57 = vpop.f32.mrf.mxu2 }
  0xe1   :  { %493 = vst [vmem:[%s1594_s2 + $0x60] sm:$0xff] %v325_v50  ;;  %v1304_v52 = vpop.f32.mrf.mxu1  ;;  %v627_v22 = vmul.f32 %v325_v50, %v325_v50  ;;  %v556_v30 = vadd.f32 %v555_v21, %v325_v50 }
  0xe2   :  { %509 = vst [vmem:[%s1594_s2 + $0xe0] sm:$0xff] %v1304_v52 }
  0xe3   :  { %v690_v34 = vadd.f32 %v689_v27, %v627_v22  ;;  %524 = vst [vmem:[%s1594_s2 + $0x158] sm:$0xff] %v1367_v57  ;;  %v637_v27 = vmul.f32 %v1186_v29, %v1186_v29 }
  0xe8   :  { %v328_v61 = vpop.f32.mrf.mxu0  ;;  %v1397_v11 = vpop.f32.mrf.mxu2 }
  0xe9   :  { %494 = vst [vmem:[%s1594_s2 + $0x68] sm:$0xff] %v328_v61  ;;  %v1330_v3 = vpop.f32.mrf.mxu1  ;;  %v628_v31 = vmul.f32 %v328_v61, %v328_v61  ;;  %v557_v38 = vadd.f32 %v556_v30, %v328_v61  ;;  %v631_v61 = vmul.f32 %v1075_v56, %v1075_v56 }
  0xea   :  { %510 = vst [vmem:[%s1594_s2 + $0xe8] sm:$0xff] %v1330_v3 }
  0xeb   :  { %v691_v46 = vadd.f32 %v690_v34, %v628_v31  ;;  %525 = vst [vmem:[%s1594_s2 + $0x160] sm:$0xff] %v1397_v11 }
  0xf0   :  { %v331_v16 = vpop.f32.mrf.mxu0  ;;  %v1421_v34 = vpop.f32.mrf.mxu2 }
  0xf1   :  { %495 = vst [vmem:[%s1594_s2 + $0x70] sm:$0xff] %v331_v16  ;;  %v1351_v23 = vpop.f32.mrf.mxu1  ;;  %v629_v42 = vmul.f32 %v331_v16, %v331_v16  ;;  %v558_v54 = vadd.f32 %v557_v38, %v331_v16  ;;  %v638_v38 = vmul.f32 %v1205_v33, %v1205_v33 }
  0xf2   :  { %511 = vst [vmem:[%s1594_s2 + $0xf0] sm:$0xff] %v1351_v23 }
  0xf3   :  { %v692_v50 = vadd.f32 %v691_v46, %v629_v42  ;;  %526 = vst [vmem:[%s1594_s2 + $0x168] sm:$0xff] %v1421_v34 }
  0xf8   :  { %v334_v55 = vpop.f32.mrf.mxu0 }
  0xf9   :  { %496 = vst [vmem:[%s1594_s2 + $0x78] sm:$0xff] %v334_v55  ;;  %v559_v58 = vadd.f32 %v558_v54, %v334_v55  ;;  %v630_v59 = vmul.f32 %v334_v55, %v334_v55  ;;  %v1372_v60 = vpop.f32.mrf.mxu1 }
  0xfa   :  { %512 = vst [vmem:[%s1594_s2 + $0xf8] sm:$0xff] %v1372_v60 }
  0xfb   :  { %v560_v1 = vadd.f32 %v559_v58, %v1075_v56  ;;  %v693_v2 = vadd.f32 %v692_v50, %v630_v59  ;;  %v633_v56 = vmul.f32 %v1109_v6, %v1109_v6  ;;  %v641_v58 = vmul.f32 %v1262_v44, %v1262_v44 }
  0xfd   :  { %v561_v7 = vadd.f32 %v560_v1, %v1092_v63  ;;  %v694_v8 = vadd.f32 %v693_v2, %v631_v61  ;;  %v1406_v63 = vpop.f32.mrf.mxu3  ;;  %v1445_v1 = vpop.f32.mrf.mxu2 }
  0xfe   :  { %537 = vst [vmem:[%s1594_s2 + $0x1c0] sm:$0xff] %v1406_v63 }
  0xff   :  { %v562_v9 = vadd.f32 %v561_v7, %v1109_v6  ;;  %v695_v10 = vadd.f32 %v694_v8, %v632_v5  ;;  %v635_v6 = vmul.f32 %v1143_v20, %v1143_v20  ;;  %527 = vst [vmem:[%s1594_s2 + $0x170] sm:$0xff] %v1445_v1  ;;  %v643_v8 = vmul.f32 %v1304_v52, %v1304_v52 }
 0x101   :  { %v563_v14 = vadd.f32 %v562_v9, %v1126_v13  ;;  %v696_v15 = vadd.f32 %v695_v10, %v633_v56  ;;  %v636_v13 = vmul.f32 %v1167_v25, %v1167_v25  ;;  %v644_v9 = vmul.f32 %v1330_v3, %v1330_v3 }
 0x103   :  { %v564_v16 = vadd.f32 %v563_v14, %v1143_v20  ;;  %v697_v19 = vadd.f32 %v696_v15, %v634_v12  ;;  %v645_v14 = vmul.f32 %v1351_v23, %v1351_v23  ;;  %v646_v15 = vmul.f32 %v1372_v60, %v1372_v60 }
 0x105   :  { %v565_v21 = vadd.f32 %v564_v16, %v1167_v25  ;;  %v698_v22 = vadd.f32 %v697_v19, %v635_v6  ;;  %v1430_v25 = vpop.f32.mrf.mxu3  ;;  %v430_v6 = vpop.f32.mrf.mxu2 }
 0x106   :  { %538 = vst [vmem:[%s1594_s2 + $0x1c8] sm:$0xff] %v1430_v25 }
 0x107   :  { %v699_v30 = vadd.f32 %v698_v22, %v636_v13  ;;  %v566_v31 = vadd.f32 %v565_v21, %v1186_v29  ;;  %v639_v29 = vmul.f32 %v1220_v36, %v1220_v36  ;;  %528 = vst [vmem:[%s1594_s2 + $0x178] sm:$0xff] %v430_v6 }
 0x109   :  { %v567_v20 = vadd.f32 %v566_v31, %v1205_v33  ;;  %v700_v42 = vadd.f32 %v699_v30, %v637_v27  ;;  %v640_v33 = vmul.f32 %v1241_v40, %v1241_v40  ;;  %v649_v27 = vmul.f32 %v1181_v28, %v1181_v28 }
 0x10b   :  { %v568_v46 = vadd.f32 %v567_v20, %v1220_v36  ;;  %v701_v54 = vadd.f32 %v700_v42, %v638_v38  ;;  %v642_v36 = vmul.f32 %v1283_v48, %v1283_v48  ;;  %v650_v38 = vmul.f32 %v1200_v32, %v1200_v32 }
 0x10d   :  { %v569_v55 = vadd.f32 %v568_v46, %v1241_v40  ;;  %v702_v50 = vadd.f32 %v701_v54, %v639_v29  ;;  %v1454_v40 = vpop.f32.mrf.mxu3  ;;  %v652_v46 = vmul.f32 %v1236_v39, %v1236_v39 }
 0x10e   :  { %539 = vst [vmem:[%s1594_s2 + $0x1d0] sm:$0xff] %v1454_v40 }
 0x10f   :  { %v570_v59 = vadd.f32 %v569_v55, %v1262_v44  ;;  %v703_v61 = vadd.f32 %v702_v50, %v640_v33  ;;  %v653_v33 = vmul.f32 %v1257_v43, %v1257_v43 }
 0x111   :  { %v571_v2 = vadd.f32 %v570_v59, %v1283_v48  ;;  %v704_v5 = vadd.f32 %v703_v61, %v641_v58  ;;  %v654_v58 = vmul.f32 %v1278_v47, %v1278_v47 }
 0x113   :  { %v705_v44 = vadd.f32 %v704_v5, %v642_v36  ;;  %v572_v7 = vadd.f32 %v571_v2, %v1304_v52 }
 0x115   :  { %v706_v48 = vadd.f32 %v705_v44, %v643_v8  ;;  %v573_v56 = vadd.f32 %v572_v7, %v1330_v3  ;;  %v1475_v52 = vpop.f32.mrf.mxu3  ;;  %v647_v3 = vmul.f32 %v1136_v17, %v1136_v17  ;;  %v657_v44 = vmul.f32 %v1346_v18, %v1346_v18 }
 0x116   :  { %540 = vst [vmem:[%s1594_s2 + $0x1d8] sm:$0xff] %v1475_v52 }
 0x117   :  { %v707_v10 = vadd.f32 %v706_v48, %v644_v9  ;;  %v574_v12 = vadd.f32 %v573_v56, %v1351_v23  ;;  %v658_v56 = vmul.f32 %v1367_v57, %v1367_v57 }
 0x119   :  { %v708_v16 = vadd.f32 %v707_v10, %v645_v14  ;;  %v575_v19 = vadd.f32 %v574_v12, %v1372_v60  ;;  %v648_v60 = vmul.f32 %v1161_v24, %v1161_v24  ;;  %v659_v12 = vmul.f32 %v1397_v11, %v1397_v11 }
 0x11b   :  { %v576_v23 = vadd.f32 %v575_v19, %v1136_v17  ;;  %v709_v13 = vadd.f32 %v708_v16, %v646_v15  ;;  %v660_v15 = vmul.f32 %v1421_v34, %v1421_v34  ;;  %v661_v19 = vmul.f32 %v1445_v1, %v1445_v1 }
 0x11d   :  { %v577_v21 = vadd.f32 %v576_v23, %v1161_v24  ;;  %v710_v22 = vadd.f32 %v709_v13, %v647_v3  ;;  %v1493_v17 = vpop.f32.mrf.mxu3  ;;  %v651_v24 = vmul.f32 %v1215_v35, %v1215_v35  ;;  %v662_v3 = vmul.f32 %v430_v6, %v430_v6 }
 0x11e   :  { %541 = vst [vmem:[%s1594_s2 + $0x1e0] sm:$0xff] %v1493_v17 }
 0x11f   :  { %v578_v30 = vadd.f32 %v577_v21, %v1181_v28  ;;  %v711_v31 = vadd.f32 %v710_v22, %v648_v60  ;;  %v664_v22 = vmul.f32 %v1243_v41, %v1243_v41 }
 0x121   :  { %v579_v20 = vadd.f32 %v578_v30, %v1200_v32  ;;  %v712_v42 = vadd.f32 %v711_v31, %v649_v27 }
 0x123   :  { %v580_v29 = vadd.f32 %v579_v20, %v1215_v35  ;;  %v713_v28 = vadd.f32 %v712_v42, %v650_v38  ;;  %v666_v38 = vmul.f32 %v1285_v49, %v1285_v49 }
 0x125   :  { %v581_v54 = vadd.f32 %v580_v29, %v1236_v39  ;;  %v714_v32 = vadd.f32 %v713_v28, %v651_v24  ;;  %v1511_v35 = vpop.f32.mrf.mxu3  ;;  %v655_v39 = vmul.f32 %v1299_v51, %v1299_v51 }
 0x126   :  { %542 = vst [vmem:[%s1594_s2 + $0x1e8] sm:$0xff] %v1511_v35 }
 0x127   :  { %v715_v55 = vadd.f32 %v714_v32, %v652_v46  ;;  %v582_v50 = vadd.f32 %v581_v54, %v1257_v43  ;;  %v656_v43 = vmul.f32 %v1325_v62, %v1325_v62 }
 0x129   :  { %v583_v59 = vadd.f32 %v582_v50, %v1278_v47  ;;  %v716_v61 = vadd.f32 %v715_v55, %v653_v33 }
 0x12b   :  { %v584_v2 = vadd.f32 %v583_v59, %v1299_v51  ;;  %v717_v36 = vadd.f32 %v716_v61, %v654_v58 }
 0x12d   :  { %v585_v5 = vadd.f32 %v584_v2, %v1325_v62  ;;  %v718_v47 = vadd.f32 %v717_v36, %v655_v39  ;;  %v475_v51 = vpop.f32.mrf.mxu3  ;;  %v674_v36 = vmul.f32 %v1475_v52, %v1475_v52 }
 0x12e   :  { %543 = vst [vmem:[%s1594_s2 + $0x1f0] sm:$0xff] %v475_v51 }
 0x12f   :  { %v586_v7 = vadd.f32 %v585_v5, %v1346_v18  ;;  %v719_v8 = vadd.f32 %v718_v47, %v656_v43  ;;  %v675_v47 = vmul.f32 %v1493_v17, %v1493_v17 }
 0x131   :  { %v587_v48 = vadd.f32 %v586_v7, %v1367_v57  ;;  %v720_v9 = vadd.f32 %v719_v8, %v657_v44  ;;  %v676_v7 = vmul.f32 %v1511_v35, %v1511_v35 }
 0x133   :  { %v721_v10 = vadd.f32 %v720_v9, %v658_v56  ;;  %v588_v62 = vadd.f32 %v587_v48, %v1397_v11  ;;  %v663_v11 = vmul.f32 %v1222_v37, %v1222_v37  ;;  %v677_v48 = vmul.f32 %v475_v51, %v475_v51 }
 0x135   :  { %v722_v14 = vadd.f32 %v721_v10, %v659_v12  ;;  %v589_v18 = vadd.f32 %v588_v62, %v1421_v34  ;;  %v478_v60 = vpop.f32.mrf.mxu3 }
 0x136   :  { %544 = vst [vmem:[%s1594_s2 + $0x1f8] sm:$0xff] %v478_v60  ;;  %v678_v56 = vmul.f32 %v478_v60, %v478_v60 }
 0x137   :  { %v723_v16 = vadd.f32 %v722_v14, %v660_v15  ;;  %v590_v57 = vadd.f32 %v589_v18, %v1445_v1 }
 0x139   :  { %v724_v23 = vadd.f32 %v723_v16, %v661_v19  ;;  %v591_v13 = vadd.f32 %v590_v57, %v430_v6  ;;  %v665_v6 = vmul.f32 %v1264_v45, %v1264_v45 }
 0x13b   :  { %v592_v21 = vadd.f32 %v591_v13, %v1222_v37  ;;  %v725_v34 = vadd.f32 %v724_v23, %v662_v3  ;;  %v667_v37 = vmul.f32 %v1306_v53, %v1306_v53 }
 0x13d   :  { %v593_v27 = vadd.f32 %v592_v21, %v1243_v41  ;;  %v726_v1 = vadd.f32 %v725_v34, %v663_v11  ;;  %v668_v41 = vmul.f32 %v1332_v4, %v1332_v4 }
 0x13f   :  { %v594_v30 = vadd.f32 %v593_v27, %v1264_v45  ;;  %v727_v31 = vadd.f32 %v726_v1, %v664_v22  ;;  %v669_v45 = vmul.f32 %v1353_v26, %v1353_v26 }
 0x141   :  { %v595_v20 = vadd.f32 %v594_v30, %v1285_v49  ;;  %v728_v42 = vadd.f32 %v727_v31, %v665_v6  ;;  %v670_v49 = vmul.f32 %v1374_v0, %v1374_v0 }
 0x143   :  { %v596_v24 = vadd.f32 %v595_v20, %v1306_v53  ;;  %v729_v29 = vadd.f32 %v728_v42, %v666_v38  ;;  %v671_v53 = vmul.f32 %v1406_v63, %v1406_v63 }
 0x145   :  { %v597_v28 = vadd.f32 %v596_v24, %v1332_v4  ;;  %v730_v46 = vadd.f32 %v729_v29, %v667_v37  ;;  %v672_v4 = vmul.f32 %v1430_v25, %v1430_v25 }
 0x147   :  { %v731_v54 = vadd.f32 %v730_v46, %v668_v41  ;;  %v598_v32 = vadd.f32 %v597_v28, %v1353_v26  ;;  %v673_v26 = vmul.f32 %v1454_v40, %v1454_v40 }
 0x149   :  { %v599_v33 = vadd.f32 %v598_v32, %v1374_v0  ;;  %v732_v55 = vadd.f32 %v731_v54, %v669_v45 }
 0x14b   :  { %v600_v50 = vadd.f32 %v599_v33, %v1406_v63  ;;  %v733_v58 = vadd.f32 %v732_v55, %v670_v49 }
 0x14d   :  { %v601_v59 = vadd.f32 %v600_v50, %v1430_v25  ;;  %v734_v61 = vadd.f32 %v733_v58, %v671_v53 }
 0x14f   :  { %v602_v39 = vadd.f32 %v601_v59, %v1454_v40  ;;  %v735_v2 = vadd.f32 %v734_v61, %v672_v4 }
 0x151   :  { %v603_v0 = vadd.f32 %v602_v39, %v1475_v52  ;;  %v736_v43 = vadd.f32 %v735_v2, %v673_v26 }
 0x153   :  { %v737_v63 = vadd.f32 %v736_v43, %v674_v36  ;;  %v604_v5 = vadd.f32 %v603_v0, %v1493_v17 }
 0x155   :  { %v738_v25 = vadd.f32 %v737_v63, %v675_v47  ;;  %v605_v44 = vadd.f32 %v604_v5, %v1511_v35 }
 0x157   :  { %v739_v40 = vadd.f32 %v738_v25, %v676_v7  ;;  %v606_v8 = vadd.f32 %v605_v44, %v475_v51 }
 0x159   :  { %v740_v9 = vadd.f32 %v739_v40, %v677_v48  ;;  %v607_v10 = vadd.f32 %v606_v8, %v478_v60 }
 0x15b   :  { %v608_v52 = vrot.slane %v607_v10, 4  ;;  %v741_v62 = vadd.f32 %v740_v9, %v678_v56 }
 0x15d   :  { %v609_v12 = vadd.f32 %v608_v52, %v607_v10  ;;  %v742_v14 = vrot.slane %v741_v62, 4 }
 0x15f   :  { %v610_v18 = vrot.slane %v609_v12, 2  ;;  %v743_v15 = vadd.f32 %v742_v14, %v741_v62 }
 0x161   :  { %v611_v16 = vadd.f32 %v610_v18, %v609_v12  ;;  %v744_v17 = vrot.slane %v743_v15, 2 }
 0x163   :  { %v612_v57 = vrot.slane %v611_v16, 1  ;;  %v745_v19 = vadd.f32 %v744_v17, %v743_v15 }
 0x165   :  { %v613_v3 = vadd.f32 %v612_v57, %v611_v16  ;;  %v746_v23 = vrot.slane %v745_v19, 1 }
 0x167   :  { %614 = vst [vmem:[%s1595_s3] sm:$0x1] %v613_v3  ;;  %v747_v35 = vadd.f32 %v746_v23, %v745_v19 }
 0x169   :  { %748 = vst [vmem:[%s1596_s4] sm:$0x1] %v747_v35 }

// kernel: bottleneck_block.7
= control target key start
LH: loop header
LB: loop body
LE: loop exit
PB: predicated region body
PF: predicated region fallthrough
CT: control target
= control target key end

     0   :  { %vm285_vm0 = vcmask 64512   ;;  %s1948_s1 = inlined_call_operand.vmem [shape: f32[8,128], index: 1, kind: input, shape index: {}]   ;;  %s1949_s0 = inlined_call_operand.vmem [shape: f32[512,8], index: 0, kind: input, shape index: {}]   ;;  %s1950_s2 = inlined_call_operand.vmem [shape: f32[1,8], index: 2, kind: input, shape index: {}]   ;;  %s1951_s3 = inlined_call_operand.vmem [shape: f32[1,8], index: 3, kind: input, shape index: {}]   ;;  %s1952_s4 = inlined_call_operand.vmem [shape: f32[512,128], index: 4, kind: output, shape index: {0}]   ;;  %s1953_s5 = inlined_call_operand.vmem [shape: f32[1,1,128], index: 5, kind: output, shape index: {1}]   ;;  %s1954_s6 = inlined_call_operand.vmem [shape: f32[1,1,128], index: 6, kind: output, shape index: {2}]  }
   0x1   :  { %v284_v0 = vld [vmem:[%s1948_s1] sm:$0xff]  ;;  %v21_v4 = vld [vmem:[%s1949_s0 + $0x8] sm:$0xff]  ;;  %v22_v14 = vld [vmem:[%s1949_s0 + $0x10] sm:$0xff] }
   0x2   :  { %v20_v1 = vld [vmem:[%s1949_s0] sm:$0xff]  ;;  %493 = vmatpush.msra.mxu0 %v284_v0  ;;  %1031 = vmatpush.msra.mxu1 %v284_v0  ;;  %v37_v15 = vld [vmem:[%s1949_s0 + $0x88] sm:$0xff]  ;;  %v23_v22 = vld [vmem:[%s1949_s0 + $0x18] sm:$0xff] }
   0x3   :  { %v1080_v2 = vld [vmem:[%s1950_s2] ss:$0 sm:$0xff]  ;;  %1032 = vmatpush.msra.mxu2 %v284_v0  ;;  %1033 = vmatpush.msra.mxu3 %v284_v0  ;;  %v38_v23 = vld [vmem:[%s1949_s0 + $0x90] sm:$0xff]  ;;  %v39_v31 = vld [vmem:[%s1949_s0 + $0x98] sm:$0xff] }
   0x4   :  { %v1085_v3 = vld [vmem:[%s1951_s3] ss:$0 sm:$0xff]  ;;  %v88_v5 = vmul.f32 %v1080_v2, %v20_v1  ;;  %v89_v9 = vmul.f32 %v1080_v2, %v21_v4  ;;  %v105_v16 = vmul.f32 %v1080_v2, %v37_v15  ;;  %v90_v18 = vmul.f32 %v1080_v2, %v22_v14  ;;  %v25_v42 = vld [vmem:[%s1949_s0 + $0x28] sm:$0xff]  ;;  %v26_v54 = vld [vmem:[%s1949_s0 + $0x30] sm:$0xff] }
   0x5   :  { %v36_v6 = vld [vmem:[%s1949_s0 + $0x80] sm:$0xff]  ;;  %v106_v24 = vmul.f32 %v1080_v2, %v38_v23  ;;  %v91_v26 = vmul.f32 %v1080_v2, %v23_v22  ;;  %v107_v32 = vmul.f32 %v1080_v2, %v39_v31  ;;  %v53_v45 = vld [vmem:[%s1949_s0 + $0x108] sm:$0xff]  ;;  %v93_v47 = vmul.f32 %v1080_v2, %v25_v42  ;;  %v54_v57 = vld [vmem:[%s1949_s0 + $0x110] sm:$0xff] }
   0x6   :  { %v104_v7 = vmul.f32 %v1080_v2, %v36_v6  ;;  %v156_v8 = vadd.f32 %v1085_v3, %v88_v5  ;;  %v157_v13 = vadd.f32 %v1085_v3, %v89_v9  ;;  %v173_v19 = vadd.f32 %v1085_v3, %v105_v16  ;;  %v24_v30 = vld [vmem:[%s1949_s0 + $0x20] sm:$0xff]  ;;  %v41_v55 = vld [vmem:[%s1949_s0 + $0xa8] sm:$0xff]  ;;  %v27_v4 = vld [vmem:[%s1949_s0 + $0x38] sm:$0xff] }
   0x7   :  { %v158_v21 = vadd.f32 %v1085_v3, %v90_v18  ;;  %v174_v27 = vadd.f32 %v1085_v3, %v106_v24  ;;  %v159_v29 = vadd.f32 %v1085_v3, %v91_v26  ;;  %v52_v33 = vld [vmem:[%s1949_s0 + $0x100] sm:$0xff]  ;;  %v92_v35 = vmul.f32 %v1080_v2, %v24_v30  ;;  %v42_v5 = vld [vmem:[%s1949_s0 + $0xb0] sm:$0xff] }
   0x8   :  { %v172_v10 = vadd.f32 %v1085_v3, %v104_v7  ;;  %v220_v11 = vmax.f32 %v156_v8, 0.0  ;;  %v221_v17 = vmax.f32 %v157_v13, 0.0  ;;  %v237_v20 = vmax.f32 %v173_v19, 0.0  ;;  %v40_v43 = vld [vmem:[%s1949_s0 + $0xa0] sm:$0xff]  ;;  %v55_v7 = vld [vmem:[%s1949_s0 + $0x118] sm:$0xff] }
   0x9   :  { %v222_v25 = vmax.f32 %v158_v21, 0.0  ;;  %v238_v28 = vmax.f32 %v174_v27, 0.0  ;;  %v223_v34 = vmax.f32 %v159_v29, 0.0  ;;  %v175_v36 = vadd.f32 %v1085_v3, %v107_v32  ;;  %v28_v15 = vld [vmem:[%s1949_s0 + $0x40] sm:$0xff]  ;;  %v29_v32 = vld [vmem:[%s1949_s0 + $0x48] sm:$0xff] }
   0xa   :  { %v236_v12 = vmax.f32 %v172_v10, 0.0  ;;  %967 = vmatmul.msk.f32.vlgmr.msra.gmra.mxu0 %vm285_vm0, %v220_v11  ;;  %v120_v37 = vmul.f32 %v1080_v2, %v52_v33  ;;  %v160_v40 = vadd.f32 %v1085_v3, %v92_v35  ;;  %v108_v44 = vmul.f32 %v1080_v2, %v40_v43  ;;  %v68_v21 = vld [vmem:[%s1949_s0 + $0x180] sm:$0xff] }
   0xb   :  { %v239_v38 = vmax.f32 %v175_v36, 0.0  ;;  %v121_v49 = vmul.f32 %v1080_v2, %v53_v45  ;;  %v161_v52 = vadd.f32 %v1085_v3, %v93_v47  ;;  %v109_v56 = vmul.f32 %v1080_v2, %v41_v55  ;;  %v44_v33 = vld [vmem:[%s1949_s0 + $0xc0] sm:$0xff]  ;;  %v57_v36 = vld [vmem:[%s1949_s0 + $0x128] sm:$0xff] }
   0xc   :  { %983 = vmatmul.msk.f32.vlgmr.msra.gmra.mxu1 %vm285_vm0, %v236_v12  ;;  %v188_v39 = vadd.f32 %v1085_v3, %v120_v37  ;;  %v224_v46 = vmax.f32 %v160_v40, 0.0  ;;  %v176_v48 = vadd.f32 %v1085_v3, %v108_v44  ;;  %v94_v59 = vmul.f32 %v1080_v2, %v26_v54  ;;  %v69_v37 = vld [vmem:[%s1949_s0 + $0x188] sm:$0xff] }
   0xd   :  { %v189_v51 = vadd.f32 %v1085_v3, %v121_v49  ;;  %v225_v58 = vmax.f32 %v161_v52, 0.0  ;;  %v177_v60 = vadd.f32 %v1085_v3, %v109_v56  ;;  %v122_v61 = vmul.f32 %v1080_v2, %v54_v57  ;;  %v45_v49 = vld [vmem:[%s1949_s0 + $0xc8] sm:$0xff]  ;;  %v58_v52 = vld [vmem:[%s1949_s0 + $0x130] sm:$0xff] }
   0xe   :  { %v252_v41 = vmax.f32 %v188_v39, 0.0  ;;  %v240_v50 = vmax.f32 %v176_v48, 0.0  ;;  %v162_v0 = vadd.f32 %v1085_v3, %v94_v59  ;;  %v110_v6 = vmul.f32 %v1080_v2, %v42_v5 }
   0xf   :  { %v253_v53 = vmax.f32 %v189_v51, 0.0  ;;  %v241_v62 = vmax.f32 %v177_v60, 0.0  ;;  %v190_v63 = vadd.f32 %v1085_v3, %v122_v61  ;;  %v95_v9 = vmul.f32 %v1080_v2, %v27_v4 }
  0x10   :  { %999 = vmatmul.msk.f32.vlgmr.msra.gmra.mxu2 %vm285_vm0, %v252_v41  ;;  %v226_v8 = vmax.f32 %v162_v0, 0.0  ;;  %v178_v10 = vadd.f32 %v1085_v3, %v110_v6  ;;  %v123_v11 = vmul.f32 %v1080_v2, %v55_v7  ;;  %v96_v19 = vmul.f32 %v1080_v2, %v28_v15  ;;  %v31_v0 = vld [vmem:[%s1949_s0 + $0x58] sm:$0xff] }
  0x11   :  { %v254_v1 = vmax.f32 %v190_v63, 0.0  ;;  %v163_v14 = vadd.f32 %v1085_v3, %v95_v9  ;;  %v125_v40 = vmul.f32 %v1080_v2, %v57_v36  ;;  %v137_v41 = vmul.f32 %v1080_v2, %v69_v37  ;;  %v59_v6 = vld [vmem:[%s1949_s0 + $0x138] sm:$0xff] }
  0x12   :  { %968 = vmatmul.msk.f32.gmra.mxu0 %vm285_vm0, %v221_v17  ;;  %v242_v12 = vmax.f32 %v178_v10, 0.0  ;;  %v191_v13 = vadd.f32 %v1085_v3, %v123_v11  ;;  %v43_v17 = vld [vmem:[%s1949_s0 + $0xb8] sm:$0xff]  ;;  %v164_v29 = vadd.f32 %v1085_v3, %v96_v19  ;;  %v126_v56 = vmul.f32 %v1080_v2, %v58_v52 }
  0x13   :  { %v111_v18 = vmul.f32 %v1080_v2, %v43_v17  ;;  %v227_v22 = vmax.f32 %v163_v14, 0.0  ;;  %v193_v43 = vadd.f32 %v1085_v3, %v125_v40  ;;  %v205_v44 = vadd.f32 %v1085_v3, %v137_v41  ;;  %v71_v7 = vld [vmem:[%s1949_s0 + $0x198] sm:$0xff] }
  0x14   :  { %984 = vmatmul.msk.f32.gmra.mxu1 %vm285_vm0, %v237_v20  ;;  %v255_v16 = vmax.f32 %v191_v13, 0.0  ;;  %v56_v20 = vld [vmem:[%s1949_s0 + $0x120] sm:$0xff]  ;;  %v228_v35 = vmax.f32 %v164_v29, 0.0  ;;  %v194_v59 = vadd.f32 %v1085_v3, %v126_v56  ;;  %v127_v10 = vmul.f32 %v1080_v2, %v59_v6  ;;  %v47_v19 = vld [vmem:[%s1949_s0 + $0xd8] sm:$0xff] }
  0x15   :  { %v179_v23 = vadd.f32 %v1085_v3, %v111_v18  ;;  %v124_v24 = vmul.f32 %v1080_v2, %v56_v20  ;;  %v257_v47 = vmax.f32 %v193_v43, 0.0  ;;  %v269_v48 = vmax.f32 %v205_v44, 0.0 }
  0x16   :  { %v139_v11 = vmul.f32 %v1080_v2, %v71_v7  ;;  %v195_v13 = vadd.f32 %v1085_v3, %v127_v10  ;;  %v115_v20 = vmul.f32 %v1080_v2, %v47_v19 }
  0x17   :  { %v243_v26 = vmax.f32 %v179_v23, 0.0  ;;  %v192_v27 = vadd.f32 %v1085_v3, %v124_v24  ;;  %v72_v23 = vld [vmem:[%s1949_s0 + $0x1a0] sm:$0xff] }
  0x18   :  { %1000 = vmatmul.msk.f32.gmra.mxu2 %vm285_vm0, %v253_v53  ;;  %v70_v53 = vld [vmem:[%s1949_s0 + $0x190] sm:$0xff]  ;;  %v207_v14 = vadd.f32 %v1085_v3, %v139_v11  ;;  %v259_v17 = vmax.f32 %v195_v13, 0.0 }
  0x19   :  { %v256_v30 = vmax.f32 %v192_v27, 0.0  ;;  %v138_v57 = vmul.f32 %v1080_v2, %v70_v53  ;;  %v140_v27 = vmul.f32 %v1080_v2, %v72_v23  ;;  %v76_v23 = vld [vmem:[%s1949_s0 + $0x1c0] sm:$0xff] }
  0x1a   :  { %969 = vmatmul.msk.f32.gmra.mxu0 %vm285_vm0, %v222_v25  ;;  %v136_v25 = vmul.f32 %v1080_v2, %v68_v21  ;;  %v271_v18 = vmax.f32 %v207_v14, 0.0 }
  0x1b   :  { %v206_v60 = vadd.f32 %v1085_v3, %v138_v57 }
  0x1c   :  { %985 = vmatmul.msk.f32.gmra.mxu1 %vm285_vm0, %v238_v28  ;;  %v204_v28 = vadd.f32 %v1085_v3, %v136_v25  ;;  %v183_v25 = vadd.f32 %v1085_v3, %v115_v20  ;;  %v51_v20 = vld [vmem:[%s1949_s0 + $0xf8] sm:$0xff] }
  0x1d   :  { %v270_v63 = vmax.f32 %v206_v60, 0.0 }
  0x1e   :  { %v268_v31 = vmax.f32 %v204_v28, 0.0  ;;  %v247_v28 = vmax.f32 %v183_v25, 0.0 }
  0x20   :  { %1001 = vmatmul.msk.f32.gmra.mxu2 %vm285_vm0, %v254_v1  ;;  %1015 = vmatmul.msk.f32.vlgmr.msra.gmra.mxu3 %vm285_vm0, %v268_v31  ;;  %v46_v1 = vld [vmem:[%s1949_s0 + $0xd0] sm:$0xff] }
  0x21   :  { %v114_v4 = vmul.f32 %v1080_v2, %v46_v1 }
  0x22   :  { %970 = vmatmul.msk.f32.gmra.mxu0 %vm285_vm0, %v223_v34  ;;  %v112_v34 = vmul.f32 %v1080_v2, %v44_v33 }
  0x23   :  { %v182_v9 = vadd.f32 %v1085_v3, %v114_v4  ;;  %v35_v4 = vld [vmem:[%s1949_s0 + $0x78] sm:$0xff] }
  0x24   :  { %986 = vmatmul.msk.f32.gmra.mxu1 %vm285_vm0, %v239_v38  ;;  %v97_v38 = vmul.f32 %v1080_v2, %v29_v32  ;;  %v180_v39 = vadd.f32 %v1085_v3, %v112_v34  ;;  %v33_v34 = vld [vmem:[%s1949_s0 + $0x68] sm:$0xff]  ;;  %v103_v10 = vmul.f32 %v1080_v2, %v35_v4 }
  0x25   :  { %v101_v40 = vmul.f32 %v1080_v2, %v33_v34  ;;  %v77_v34 = vld [vmem:[%s1949_s0 + $0x1c8] sm:$0xff] }
  0x26   :  { %v244_v42 = vmax.f32 %v180_v39, 0.0  ;;  %v165_v45 = vadd.f32 %v1085_v3, %v97_v38  ;;  %v61_v38 = vld [vmem:[%s1949_s0 + $0x148] sm:$0xff] }
  0x27   :  { %v73_v39 = vld [vmem:[%s1949_s0 + $0x1a8] sm:$0xff] }
  0x28   :  { %1002 = vmatmul.msk.f32.gmra.mxu2 %vm285_vm0, %v255_v16  ;;  %1016 = vmatmul.msk.f32.gmra.mxu3 %vm285_vm0, %v269_v48  ;;  %v229_v54 = vmax.f32 %v165_v45, 0.0  ;;  %v32_v16 = vld [vmem:[%s1949_s0 + $0x60] sm:$0xff]  ;;  %v141_v43 = vmul.f32 %v1080_v2, %v73_v39  ;;  %v34_v48 = vld [vmem:[%s1949_s0 + $0x70] sm:$0xff] }
  0x29   :  { %v100_v21 = vmul.f32 %v1080_v2, %v32_v16  ;;  %v102_v53 = vmul.f32 %v1080_v2, %v34_v48 }
  0x2a   :  { %971 = vmatmul.msk.f32.gmra.mxu0 %vm285_vm0, %v224_v46  ;;  %v30_v46 = vld [vmem:[%s1949_s0 + $0x50] sm:$0xff] }
  0x2b   :  { %v98_v51 = vmul.f32 %v1080_v2, %v30_v46  ;;  %v168_v31 = vadd.f32 %v1085_v3, %v100_v21  ;;  %v209_v46 = vadd.f32 %v1085_v3, %v141_v43  ;;  %v119_v21 = vmul.f32 %v1080_v2, %v51_v20  ;;  %v66_v43 = vld [vmem:[%s1949_s0 + $0x170] sm:$0xff] }
  0x2c   :  { %987 = vmatmul.msk.f32.gmra.mxu1 %vm285_vm0, %v240_v50  ;;  %v113_v50 = vmul.f32 %v1080_v2, %v45_v49 }
  0x2d   :  { %v166_v61 = vadd.f32 %v1085_v3, %v98_v51  ;;  %v232_v37 = vmax.f32 %v168_v31, 0.0  ;;  %v49_v51 = vld [vmem:[%s1949_s0 + $0xe8] sm:$0xff]  ;;  %v187_v25 = vadd.f32 %v1085_v3, %v119_v21 }
  0x2e   :  { %v181_v55 = vadd.f32 %v1085_v3, %v113_v50  ;;  %v273_v50 = vmax.f32 %v209_v46, 0.0  ;;  %v117_v52 = vmul.f32 %v1080_v2, %v49_v51 }
  0x2f   :  { %v230_v5 = vmax.f32 %v166_v61, 0.0 }
  0x30   :  { %1003 = vmatmul.msk.f32.gmra.mxu2 %vm285_vm0, %v256_v30  ;;  %1017 = vmatmul.msk.f32.gmra.mxu3 %vm285_vm0, %v270_v63  ;;  %v208_v30 = vadd.f32 %v1085_v3, %v140_v27  ;;  %v185_v57 = vadd.f32 %v1085_v3, %v117_v52  ;;  %v170_v63 = vadd.f32 %v1085_v3, %v102_v53 }
  0x31   :  { %v144_v27 = vmul.f32 %v1080_v2, %v76_v23 }
  0x32   :  { %972 = vmatmul.msk.f32.gmra.mxu0 %vm285_vm0, %v225_v58  ;;  %v245_v58 = vmax.f32 %v181_v55, 0.0  ;;  %v272_v33 = vmax.f32 %v208_v30, 0.0  ;;  %v74_v55 = vld [vmem:[%s1949_s0 + $0x1b0] sm:$0xff]  ;;  %v249_v60 = vmax.f32 %v185_v57, 0.0  ;;  %v234_v7 = vmax.f32 %v170_v63, 0.0  ;;  %v67_v57 = vld [vmem:[%s1949_s0 + $0x178] sm:$0xff] }
  0x33   :  { %v212_v30 = vadd.f32 %v1085_v3, %v144_v27  ;;  %v82_v27 = vld [vmem:[%s1949_s0 + $0x1f0] sm:$0xff] }
  0x34   :  { %988 = vmatmul.msk.f32.gmra.mxu1 %vm285_vm0, %v241_v62  ;;  %v258_v62 = vmax.f32 %v194_v59, 0.0  ;;  %v142_v59 = vmul.f32 %v1080_v2, %v74_v55 }
  0x38   :  { %1004 = vmatmul.msk.f32.gmra.mxu2 %vm285_vm0, %v257_v47  ;;  %1018 = vmatmul.msk.f32.gmra.mxu3 %vm285_vm0, %v271_v18  ;;  %v169_v47 = vadd.f32 %v1085_v3, %v101_v40 }
  0x3a   :  { %973 = vmatmul.msk.f32.gmra.mxu0 %vm285_vm0, %v226_v8  ;;  %v99_v8 = vmul.f32 %v1080_v2, %v31_v0  ;;  %v233_v56 = vmax.f32 %v169_v47, 0.0 }
  0x3c   :  { %989 = vmatmul.msk.f32.gmra.mxu1 %vm285_vm0, %v242_v12  ;;  %v246_v12 = vmax.f32 %v182_v9, 0.0  ;;  %v167_v15 = vadd.f32 %v1085_v3, %v99_v8  ;;  %v63_v8 = vld [vmem:[%s1949_s0 + $0x158] sm:$0xff] }
  0x3d   :  { %v75_v9 = vld [vmem:[%s1949_s0 + $0x1b8] sm:$0xff] }
  0x3e   :  { %v231_v24 = vmax.f32 %v167_v15, 0.0  ;;  %v143_v13 = vmul.f32 %v1080_v2, %v75_v9 }
  0x40   :  { %1005 = vmatmul.msk.f32.gmra.mxu2 %vm285_vm0, %v258_v62  ;;  %1019 = vmatmul.msk.f32.gmra.mxu3 %vm285_vm0, %v272_v33  ;;  %v210_v62 = vadd.f32 %v1085_v3, %v142_v59  ;;  %v211_v16 = vadd.f32 %v1085_v3, %v143_v13  ;;  %v65_v33 = vld [vmem:[%s1949_s0 + $0x168] sm:$0xff]  ;;  %v135_v59 = vmul.f32 %v1080_v2, %v67_v57 }
  0x42   :  { %974 = vmatmul.msk.f32.gmra.mxu0 %vm285_vm0, %v227_v22  ;;  %v60_v22 = vld [vmem:[%s1949_s0 + $0x140] sm:$0xff]  ;;  %v274_v1 = vmax.f32 %v210_v62, 0.0  ;;  %v275_v19 = vmax.f32 %v211_v16, 0.0 }
  0x44   :  { %990 = vmatmul.msk.f32.gmra.mxu1 %vm285_vm0, %v243_v26  ;;  %v128_v26 = vmul.f32 %v1080_v2, %v60_v22  ;;  %v64_v22 = vld [vmem:[%s1949_s0 + $0x160] sm:$0xff] }
  0x46   :  { %v196_v29 = vadd.f32 %v1085_v3, %v128_v26  ;;  %v132_v26 = vmul.f32 %v1080_v2, %v64_v22 }
  0x48   :  { %1006 = vmatmul.msk.f32.gmra.mxu2 %vm285_vm0, %v259_v17  ;;  %v260_v32 = vmax.f32 %v196_v29, 0.0  ;;  %1020 = vmatmul.msk.f32.gmra.mxu3 %vm285_vm0, %v273_v50  ;;  %v171_v17 = vadd.f32 %v1085_v3, %v103_v10  ;;  %v200_v29 = vadd.f32 %v1085_v3, %v132_v26 }
  0x4a   :  { %975 = vmatmul.msk.f32.gmra.mxu0 %vm285_vm0, %v228_v35  ;;  %v48_v35 = vld [vmem:[%s1949_s0 + $0xe0] sm:$0xff]  ;;  %v264_v31 = vmax.f32 %v200_v29, 0.0 }
  0x4b   :  { %v116_v36 = vmul.f32 %v1080_v2, %v48_v35  ;;  %v133_v35 = vmul.f32 %v1080_v2, %v65_v33 }
  0x4c   :  { %991 = vmatmul.msk.f32.gmra.mxu1 %vm285_vm0, %v244_v42  ;;  %v129_v42 = vmul.f32 %v1080_v2, %v61_v38 }
  0x4d   :  { %v184_v41 = vadd.f32 %v1085_v3, %v116_v36  ;;  %v145_v36 = vmul.f32 %v1080_v2, %v77_v34  ;;  %v201_v39 = vadd.f32 %v1085_v3, %v133_v35  ;;  %v83_v34 = vld [vmem:[%s1949_s0 + $0x1f8] sm:$0xff] }
  0x4e   :  { %v197_v45 = vadd.f32 %v1085_v3, %v129_v42  ;;  %v151_v35 = vmul.f32 %v1080_v2, %v83_v34 }
  0x4f   :  { %v248_v44 = vmax.f32 %v184_v41, 0.0  ;;  %v213_v40 = vadd.f32 %v1085_v3, %v145_v36  ;;  %v265_v41 = vmax.f32 %v201_v39, 0.0 }
  0x50   :  { %1007 = vmatmul.msk.f32.gmra.mxu2 %vm285_vm0, %v260_v32  ;;  %v261_v49 = vmax.f32 %v197_v45, 0.0  ;;  %1021 = vmatmul.msk.f32.gmra.mxu3 %vm285_vm0, %v274_v1  ;;  %v276_v32 = vmax.f32 %v212_v30, 0.0  ;;  %v134_v45 = vmul.f32 %v1080_v2, %v66_v43  ;;  %v203_v1 = vadd.f32 %v1085_v3, %v135_v59 }
  0x51   :  { %v277_v42 = vmax.f32 %v213_v40, 0.0  ;;  %v219_v40 = vadd.f32 %v1085_v3, %v151_v35 }
  0x52   :  { %976 = vmatmul.msk.f32.gmra.mxu0 %vm285_vm0, %v229_v54  ;;  %v62_v54 = vld [vmem:[%s1949_s0 + $0x150] sm:$0xff]  ;;  %v202_v52 = vadd.f32 %v1085_v3, %v134_v45 }
  0x54   :  { %992 = vmatmul.msk.f32.gmra.mxu1 %vm285_vm0, %v245_v58  ;;  %v130_v58 = vmul.f32 %v1080_v2, %v62_v54  ;;  %v266_v55 = vmax.f32 %v202_v52, 0.0 }
  0x56   :  { %v198_v61 = vadd.f32 %v1085_v3, %v130_v58  ;;  %v79_v58 = vld [vmem:[%s1949_s0 + $0x1d8] sm:$0xff] }
  0x58   :  { %1008 = vmatmul.msk.f32.gmra.mxu2 %vm285_vm0, %v261_v49  ;;  %v262_v0 = vmax.f32 %v198_v61, 0.0  ;;  %1022 = vmatmul.msk.f32.gmra.mxu3 %vm285_vm0, %v275_v19 }
  0x5a   :  { %977 = vmatmul.msk.f32.gmra.mxu0 %vm285_vm0, %v230_v5  ;;  %v50_v5 = vld [vmem:[%s1949_s0 + $0xf0] sm:$0xff] }
  0x5b   :  { %v118_v6 = vmul.f32 %v1080_v2, %v50_v5 }
  0x5c   :  { %993 = vmatmul.msk.f32.gmra.mxu1 %vm285_vm0, %v246_v12  ;;  %v131_v12 = vmul.f32 %v1080_v2, %v63_v8  ;;  %v80_v8 = vld [vmem:[%s1949_s0 + $0x1e0] sm:$0xff] }
  0x5d   :  { %v186_v11 = vadd.f32 %v1085_v3, %v118_v6  ;;  %v267_v6 = vmax.f32 %v203_v1, 0.0  ;;  %v148_v9 = vmul.f32 %v1080_v2, %v80_v8 }
  0x5e   :  { %v199_v15 = vadd.f32 %v1085_v3, %v131_v12 }
  0x5f   :  { %v250_v14 = vmax.f32 %v186_v11, 0.0 }
  0x60   :  { %1009 = vmatmul.msk.f32.gmra.mxu2 %vm285_vm0, %v262_v0  ;;  %v263_v18 = vmax.f32 %v199_v15, 0.0  ;;  %1023 = vmatmul.msk.f32.gmra.mxu3 %vm285_vm0, %v276_v32 }
  0x62   :  { %978 = vmatmul.msk.f32.gmra.mxu0 %vm285_vm0, %v231_v24  ;;  %v235_v24 = vmax.f32 %v171_v17, 0.0  ;;  %v81_v17 = vld [vmem:[%s1949_s0 + $0x1e8] sm:$0xff] }
  0x64   :  { %994 = vmatmul.msk.f32.gmra.mxu1 %vm285_vm0, %v247_v28  ;;  %v251_v28 = vmax.f32 %v187_v25, 0.0 }
  0x68   :  { %1010 = vmatmul.msk.f32.gmra.mxu2 %vm285_vm0, %v263_v18  ;;  %1024 = vmatmul.msk.f32.gmra.mxu3 %vm285_vm0, %v277_v42  ;;  %v149_v18 = vmul.f32 %v1080_v2, %v81_v17 }
  0x6a   :  { %979 = vmatmul.msk.f32.gmra.mxu0 %vm285_vm0, %v232_v37 }
  0x6c   :  { %995 = vmatmul.msk.f32.gmra.mxu1 %vm285_vm0, %v248_v44  ;;  %v78_v44 = vld [vmem:[%s1949_s0 + $0x1d0] sm:$0xff] }
  0x6d   :  { %v146_v46 = vmul.f32 %v1080_v2, %v78_v44 }
  0x6f   :  { %v214_v53 = vadd.f32 %v1085_v3, %v146_v46 }
  0x70   :  { %1011 = vmatmul.msk.f32.gmra.mxu2 %vm285_vm0, %v264_v31 }
  0x72   :  { %980 = vmatmul.msk.f32.gmra.mxu0 %vm285_vm0, %v233_v56  ;;  %v278_v56 = vmax.f32 %v214_v53, 0.0 }
  0x74   :  { %996 = vmatmul.msk.f32.gmra.mxu1 %vm285_vm0, %v249_v60  ;;  %1025 = vmatmul.msk.f32.gmra.mxu3 %vm285_vm0, %v278_v56  ;;  %v147_v60 = vmul.f32 %v1080_v2, %v79_v58 }
  0x76   :  { %v215_v4 = vadd.f32 %v1085_v3, %v147_v60 }
  0x78   :  { %1012 = vmatmul.msk.f32.gmra.mxu2 %vm285_vm0, %v265_v41 }
  0x7a   :  { %981 = vmatmul.msk.f32.gmra.mxu0 %vm285_vm0, %v234_v7  ;;  %v279_v7 = vmax.f32 %v215_v4, 0.0 }
  0x7c   :  { %997 = vmatmul.msk.f32.gmra.mxu1 %vm285_vm0, %v250_v14  ;;  %1026 = vmatmul.msk.f32.gmra.mxu3 %vm285_vm0, %v279_v7  ;;  %v216_v14 = vadd.f32 %v1085_v3, %v148_v9 }
  0x7e   :  { %v280_v16 = vmax.f32 %v216_v14, 0.0 }
  0x80   :  { %1013 = vmatmul.msk.f32.gmra.mxu2 %vm285_vm0, %v266_v55 }
  0x82   :  { %982 = vmatmul.msk.f32.gmra.mxu0 %vm285_vm0, %v235_v24  ;;  %v217_v24 = vadd.f32 %v1085_v3, %v149_v18 }
  0x84   :  { %998 = vmatmul.msk.f32.gmra.mxu1 %vm285_vm0, %v251_v28  ;;  %1027 = vmatmul.msk.f32.gmra.mxu3 %vm285_vm0, %v280_v16  ;;  %v281_v26 = vmax.f32 %v217_v24, 0.0  ;;  %v150_v28 = vmul.f32 %v1080_v2, %v82_v27  ;;  %v283_v2 = vmax.f32 %v219_v40, 0.0 }
  0x86   :  { %v218_v32 = vadd.f32 %v1085_v3, %v150_v28 }
  0x87   :  { %v495_v37 = vpop.f32.mrf.mxu0 }
  0x88   :  { %687 = vst [vmem:[%s1952_s4] sm:$0xff] %v495_v37  ;;  %v821_v47 = vmul.f32 %v495_v37, %v495_v37  ;;  %1014 = vmatmul.msk.f32.gmra.mxu2 %vm285_vm0, %v267_v6  ;;  %v282_v33 = vmax.f32 %v218_v32, 0.0 }
  0x89   :  { %v1419_v38 = vpop.f32.mrf.mxu1 }
  0x8a   :  { %703 = vst [vmem:[%s1952_s4 + $0x80] sm:$0xff] %v1419_v38 }
  0x8c   :  { %1028 = vmatmul.msk.f32.gmra.mxu3 %vm285_vm0, %v281_v26 }
  0x8f   :  { %v498_v48 = vpop.f32.mrf.mxu0 }
  0x90   :  { %688 = vst [vmem:[%s1952_s4 + $0x8] sm:$0xff] %v498_v48  ;;  %v751_v49 = vadd.f32 %v498_v48, %v495_v37  ;;  %v822_v50 = vmul.f32 %v498_v48, %v498_v48 }
  0x91   :  { %v1440_v51 = vpop.f32.mrf.mxu1 }
  0x92   :  { %704 = vst [vmem:[%s1952_s4 + $0x88] sm:$0xff] %v1440_v51  ;;  %v885_v54 = vadd.f32 %v822_v50, %v821_v47 }
  0x93   :  { %v1490_v20 = vpop.f32.mrf.mxu2 }
  0x94   :  { %719 = vst [vmem:[%s1952_s4 + $0x100] sm:$0xff] %v1490_v20  ;;  %1029 = vmatmul.msk.f32.gmra.mxu3 %vm285_vm0, %v282_v33 }
  0x97   :  { %v501_v61 = vpop.f32.mrf.mxu0 }
  0x98   :  { %689 = vst [vmem:[%s1952_s4 + $0x10] sm:$0xff] %v501_v61  ;;  %v752_v62 = vadd.f32 %v751_v49, %v501_v61  ;;  %v823_v63 = vmul.f32 %v501_v61, %v501_v61 }
  0x99   :  { %v1461_v0 = vpop.f32.mrf.mxu1 }
  0x9a   :  { %705 = vst [vmem:[%s1952_s4 + $0x90] sm:$0xff] %v1461_v0  ;;  %v886_v5 = vadd.f32 %v885_v54, %v823_v63 }
  0x9b   :  { %v1517_v30 = vpop.f32.mrf.mxu2 }
  0x9c   :  { %720 = vst [vmem:[%s1952_s4 + $0x108] sm:$0xff] %v1517_v30  ;;  %1030 = vmatmul.msk.f32.gmra.mxu3 %vm285_vm0, %v283_v2 }
  0x9f   :  { %v504_v10 = vpop.f32.mrf.mxu0 }
  0xa0   :  { %690 = vst [vmem:[%s1952_s4 + $0x18] sm:$0xff] %v504_v10  ;;  %v753_v11 = vadd.f32 %v752_v62, %v504_v10  ;;  %v824_v12 = vmul.f32 %v504_v10, %v504_v10 }
  0xa1   :  { %v1478_v13 = vpop.f32.mrf.mxu1 }
  0xa2   :  { %706 = vst [vmem:[%s1952_s4 + $0x98] sm:$0xff] %v1478_v13  ;;  %v887_v15 = vadd.f32 %v886_v5, %v824_v12 }
  0xa3   :  { %v1539_v37 = vpop.f32.mrf.mxu2  ;;  %v1578_v46 = vpop.f32.mrf.mxu3 }
  0xa4   :  { %721 = vst [vmem:[%s1952_s4 + $0x110] sm:$0xff] %v1539_v37 }
  0xa5   :  { %735 = vst [vmem:[%s1952_s4 + $0x180] sm:$0xff] %v1578_v46 }
  0xa7   :  { %v507_v19 = vpop.f32.mrf.mxu0 }
  0xa8   :  { %691 = vst [vmem:[%s1952_s4 + $0x20] sm:$0xff] %v507_v19  ;;  %v1495_v21 = vadd.f32 %v753_v11, %v507_v19  ;;  %v825_v22 = vmul.f32 %v507_v19, %v507_v19 }
  0xa9   :  { %v1497_v23 = vpop.f32.mrf.mxu1 }
  0xaa   :  { %707 = vst [vmem:[%s1952_s4 + $0xa0] sm:$0xff] %v1497_v23  ;;  %v1504_v25 = vadd.f32 %v887_v15, %v825_v22 }
  0xab   :  { %v1556_v42 = vpop.f32.mrf.mxu2  ;;  %v1599_v50 = vpop.f32.mrf.mxu3 }
  0xac   :  { %722 = vst [vmem:[%s1952_s4 + $0x118] sm:$0xff] %v1556_v42 }
  0xad   :  { %736 = vst [vmem:[%s1952_s4 + $0x188] sm:$0xff] %v1599_v50 }
  0xaf   :  { %v1515_v29 = vpop.f32.mrf.mxu0 }
  0xb0   :  { %692 = vst [vmem:[%s1952_s4 + $0x28] sm:$0xff] %v1515_v29  ;;  %v826_v1 = vmul.f32 %v1515_v29, %v1515_v29  ;;  %v755_v4 = vadd.f32 %v1495_v21, %v1515_v29 }
  0xb1   :  { %v1523_v31 = vpop.f32.mrf.mxu1 }
  0xb2   :  { %708 = vst [vmem:[%s1952_s4 + $0xa8] sm:$0xff] %v1523_v31  ;;  %v889_v6 = vadd.f32 %v1504_v25, %v826_v1 }
  0xb3   :  { %v1571_v44 = vpop.f32.mrf.mxu2  ;;  %v1620_v55 = vpop.f32.mrf.mxu3 }
  0xb4   :  { %723 = vst [vmem:[%s1952_s4 + $0x120] sm:$0xff] %v1571_v44 }
  0xb5   :  { %737 = vst [vmem:[%s1952_s4 + $0x190] sm:$0xff] %v1620_v55 }
  0xb7   :  { %v513_v36 = vpop.f32.mrf.mxu0 }
  0xb8   :  { %693 = vst [vmem:[%s1952_s4 + $0x30] sm:$0xff] %v513_v36  ;;  %v827_v5 = vmul.f32 %v513_v36, %v513_v36  ;;  %v756_v7 = vadd.f32 %v755_v4, %v513_v36 }
  0xb9   :  { %v1544_v39 = vpop.f32.mrf.mxu1 }
  0xba   :  { %709 = vst [vmem:[%s1952_s4 + $0xb0] sm:$0xff] %v1544_v39  ;;  %v890_v11 = vadd.f32 %v889_v6, %v827_v5 }
  0xbb   :  { %v1592_v48 = vpop.f32.mrf.mxu2  ;;  %v1641_v59 = vpop.f32.mrf.mxu3 }
  0xbc   :  { %724 = vst [vmem:[%s1952_s4 + $0x128] sm:$0xff] %v1592_v48 }
  0xbd   :  { %738 = vst [vmem:[%s1952_s4 + $0x198] sm:$0xff] %v1641_v59 }
  0xbf   :  { %v516_v41 = vpop.f32.mrf.mxu0 }
  0xc0   :  { %694 = vst [vmem:[%s1952_s4 + $0x38] sm:$0xff] %v516_v41  ;;  %v828_v8 = vmul.f32 %v516_v41, %v516_v41  ;;  %v757_v12 = vadd.f32 %v756_v7, %v516_v41 }
  0xc1   :  { %v1561_v3 = vpop.f32.mrf.mxu1 }
  0xc2   :  { %710 = vst [vmem:[%s1952_s4 + $0xb8] sm:$0xff] %v1561_v3  ;;  %v891_v17 = vadd.f32 %v890_v11, %v828_v8 }
  0xc3   :  { %v1613_v53 = vpop.f32.mrf.mxu2  ;;  %v1662_v63 = vpop.f32.mrf.mxu3 }
  0xc4   :  { %725 = vst [vmem:[%s1952_s4 + $0x130] sm:$0xff] %v1613_v53 }
  0xc5   :  { %739 = vst [vmem:[%s1952_s4 + $0x1a0] sm:$0xff] %v1662_v63 }
  0xc7   :  { %v519_v43 = vpop.f32.mrf.mxu0 }
  0xc8   :  { %695 = vst [vmem:[%s1952_s4 + $0x40] sm:$0xff] %v519_v43  ;;  %v829_v14 = vmul.f32 %v519_v43, %v519_v43  ;;  %v758_v18 = vadd.f32 %v757_v12, %v519_v43 }
  0xc9   :  { %v1576_v45 = vpop.f32.mrf.mxu1 }
  0xca   :  { %711 = vst [vmem:[%s1952_s4 + $0xc0] sm:$0xff] %v1576_v45  ;;  %v892_v21 = vadd.f32 %v891_v17, %v829_v14  ;;  %v838_v17 = vmul.f32 %v1440_v51, %v1440_v51 }
  0xcb   :  { %v1634_v57 = vpop.f32.mrf.mxu2  ;;  %v1688_v16 = vpop.f32.mrf.mxu3 }
  0xcc   :  { %726 = vst [vmem:[%s1952_s4 + $0x138] sm:$0xff] %v1634_v57 }
  0xcd   :  { %740 = vst [vmem:[%s1952_s4 + $0x1a8] sm:$0xff] %v1688_v16 }
  0xcf   :  { %v522_v47 = vpop.f32.mrf.mxu0 }
  0xd0   :  { %696 = vst [vmem:[%s1952_s4 + $0x48] sm:$0xff] %v522_v47  ;;  %v830_v19 = vmul.f32 %v522_v47, %v522_v47  ;;  %v759_v22 = vadd.f32 %v758_v18, %v522_v47 }
  0xd1   :  { %v1597_v49 = vpop.f32.mrf.mxu1 }
  0xd2   :  { %712 = vst [vmem:[%s1952_s4 + $0xc8] sm:$0xff] %v1597_v49  ;;  %v893_v25 = vadd.f32 %v892_v21, %v830_v19 }
  0xd3   :  { %v1655_v61 = vpop.f32.mrf.mxu2  ;;  %v1709_v36 = vpop.f32.mrf.mxu3 }
  0xd4   :  { %727 = vst [vmem:[%s1952_s4 + $0x140] sm:$0xff] %v1655_v61 }
  0xd5   :  { %741 = vst [vmem:[%s1952_s4 + $0x1b0] sm:$0xff] %v1709_v36 }
  0xd7   :  { %v525_v52 = vpop.f32.mrf.mxu0 }
  0xd8   :  { %697 = vst [vmem:[%s1952_s4 + $0x50] sm:$0xff] %v525_v52  ;;  %v831_v24 = vmul.f32 %v525_v52, %v525_v52  ;;  %v760_v26 = vadd.f32 %v759_v22, %v525_v52 }
  0xd9   :  { %v1618_v54 = vpop.f32.mrf.mxu1 }
  0xda   :  { %713 = vst [vmem:[%s1952_s4 + $0xd0] sm:$0xff] %v1618_v54  ;;  %v894_v32 = vadd.f32 %v893_v25, %v831_v24  ;;  %v840_v25 = vmul.f32 %v1478_v13, %v1478_v13 }
  0xdb   :  { %v1681_v10 = vpop.f32.mrf.mxu2  ;;  %v1730_v11 = vpop.f32.mrf.mxu3 }
  0xdc   :  { %728 = vst [vmem:[%s1952_s4 + $0x148] sm:$0xff] %v1681_v10 }
  0xdd   :  { %742 = vst [vmem:[%s1952_s4 + $0x1b8] sm:$0xff] %v1730_v11 }
  0xdf   :  { %v528_v56 = vpop.f32.mrf.mxu0 }
  0xe0   :  { %698 = vst [vmem:[%s1952_s4 + $0x58] sm:$0xff] %v528_v56  ;;  %v832_v27 = vmul.f32 %v528_v56, %v528_v56  ;;  %v761_v33 = vadd.f32 %v760_v26, %v528_v56 }
  0xe1   :  { %v1639_v58 = vpop.f32.mrf.mxu1 }
  0xe2   :  { %714 = vst [vmem:[%s1952_s4 + $0xd8] sm:$0xff] %v1639_v58  ;;  %v895_v40 = vadd.f32 %v894_v32, %v832_v27 }
  0xe3   :  { %v1702_v29 = vpop.f32.mrf.mxu2 }
  0xe4   :  { %729 = vst [vmem:[%s1952_s4 + $0x150] sm:$0xff] %v1702_v29 }
  0xe7   :  { %v531_v60 = vpop.f32.mrf.mxu0 }
  0xe8   :  { %699 = vst [vmem:[%s1952_s4 + $0x60] sm:$0xff] %v531_v60  ;;  %v833_v34 = vmul.f32 %v531_v60, %v531_v60  ;;  %v762_v2 = vadd.f32 %v761_v33, %v531_v60 }
  0xe9   :  { %v1660_v62 = vpop.f32.mrf.mxu1 }
  0xea   :  { %715 = vst [vmem:[%s1952_s4 + $0xe0] sm:$0xff] %v1660_v62  ;;  %v896_v43 = vadd.f32 %v895_v40, %v833_v34  ;;  %v843_v40 = vmul.f32 %v1544_v39, %v1544_v39 }
  0xeb   :  { %v1723_v5 = vpop.f32.mrf.mxu2 }
  0xec   :  { %730 = vst [vmem:[%s1952_s4 + $0x158] sm:$0xff] %v1723_v5 }
  0xef   :  { %v534_v9 = vpop.f32.mrf.mxu0 }
  0xf0   :  { %700 = vst [vmem:[%s1952_s4 + $0x68] sm:$0xff] %v534_v9  ;;  %v834_v41 = vmul.f32 %v534_v9, %v534_v9  ;;  %v763_v47 = vadd.f32 %v762_v2, %v534_v9  ;;  %v837_v9 = vmul.f32 %v1419_v38, %v1419_v38 }
  0xf1   :  { %v1686_v15 = vpop.f32.mrf.mxu1 }
  0xf2   :  { %716 = vst [vmem:[%s1952_s4 + $0xe8] sm:$0xff] %v1686_v15  ;;  %v897_v56 = vadd.f32 %v896_v43, %v834_v41 }
  0xf3   :  { %v1753_v24 = vpop.f32.mrf.mxu2 }
  0xf4   :  { %731 = vst [vmem:[%s1952_s4 + $0x160] sm:$0xff] %v1753_v24 }
  0xf7   :  { %v537_v28 = vpop.f32.mrf.mxu0 }
  0xf8   :  { %701 = vst [vmem:[%s1952_s4 + $0x70] sm:$0xff] %v537_v28  ;;  %v835_v52 = vmul.f32 %v537_v28, %v537_v28  ;;  %v764_v1 = vadd.f32 %v763_v47, %v537_v28  ;;  %v844_v47 = vmul.f32 %v1561_v3, %v1561_v3 }
  0xf9   :  { %v1707_v35 = vpop.f32.mrf.mxu1 }
  0xfa   :  { %717 = vst [vmem:[%s1952_s4 + $0xf0] sm:$0xff] %v1707_v35  ;;  %v898_v60 = vadd.f32 %v897_v56, %v835_v52 }
  0xfb   :  { %v1777_v43 = vpop.f32.mrf.mxu2 }
  0xfc   :  { %732 = vst [vmem:[%s1952_s4 + $0x168] sm:$0xff] %v1777_v43 }
  0xff   :  { %v540_v4 = vpop.f32.mrf.mxu0 }
 0x100   :  { %702 = vst [vmem:[%s1952_s4 + $0x78] sm:$0xff] %v540_v4  ;;  %v765_v6 = vadd.f32 %v764_v1, %v540_v4  ;;  %v836_v7 = vmul.f32 %v540_v4, %v540_v4 }
 0x101   :  { %v1728_v8 = vpop.f32.mrf.mxu1 }
 0x102   :  { %718 = vst [vmem:[%s1952_s4 + $0xf8] sm:$0xff] %v1728_v8  ;;  %v766_v12 = vadd.f32 %v765_v6, %v1419_v38  ;;  %v899_v14 = vadd.f32 %v898_v60, %v836_v7  ;;  %v839_v38 = vmul.f32 %v1461_v0, %v1461_v0  ;;  %v847_v6 = vmul.f32 %v1618_v54, %v1618_v54 }
 0x104   :  { %v767_v18 = vadd.f32 %v766_v12, %v1440_v51  ;;  %v900_v19 = vadd.f32 %v899_v14, %v837_v9  ;;  %v1762_v51 = vpop.f32.mrf.mxu3  ;;  %v1801_v12 = vpop.f32.mrf.mxu2 }
 0x105   :  { %743 = vst [vmem:[%s1952_s4 + $0x1c0] sm:$0xff] %v1762_v51 }
 0x106   :  { %v768_v21 = vadd.f32 %v767_v18, %v1461_v0  ;;  %v901_v22 = vadd.f32 %v900_v19, %v838_v17  ;;  %v841_v0 = vmul.f32 %v1497_v23, %v1497_v23  ;;  %733 = vst [vmem:[%s1952_s4 + $0x170] sm:$0xff] %v1801_v12  ;;  %v849_v19 = vmul.f32 %v1660_v62, %v1660_v62 }
 0x108   :  { %v769_v26 = vadd.f32 %v768_v21, %v1478_v13  ;;  %v902_v27 = vadd.f32 %v901_v22, %v839_v38  ;;  %v842_v13 = vmul.f32 %v1523_v31, %v1523_v31  ;;  %v850_v21 = vmul.f32 %v1686_v15, %v1686_v15 }
 0x10a   :  { %v770_v28 = vadd.f32 %v769_v26, %v1497_v23  ;;  %v903_v32 = vadd.f32 %v902_v27, %v840_v25  ;;  %v851_v26 = vmul.f32 %v1707_v35, %v1707_v35  ;;  %v852_v27 = vmul.f32 %v1728_v8, %v1728_v8 }
 0x10c   :  { %v771_v33 = vadd.f32 %v770_v28, %v1523_v31  ;;  %v904_v34 = vadd.f32 %v903_v32, %v841_v0  ;;  %v1786_v31 = vpop.f32.mrf.mxu3  ;;  %v636_v0 = vpop.f32.mrf.mxu2 }
 0x10d   :  { %744 = vst [vmem:[%s1952_s4 + $0x1c8] sm:$0xff] %v1786_v31 }
 0x10e   :  { %v905_v2 = vadd.f32 %v904_v34, %v842_v13  ;;  %v772_v41 = vadd.f32 %v771_v33, %v1544_v39  ;;  %v845_v39 = vmul.f32 %v1576_v45, %v1576_v45  ;;  %734 = vst [vmem:[%s1952_s4 + $0x178] sm:$0xff] %v636_v0 }
 0x110   :  { %v773_v23 = vadd.f32 %v772_v41, %v1561_v3  ;;  %v906_v52 = vadd.f32 %v905_v2, %v843_v40  ;;  %v846_v3 = vmul.f32 %v1597_v49, %v1597_v49  ;;  %v855_v40 = vmul.f32 %v1539_v37, %v1539_v37 }
 0x112   :  { %v774_v56 = vadd.f32 %v773_v23, %v1576_v45  ;;  %v907_v1 = vadd.f32 %v906_v52, %v844_v47  ;;  %v848_v45 = vmul.f32 %v1639_v58, %v1639_v58  ;;  %v856_v47 = vmul.f32 %v1556_v42, %v1556_v42 }
 0x114   :  { %v775_v4 = vadd.f32 %v774_v56, %v1597_v49  ;;  %v908_v60 = vadd.f32 %v907_v1, %v845_v39  ;;  %v1810_v49 = vpop.f32.mrf.mxu3  ;;  %v858_v56 = vmul.f32 %v1592_v48, %v1592_v48 }
 0x115   :  { %745 = vst [vmem:[%s1952_s4 + $0x1d0] sm:$0xff] %v1810_v49 }
 0x116   :  { %v776_v7 = vadd.f32 %v775_v4, %v1618_v54  ;;  %v909_v9 = vadd.f32 %v908_v60, %v846_v3  ;;  %v859_v3 = vmul.f32 %v1613_v53, %v1613_v53 }
 0x118   :  { %v777_v14 = vadd.f32 %v776_v7, %v1639_v58  ;;  %v910_v17 = vadd.f32 %v909_v9, %v847_v6  ;;  %v860_v6 = vmul.f32 %v1634_v57, %v1634_v57 }
 0x11a   :  { %v911_v54 = vadd.f32 %v910_v17, %v848_v45  ;;  %v778_v18 = vadd.f32 %v777_v14, %v1660_v62 }
 0x11c   :  { %v912_v58 = vadd.f32 %v911_v54, %v849_v19  ;;  %v779_v38 = vadd.f32 %v778_v18, %v1686_v15  ;;  %v1831_v62 = vpop.f32.mrf.mxu3  ;;  %v853_v15 = vmul.f32 %v1490_v20, %v1490_v20  ;;  %v863_v54 = vmul.f32 %v1702_v29, %v1702_v29 }
 0x11d   :  { %746 = vst [vmem:[%s1952_s4 + $0x1d8] sm:$0xff] %v1831_v62 }
 0x11e   :  { %v913_v22 = vadd.f32 %v912_v58, %v850_v21  ;;  %v780_v25 = vadd.f32 %v779_v38, %v1707_v35  ;;  %v864_v38 = vmul.f32 %v1723_v5, %v1723_v5 }
 0x120   :  { %v914_v28 = vadd.f32 %v913_v22, %v851_v26  ;;  %v781_v32 = vadd.f32 %v780_v25, %v1728_v8  ;;  %v854_v8 = vmul.f32 %v1517_v30, %v1517_v30  ;;  %v865_v25 = vmul.f32 %v1753_v24, %v1753_v24 }
 0x122   :  { %v782_v35 = vadd.f32 %v781_v32, %v1490_v20  ;;  %v915_v13 = vadd.f32 %v914_v28, %v852_v27  ;;  %v866_v27 = vmul.f32 %v1777_v43, %v1777_v43  ;;  %v867_v32 = vmul.f32 %v1801_v12, %v1801_v12 }
 0x124   :  { %v783_v33 = vadd.f32 %v782_v35, %v1517_v30  ;;  %v916_v34 = vadd.f32 %v915_v13, %v853_v15  ;;  %v1849_v20 = vpop.f32.mrf.mxu3  ;;  %v857_v30 = vmul.f32 %v1571_v44, %v1571_v44  ;;  %v868_v15 = vmul.f32 %v636_v0, %v636_v0 }
 0x125   :  { %747 = vst [vmem:[%s1952_s4 + $0x1e0] sm:$0xff] %v1849_v20 }
 0x126   :  { %v784_v2 = vadd.f32 %v783_v33, %v1539_v37  ;;  %v917_v41 = vadd.f32 %v916_v34, %v854_v8  ;;  %v870_v34 = vmul.f32 %v1599_v50, %v1599_v50 }
 0x128   :  { %v785_v23 = vadd.f32 %v784_v2, %v1556_v42  ;;  %v918_v52 = vadd.f32 %v917_v41, %v855_v40 }
 0x12a   :  { %v786_v39 = vadd.f32 %v785_v23, %v1571_v44  ;;  %v919_v37 = vadd.f32 %v918_v52, %v856_v47  ;;  %v872_v47 = vmul.f32 %v1641_v59, %v1641_v59 }
 0x12c   :  { %v787_v1 = vadd.f32 %v786_v39, %v1592_v48  ;;  %v920_v42 = vadd.f32 %v919_v37, %v857_v30  ;;  %v1867_v44 = vpop.f32.mrf.mxu3  ;;  %v861_v48 = vmul.f32 %v1655_v61, %v1655_v61 }
 0x12d   :  { %748 = vst [vmem:[%s1952_s4 + $0x1e8] sm:$0xff] %v1867_v44 }
 0x12e   :  { %v921_v4 = vadd.f32 %v920_v42, %v858_v56  ;;  %v788_v60 = vadd.f32 %v787_v1, %v1613_v53  ;;  %v862_v53 = vmul.f32 %v1681_v10, %v1681_v10 }
 0x130   :  { %v789_v7 = vadd.f32 %v788_v60, %v1634_v57  ;;  %v922_v9 = vadd.f32 %v921_v4, %v859_v3 }
 0x132   :  { %v790_v14 = vadd.f32 %v789_v7, %v1655_v61  ;;  %v923_v45 = vadd.f32 %v922_v9, %v860_v6 }
 0x134   :  { %v791_v17 = vadd.f32 %v790_v14, %v1681_v10  ;;  %v924_v57 = vadd.f32 %v923_v45, %v861_v48  ;;  %v681_v61 = vpop.f32.mrf.mxu3  ;;  %v880_v45 = vmul.f32 %v1831_v62, %v1831_v62 }
 0x135   :  { %749 = vst [vmem:[%s1952_s4 + $0x1f0] sm:$0xff] %v681_v61 }
 0x136   :  { %v792_v18 = vadd.f32 %v791_v17, %v1702_v29  ;;  %v925_v19 = vadd.f32 %v924_v57, %v862_v53  ;;  %v881_v57 = vmul.f32 %v1849_v20, %v1849_v20 }
 0x138   :  { %v793_v58 = vadd.f32 %v792_v18, %v1723_v5  ;;  %v926_v21 = vadd.f32 %v925_v19, %v863_v54  ;;  %v882_v18 = vmul.f32 %v1867_v44, %v1867_v44 }
 0x13a   :  { %v927_v22 = vadd.f32 %v926_v21, %v864_v38  ;;  %v794_v10 = vadd.f32 %v793_v58, %v1753_v24  ;;  %v869_v24 = vmul.f32 %v1578_v46, %v1578_v46  ;;  %v883_v58 = vmul.f32 %v681_v61, %v681_v61 }
 0x13c   :  { %v928_v26 = vadd.f32 %v927_v22, %v865_v25  ;;  %v795_v29 = vadd.f32 %v794_v10, %v1777_v43  ;;  %v684_v8 = vpop.f32.mrf.mxu3 }
 0x13d   :  { %750 = vst [vmem:[%s1952_s4 + $0x1f8] sm:$0xff] %v684_v8  ;;  %v884_v38 = vmul.f32 %v684_v8, %v684_v8 }
 0x13e   :  { %v929_v28 = vadd.f32 %v928_v26, %v866_v27  ;;  %v796_v5 = vadd.f32 %v795_v29, %v1801_v12 }
 0x140   :  { %v930_v35 = vadd.f32 %v929_v28, %v867_v32  ;;  %v797_v13 = vadd.f32 %v796_v5, %v636_v0  ;;  %v871_v0 = vmul.f32 %v1620_v55, %v1620_v55 }
 0x142   :  { %v798_v33 = vadd.f32 %v797_v13, %v1578_v46  ;;  %v931_v43 = vadd.f32 %v930_v35, %v868_v15  ;;  %v873_v46 = vmul.f32 %v1662_v63, %v1662_v63 }
 0x144   :  { %v799_v40 = vadd.f32 %v798_v33, %v1599_v50  ;;  %v932_v12 = vadd.f32 %v931_v43, %v869_v24  ;;  %v874_v50 = vmul.f32 %v1688_v16, %v1688_v16 }
 0x146   :  { %v800_v2 = vadd.f32 %v799_v40, %v1620_v55  ;;  %v933_v41 = vadd.f32 %v932_v12, %v870_v34  ;;  %v875_v55 = vmul.f32 %v1709_v36, %v1709_v36 }
 0x148   :  { %v801_v23 = vadd.f32 %v800_v2, %v1641_v59  ;;  %v934_v52 = vadd.f32 %v933_v41, %v871_v0  ;;  %v876_v59 = vmul.f32 %v1730_v11, %v1730_v11 }
 0x14a   :  { %v802_v30 = vadd.f32 %v801_v23, %v1662_v63  ;;  %v935_v39 = vadd.f32 %v934_v52, %v872_v47  ;;  %v877_v63 = vmul.f32 %v1762_v51, %v1762_v51 }
 0x14c   :  { %v803_v37 = vadd.f32 %v802_v30, %v1688_v16  ;;  %v936_v56 = vadd.f32 %v935_v39, %v873_v46  ;;  %v878_v16 = vmul.f32 %v1786_v31, %v1786_v31 }
 0x14e   :  { %v937_v1 = vadd.f32 %v936_v56, %v874_v50  ;;  %v804_v42 = vadd.f32 %v803_v37, %v1709_v36  ;;  %v879_v36 = vmul.f32 %v1810_v49, %v1810_v49 }
 0x150   :  { %v805_v3 = vadd.f32 %v804_v42, %v1730_v11  ;;  %v938_v4 = vadd.f32 %v937_v1, %v875_v55 }
 0x152   :  { %v806_v60 = vadd.f32 %v805_v3, %v1762_v51  ;;  %v939_v6 = vadd.f32 %v938_v4, %v876_v59 }
 0x154   :  { %v807_v7 = vadd.f32 %v806_v60, %v1786_v31  ;;  %v940_v9 = vadd.f32 %v939_v6, %v877_v63 }
 0x156   :  { %v808_v48 = vadd.f32 %v807_v7, %v1810_v49  ;;  %v941_v14 = vadd.f32 %v940_v9, %v878_v16 }
 0x158   :  { %v809_v11 = vadd.f32 %v808_v48, %v1831_v62  ;;  %v942_v53 = vadd.f32 %v941_v14, %v879_v36 }
 0x15a   :  { %v943_v51 = vadd.f32 %v942_v53, %v880_v45  ;;  %v810_v17 = vadd.f32 %v809_v11, %v1849_v20 }
 0x15c   :  { %v944_v31 = vadd.f32 %v943_v51, %v881_v57  ;;  %v811_v54 = vadd.f32 %v810_v17, %v1867_v44 }
 0x15e   :  { %v945_v49 = vadd.f32 %v944_v31, %v882_v18  ;;  %v812_v19 = vadd.f32 %v811_v54, %v681_v61 }
 0x160   :  { %v946_v21 = vadd.f32 %v945_v49, %v883_v58  ;;  %v813_v22 = vadd.f32 %v812_v19, %v684_v8 }
 0x162   :  { %v814_v62 = vrot.slane %v813_v22, 4  ;;  %v947_v10 = vadd.f32 %v946_v21, %v884_v38 }
 0x164   :  { %v815_v25 = vadd.f32 %v814_v62, %v813_v22  ;;  %v948_v26 = vrot.slane %v947_v10, 4 }
 0x166   :  { %v816_v29 = vrot.slane %v815_v25, 2  ;;  %v949_v27 = vadd.f32 %v948_v26, %v947_v10 }
 0x168   :  { %v817_v28 = vadd.f32 %v816_v29, %v815_v25  ;;  %v950_v20 = vrot.slane %v949_v27, 2 }
 0x16a   :  { %v818_v5 = vrot.slane %v817_v28, 1  ;;  %v951_v32 = vadd.f32 %v950_v20, %v949_v27 }
 0x16c   :  { %v819_v15 = vadd.f32 %v818_v5, %v817_v28  ;;  %v952_v35 = vrot.slane %v951_v32, 1 }
 0x16e   :  { %820 = vst [vmem:[%s1953_s5] sm:$0x1] %v819_v15  ;;  %v953_v44 = vadd.f32 %v952_v35, %v951_v32 }
 0x170   :  { %954 = vst [vmem:[%s1954_s6] sm:$0x1] %v953_v44 }

// kernel: bottleneck_block.9
= control target key start
LH: loop header
LB: loop body
LE: loop exit
PB: predicated region body
PF: predicated region fallthrough
CT: control target
= control target key end

     0   :  { %s1357_s0 = inlined_call_operand.vmem [shape: f32[512,128], index: 0, kind: input, shape index: {}]   ;;  %s1358_s1 = inlined_call_operand.vmem [shape: f32[512,128], index: 1, kind: input, shape index: {}]   ;;  %s1359_s2 = inlined_call_operand.vmem [shape: f32[1,128], index: 2, kind: input, shape index: {}]   ;;  %s1360_s3 = inlined_call_operand.vmem [shape: f32[1,128], index: 3, kind: input, shape index: {}]   ;;  %s1361_s4 = inlined_call_operand.vmem [shape: f32[1,128], index: 4, kind: input, shape index: {}]   ;;  %s1362_s5 = inlined_call_operand.vmem [shape: f32[1,128], index: 5, kind: input, shape index: {}]   ;;  %s1363_s6 = inlined_call_operand.hbm [shape: f32[512,128], index: 6, kind: output, shape index: {}]  }
   0x1   :  { %v24_v0 = vld [vmem:[%s1357_s0] sm:$0xff]  ;;  %v25_v7 = vld [vmem:[%s1357_s0 + $0x8] sm:$0xff]  ;;  %v26_v13 = vld [vmem:[%s1357_s0 + $0x10] sm:$0xff] }
   0x2   :  { %v715_v1 = vld [vmem:[%s1359_s2] ss:$0 sm:$0xff]  ;;  %v225_v8 = vld [vmem:[%s1358_s1 + $0x8] sm:$0xff]  ;;  %v226_v14 = vld [vmem:[%s1358_s1 + $0x10] sm:$0xff] }
   0x3   :  { %v720_v2 = vld [vmem:[%s1360_s3] ss:$0 sm:$0xff]  ;;  %v92_v4 = vmul.f32 %v715_v1, %v24_v0  ;;  %v93_v11 = vmul.f32 %v715_v1, %v25_v7  ;;  %v27_v15 = vld [vmem:[%s1357_s0 + $0x18] sm:$0xff]  ;;  %v94_v16 = vmul.f32 %v715_v1, %v26_v13  ;;  %v29_v26 = vld [vmem:[%s1357_s0 + $0x28] sm:$0xff] }
   0x4   :  { %v224_v3 = vld [vmem:[%s1358_s1] sm:$0xff]  ;;  %v95_v18 = vmul.f32 %v715_v1, %v27_v15  ;;  %v227_v19 = vld [vmem:[%s1358_s1 + $0x18] sm:$0xff]  ;;  %v229_v27 = vld [vmem:[%s1358_s1 + $0x28] sm:$0xff]  ;;  %v97_v39 = vmul.f32 %v715_v1, %v29_v26 }
   0x5   :  { %v729_v5 = vld [vmem:[%s1361_s4] ss:$0 sm:$0xff]  ;;  %v160_v9 = vadd.f32 %v720_v2, %v92_v4  ;;  %v161_v23 = vadd.f32 %v720_v2, %v93_v11  ;;  %v162_v28 = vadd.f32 %v720_v2, %v94_v16  ;;  %v30_v36 = vld [vmem:[%s1357_s0 + $0x30] sm:$0xff]  ;;  %v31_v42 = vld [vmem:[%s1357_s0 + $0x38] sm:$0xff] }
   0x6   :  { %v734_v6 = vld [vmem:[%s1362_s5] ss:$0 sm:$0xff]  ;;  %v292_v10 = vmul.f32 %v729_v5, %v224_v3  ;;  %v293_v12 = vmul.f32 %v729_v5, %v225_v8  ;;  %v294_v17 = vmul.f32 %v729_v5, %v226_v14  ;;  %v295_v25 = vmul.f32 %v729_v5, %v227_v19  ;;  %v230_v41 = vld [vmem:[%s1358_s1 + $0x30] sm:$0xff]  ;;  %v231_v47 = vld [vmem:[%s1358_s1 + $0x38] sm:$0xff] }
   0x7   :  { %v28_v20 = vld [vmem:[%s1357_s0 + $0x20] sm:$0xff]  ;;  %v163_v30 = vadd.f32 %v720_v2, %v95_v18  ;;  %v297_v40 = vmul.f32 %v729_v5, %v229_v27  ;;  %v165_v50 = vadd.f32 %v720_v2, %v97_v39  ;;  %v98_v52 = vmul.f32 %v715_v1, %v30_v36  ;;  %v33_v58 = vld [vmem:[%s1357_s0 + $0x48] sm:$0xff]  ;;  %v34_v0 = vld [vmem:[%s1357_s0 + $0x50] sm:$0xff] }
   0x8   :  { %v228_v21 = vld [vmem:[%s1358_s1 + $0x20] sm:$0xff]  ;;  %v360_v22 = vadd.f32 %v734_v6, %v292_v10  ;;  %v361_v24 = vadd.f32 %v734_v6, %v293_v12  ;;  %v362_v29 = vadd.f32 %v734_v6, %v294_v17  ;;  %v96_v31 = vmul.f32 %v715_v1, %v28_v20  ;;  %v233_v63 = vld [vmem:[%s1358_s1 + $0x48] sm:$0xff]  ;;  %v35_v10 = vld [vmem:[%s1357_s0 + $0x58] sm:$0xff] }
   0x9   :  { %v363_v34 = vadd.f32 %v734_v6, %v295_v25  ;;  %v296_v35 = vmul.f32 %v729_v5, %v228_v21  ;;  %v32_v48 = vld [vmem:[%s1357_s0 + $0x40] sm:$0xff]  ;;  %v365_v51 = vadd.f32 %v734_v6, %v297_v40  ;;  %v298_v56 = vmul.f32 %v729_v5, %v230_v41  ;;  %v235_v19 = vld [vmem:[%s1358_s1 + $0x58] sm:$0xff]  ;;  %v38_v36 = vld [vmem:[%s1357_s0 + $0x70] sm:$0xff] }
   0xa   :  { %v424_v32 = vadd.f32 %v360_v22, %v160_v9  ;;  %v425_v33 = vadd.f32 %v361_v24, %v161_v23  ;;  %v426_v37 = vadd.f32 %v362_v29, %v162_v28  ;;  %v164_v38 = vadd.f32 %v720_v2, %v96_v31  ;;  %v232_v53 = vld [vmem:[%s1358_s1 + $0x40] sm:$0xff]  ;;  %v234_v9 = vld [vmem:[%s1358_s1 + $0x50] sm:$0xff]  ;;  %v237_v31 = vld [vmem:[%s1358_s1 + $0x68] sm:$0xff] }
   0xb   :  { %v427_v45 = vadd.f32 %v363_v34, %v163_v30  ;;  %v364_v46 = vadd.f32 %v734_v6, %v296_v35  ;;  %v99_v57 = vmul.f32 %v715_v1, %v31_v42  ;;  %v429_v59 = vadd.f32 %v365_v51, %v165_v50  ;;  %v36_v24 = vld [vmem:[%s1357_s0 + $0x60] sm:$0xff]  ;;  %v37_v30 = vld [vmem:[%s1357_s0 + $0x68] sm:$0xff]  ;;  %v239_v51 = vld [vmem:[%s1358_s1 + $0x78] sm:$0xff] }
   0xc   :  { %v488_v43 = vmax.f32 %v424_v32, 0.0  ;;  %v489_v44 = vmax.f32 %v425_v33, 0.0  ;;  %v490_v49 = vmax.f32 %v426_v37, 0.0  ;;  %v166_v60 = vadd.f32 %v720_v2, %v98_v52  ;;  %v236_v25 = vld [vmem:[%s1358_s1 + $0x60] sm:$0xff] }
   0xd   :  { %v491_v54 = vmax.f32 %v427_v45, 0.0  ;;  %v428_v55 = vadd.f32 %v364_v46, %v164_v38  ;;  %v299_v61 = vmul.f32 %v729_v5, %v231_v47  ;;  %v100_v62 = vmul.f32 %v715_v1, %v32_v48  ;;  %v238_v45 = vld [vmem:[%s1358_s1 + $0x70] sm:$0xff]  ;;  %v39_v46 = vld [vmem:[%s1357_s0 + $0x78] sm:$0xff]  ;;  %v40_v52 = vld [vmem:[%s1357_s0 + $0x80] sm:$0xff] }
   0xe   :  { %552 = vst [vmem:[#allocation2] sm:$0xff] %v488_v43  ;;  %v366_v4 = vadd.f32 %v734_v6, %v298_v56  ;;  %v167_v7 = vadd.f32 %v720_v2, %v99_v57  ;;  %v300_v8 = vmul.f32 %v729_v5, %v232_v53  ;;  %v493_v11 = vmax.f32 %v429_v59, 0.0  ;;  %v240_v57 = vld [vmem:[%s1358_s1 + $0x80] sm:$0xff] }
   0xf   :  { %553 = vst [vmem:[#allocation2 + $0x8] sm:$0xff] %v489_v44  ;;  %v492_v3 = vmax.f32 %v428_v55, 0.0  ;;  %v367_v12 = vadd.f32 %v734_v6, %v299_v61  ;;  %v168_v13 = vadd.f32 %v720_v2, %v100_v62  ;;  %v101_v14 = vmul.f32 %v715_v1, %v33_v58  ;;  %v41_v62 = vld [vmem:[%s1357_s0 + $0x88] sm:$0xff] }
  0x10   :  { %554 = vst [vmem:[#allocation2 + $0x10] sm:$0xff] %v490_v49  ;;  %v430_v15 = vadd.f32 %v366_v4, %v166_v60  ;;  %v368_v16 = vadd.f32 %v734_v6, %v300_v8  ;;  %v301_v17 = vmul.f32 %v729_v5, %v233_v63  ;;  %v102_v18 = vmul.f32 %v715_v1, %v34_v0  ;;  %v42_v8 = vld [vmem:[%s1357_s0 + $0x90] sm:$0xff] }
  0x11   :  { %555 = vst [vmem:[#allocation2 + $0x18] sm:$0xff] %v491_v54  ;;  %v431_v20 = vadd.f32 %v367_v12, %v167_v7  ;;  %v169_v21 = vadd.f32 %v720_v2, %v101_v14  ;;  %v302_v22 = vmul.f32 %v729_v5, %v234_v9  ;;  %v103_v23 = vmul.f32 %v715_v1, %v35_v10  ;;  %v241_v7 = vld [vmem:[%s1358_s1 + $0x88] sm:$0xff]  ;;  %v43_v14 = vld [vmem:[%s1357_s0 + $0x98] sm:$0xff] }
  0x12   :  { %556 = vst [vmem:[#allocation2 + $0x20] sm:$0xff] %v492_v3  ;;  %v494_v26 = vmax.f32 %v430_v15, 0.0  ;;  %v432_v27 = vadd.f32 %v368_v16, %v168_v13  ;;  %v369_v28 = vadd.f32 %v734_v6, %v301_v17  ;;  %v170_v29 = vadd.f32 %v720_v2, %v102_v18  ;;  %v242_v13 = vld [vmem:[%s1358_s1 + $0x90] sm:$0xff] }
  0x13   :  { %557 = vst [vmem:[#allocation2 + $0x28] sm:$0xff] %v493_v11  ;;  %v495_v32 = vmax.f32 %v431_v20, 0.0  ;;  %v370_v33 = vadd.f32 %v734_v6, %v302_v22  ;;  %v171_v34 = vadd.f32 %v720_v2, %v103_v23  ;;  %v303_v35 = vmul.f32 %v729_v5, %v235_v19  ;;  %v243_v23 = vld [vmem:[%s1358_s1 + $0x98] sm:$0xff] }
  0x14   :  { %558 = vst [vmem:[#allocation2 + $0x30] sm:$0xff] %v494_v26  ;;  %v496_v37 = vmax.f32 %v432_v27, 0.0  ;;  %v433_v38 = vadd.f32 %v369_v28, %v169_v21  ;;  %v104_v39 = vmul.f32 %v715_v1, %v36_v24  ;;  %v304_v40 = vmul.f32 %v729_v5, %v236_v25  ;;  %v44_v28 = vld [vmem:[%s1357_s0 + $0xa0] sm:$0xff] }
  0x15   :  { %559 = vst [vmem:[#allocation2 + $0x38] sm:$0xff] %v495_v32  ;;  %v434_v41 = vadd.f32 %v370_v33, %v170_v29  ;;  %v371_v42 = vadd.f32 %v734_v6, %v303_v35  ;;  %v105_v43 = vmul.f32 %v715_v1, %v37_v30  ;;  %v305_v44 = vmul.f32 %v729_v5, %v237_v31  ;;  %v244_v29 = vld [vmem:[%s1358_s1 + $0xa0] sm:$0xff]  ;;  %v245_v35 = vld [vmem:[%s1358_s1 + $0xa8] sm:$0xff] }
  0x16   :  { %560 = vst [vmem:[#allocation2 + $0x40] sm:$0xff] %v496_v37  ;;  %v497_v47 = vmax.f32 %v433_v38, 0.0  ;;  %v172_v48 = vadd.f32 %v720_v2, %v104_v39  ;;  %v372_v49 = vadd.f32 %v734_v6, %v304_v40  ;;  %v106_v50 = vmul.f32 %v715_v1, %v38_v36 }
  0x17   :  { %v498_v53 = vmax.f32 %v434_v41, 0.0  ;;  %v435_v54 = vadd.f32 %v371_v42, %v171_v34  ;;  %v173_v55 = vadd.f32 %v720_v2, %v105_v43  ;;  %v373_v56 = vadd.f32 %v734_v6, %v305_v44  ;;  %v45_v34 = vld [vmem:[%s1357_s0 + $0xa8] sm:$0xff] }
  0x18   :  { %561 = vst [vmem:[#allocation2 + $0x48] sm:$0xff] %v497_v47  ;;  %v436_v58 = vadd.f32 %v372_v49, %v172_v48  ;;  %v174_v59 = vadd.f32 %v720_v2, %v106_v50  ;;  %v306_v60 = vmul.f32 %v729_v5, %v238_v45  ;;  %v107_v61 = vmul.f32 %v715_v1, %v39_v46 }
  0x19   :  { %562 = vst [vmem:[#allocation2 + $0x50] sm:$0xff] %v498_v53  ;;  %v499_v63 = vmax.f32 %v435_v54, 0.0  ;;  %v437_v0 = vadd.f32 %v373_v56, %v173_v55  ;;  %v307_v3 = vmul.f32 %v729_v5, %v239_v51  ;;  %v108_v4 = vmul.f32 %v715_v1, %v40_v52 }
  0x1a   :  { %v500_v9 = vmax.f32 %v436_v58, 0.0  ;;  %v374_v10 = vadd.f32 %v734_v6, %v306_v60  ;;  %v175_v11 = vadd.f32 %v720_v2, %v107_v61  ;;  %v308_v12 = vmul.f32 %v729_v5, %v240_v57 }
  0x1b   :  { %563 = vst [vmem:[#allocation2 + $0x58] sm:$0xff] %v499_v63  ;;  %v501_v15 = vmax.f32 %v437_v0, 0.0  ;;  %v375_v16 = vadd.f32 %v734_v6, %v307_v3  ;;  %v176_v17 = vadd.f32 %v720_v2, %v108_v4  ;;  %v109_v18 = vmul.f32 %v715_v1, %v41_v62 }
  0x1c   :  { %564 = vst [vmem:[#allocation2 + $0x60] sm:$0xff] %v500_v9  ;;  %v438_v19 = vadd.f32 %v374_v10, %v174_v59  ;;  %v376_v20 = vadd.f32 %v734_v6, %v308_v12  ;;  %v309_v21 = vmul.f32 %v729_v5, %v241_v7  ;;  %v110_v22 = vmul.f32 %v715_v1, %v42_v8 }
  0x1d   :  { %565 = vst [vmem:[#allocation2 + $0x68] sm:$0xff] %v501_v15  ;;  %v439_v24 = vadd.f32 %v375_v16, %v175_v11  ;;  %v177_v25 = vadd.f32 %v720_v2, %v109_v18  ;;  %v310_v26 = vmul.f32 %v729_v5, %v242_v13  ;;  %v111_v27 = vmul.f32 %v715_v1, %v43_v14 }
  0x1e   :  { %v502_v30 = vmax.f32 %v438_v19, 0.0  ;;  %v440_v31 = vadd.f32 %v376_v20, %v176_v17  ;;  %v377_v32 = vadd.f32 %v734_v6, %v309_v21  ;;  %v178_v33 = vadd.f32 %v720_v2, %v110_v22 }
  0x1f   :  { %11 = vsyncpa [#allocation3], 0  ;;  %v503_v36 = vmax.f32 %v439_v24, 0.0  ;;  %v378_v37 = vadd.f32 %v734_v6, %v310_v26  ;;  %v179_v38 = vadd.f32 %v720_v2, %v111_v27  ;;  %v311_v39 = vmul.f32 %v729_v5, %v243_v23  ;;  %v46_v40 = vld [vmem:[%s1357_s0 + $0xb0] sm:$0xff]  ;;  %v47_v50 = vld [vmem:[%s1357_s0 + $0xb8] sm:$0xff]  ;;  %s622_s27 = sshll.u32 %s1363_s6, 4  ;;  %s623_s27 = int_to_ptr.hbm [resolvable:$true] %s622_s27 }
  0x20   :  { %566 = vst [vmem:[#allocation2 + $0x70] sm:$0xff] %v502_v30  ;;  %v504_v41 = vmax.f32 %v440_v31, 0.0  ;;  %v441_v42 = vadd.f32 %v377_v32, %v177_v25  ;;  %v112_v43 = vmul.f32 %v715_v1, %v44_v28  ;;  %v312_v44 = vmul.f32 %v729_v5, %v244_v29  ;;  %v246_v49 = vld [vmem:[%s1358_s1 + $0xb0] sm:$0xff]  ;;  %v247_v55 = vld [vmem:[%s1358_s1 + $0xb8] sm:$0xff]  ;;  %v48_v56 = vld [vmem:[%s1357_s0 + $0xc0] sm:$0xff]  ;;  %s672_s28 = smov 128  }
  0x21   :  { %567 = vst [vmem:[#allocation2 + $0x78] sm:$0xff] %v503_v36  ;;  %v442_v45 = vadd.f32 %v378_v37, %v178_v33  ;;  %v379_v46 = vadd.f32 %v734_v6, %v311_v39  ;;  %v113_v47 = vmul.f32 %v715_v1, %v45_v34  ;;  %v313_v48 = vmul.f32 %v729_v5, %v245_v35  ;;  %v248_v61 = vld [vmem:[%s1358_s1 + $0xc0] sm:$0xff]  ;;  %v49_v4 = vld [vmem:[%s1357_s0 + $0xc8] sm:$0xff]  ;;  %v50_v12 = vld [vmem:[%s1357_s0 + $0xd0] sm:$0xff]  ;;  %s673_s29 = smov 8  }
  0x22   :  { %568 = vst [vmem:[#allocation2 + $0x80] sm:$0xff] %v504_v41  ;;  %v505_v51 = vmax.f32 %v441_v42, 0.0  ;;  %v180_v52 = vadd.f32 %v720_v2, %v112_v43  ;;  %v380_v53 = vadd.f32 %v734_v6, %v312_v44  ;;  %v114_v54 = vmul.f32 %v715_v1, %v46_v40  ;;  %v249_v11 = vld [vmem:[%s1358_s1 + $0xc8] sm:$0xff]  ;;  %v250_v17 = vld [vmem:[%s1358_s1 + $0xd0] sm:$0xff]  ;;  %v51_v18 = vld [vmem:[%s1357_s0 + $0xd8] sm:$0xff] }
  0x23   :  { %v506_v57 = vmax.f32 %v442_v45, 0.0  ;;  %v443_v58 = vadd.f32 %v379_v46, %v179_v38  ;;  %v181_v59 = vadd.f32 %v720_v2, %v113_v47  ;;  %v381_v60 = vadd.f32 %v734_v6, %v313_v48  ;;  %v251_v27 = vld [vmem:[%s1358_s1 + $0xd8] sm:$0xff]  ;;  %v52_v32 = vld [vmem:[%s1357_s0 + $0xe0] sm:$0xff]  ;;  %v53_v38 = vld [vmem:[%s1357_s0 + $0xe8] sm:$0xff] }
  0x24   :  { %569 = vst [vmem:[#allocation2 + $0x88] sm:$0xff] %v505_v51  ;;  %v444_v62 = vadd.f32 %v380_v53, %v180_v52  ;;  %v182_v63 = vadd.f32 %v720_v2, %v114_v54  ;;  %v314_v0 = vmul.f32 %v729_v5, %v246_v49  ;;  %v115_v3 = vmul.f32 %v715_v1, %v47_v50  ;;  %v252_v33 = vld [vmem:[%s1358_s1 + $0xe0] sm:$0xff]  ;;  %v253_v39 = vld [vmem:[%s1358_s1 + $0xe8] sm:$0xff]  ;;  %v54_v44 = vld [vmem:[%s1357_s0 + $0xf0] sm:$0xff] }
  0x25   :  { %570 = vst [vmem:[#allocation2 + $0x90] sm:$0xff] %v506_v57  ;;  %v507_v7 = vmax.f32 %v443_v58, 0.0  ;;  %v445_v8 = vadd.f32 %v381_v60, %v181_v59  ;;  %v315_v9 = vmul.f32 %v729_v5, %v247_v55  ;;  %v116_v10 = vmul.f32 %v715_v1, %v48_v56  ;;  %v254_v53 = vld [vmem:[%s1358_s1 + $0xf0] sm:$0xff]  ;;  %v55_v54 = vld [vmem:[%s1357_s0 + $0xf8] sm:$0xff]  ;;  %v56_v60 = vld [vmem:[%s1357_s0 + $0x100] sm:$0xff] }
  0x26   :  { %v508_v13 = vmax.f32 %v444_v62, 0.0  ;;  %v382_v14 = vadd.f32 %v734_v6, %v314_v0  ;;  %v183_v15 = vadd.f32 %v720_v2, %v115_v3  ;;  %v316_v16 = vmul.f32 %v729_v5, %v248_v61  ;;  %v255_v59 = vld [vmem:[%s1358_s1 + $0xf8] sm:$0xff]  ;;  %v256_v3 = vld [vmem:[%s1358_s1 + $0x100] sm:$0xff] }
  0x27   :  { %571 = vst [vmem:[#allocation2 + $0x98] sm:$0xff] %v507_v7  ;;  %v509_v19 = vmax.f32 %v445_v8, 0.0  ;;  %v383_v20 = vadd.f32 %v734_v6, %v315_v9  ;;  %v184_v21 = vadd.f32 %v720_v2, %v116_v10  ;;  %v117_v22 = vmul.f32 %v715_v1, %v49_v4  ;;  %v57_v10 = vld [vmem:[%s1357_s0 + $0x108] sm:$0xff] }
  0x28   :  { %572 = vst [vmem:[#allocation2 + $0xa0] sm:$0xff] %v508_v13  ;;  %v446_v23 = vadd.f32 %v382_v14, %v182_v63  ;;  %v384_v24 = vadd.f32 %v734_v6, %v316_v16  ;;  %v317_v25 = vmul.f32 %v729_v5, %v249_v11  ;;  %v118_v26 = vmul.f32 %v715_v1, %v50_v12  ;;  %v58_v16 = vld [vmem:[%s1357_s0 + $0x110] sm:$0xff] }
  0x29   :  { %573 = vst [vmem:[#allocation2 + $0xa8] sm:$0xff] %v509_v19  ;;  %v447_v28 = vadd.f32 %v383_v20, %v183_v15  ;;  %v185_v29 = vadd.f32 %v720_v2, %v117_v22  ;;  %v318_v30 = vmul.f32 %v729_v5, %v250_v17  ;;  %v119_v31 = vmul.f32 %v715_v1, %v51_v18  ;;  %v257_v15 = vld [vmem:[%s1358_s1 + $0x108] sm:$0xff]  ;;  %v59_v22 = vld [vmem:[%s1357_s0 + $0x118] sm:$0xff] }
  0x2a   :  { %v510_v34 = vmax.f32 %v446_v23, 0.0  ;;  %v448_v35 = vadd.f32 %v384_v24, %v184_v21  ;;  %v385_v36 = vadd.f32 %v734_v6, %v317_v25  ;;  %v186_v37 = vadd.f32 %v720_v2, %v118_v26  ;;  %v258_v21 = vld [vmem:[%s1358_s1 + $0x110] sm:$0xff] }
  0x2b   :  { %v511_v40 = vmax.f32 %v447_v28, 0.0  ;;  %v386_v41 = vadd.f32 %v734_v6, %v318_v30  ;;  %v187_v42 = vadd.f32 %v720_v2, %v119_v31  ;;  %v319_v43 = vmul.f32 %v729_v5, %v251_v27  ;;  %v259_v31 = vld [vmem:[%s1358_s1 + $0x118] sm:$0xff] }
  0x2c   :  { %574 = vst [vmem:[#allocation2 + $0xb0] sm:$0xff] %v510_v34  ;;  %v512_v45 = vmax.f32 %v448_v35, 0.0  ;;  %v449_v46 = vadd.f32 %v385_v36, %v185_v29  ;;  %v120_v47 = vmul.f32 %v715_v1, %v52_v32  ;;  %v320_v48 = vmul.f32 %v729_v5, %v252_v33  ;;  %v60_v36 = vld [vmem:[%s1357_s0 + $0x120] sm:$0xff] }
  0x2d   :  { %575 = vst [vmem:[#allocation2 + $0xb8] sm:$0xff] %v511_v40  ;;  %v450_v49 = vadd.f32 %v386_v41, %v186_v37  ;;  %v387_v50 = vadd.f32 %v734_v6, %v319_v43  ;;  %v121_v51 = vmul.f32 %v715_v1, %v53_v38  ;;  %v321_v52 = vmul.f32 %v729_v5, %v253_v39  ;;  %v260_v37 = vld [vmem:[%s1358_s1 + $0x120] sm:$0xff]  ;;  %v261_v43 = vld [vmem:[%s1358_s1 + $0x128] sm:$0xff] }
  0x2e   :  { %576 = vst [vmem:[#allocation2 + $0xc0] sm:$0xff] %v512_v45  ;;  %v513_v55 = vmax.f32 %v449_v46, 0.0  ;;  %v188_v56 = vadd.f32 %v720_v2, %v120_v47  ;;  %v388_v57 = vadd.f32 %v734_v6, %v320_v48  ;;  %v122_v58 = vmul.f32 %v715_v1, %v54_v44  ;;  %v62_v48 = vld [vmem:[%s1357_s0 + $0x130] sm:$0xff] }
  0x2f   :  { %v514_v61 = vmax.f32 %v450_v49, 0.0  ;;  %v451_v62 = vadd.f32 %v387_v50, %v187_v42  ;;  %v189_v63 = vadd.f32 %v720_v2, %v121_v51  ;;  %v389_v0 = vadd.f32 %v734_v6, %v321_v52  ;;  %v61_v42 = vld [vmem:[%s1357_s0 + $0x128] sm:$0xff] }
  0x30   :  { %577 = vst [vmem:[#allocation2 + $0xc8] sm:$0xff] %v513_v55  ;;  %v452_v4 = vadd.f32 %v388_v57, %v188_v56  ;;  %v190_v7 = vadd.f32 %v720_v2, %v122_v58  ;;  %v322_v8 = vmul.f32 %v729_v5, %v254_v53  ;;  %v123_v9 = vmul.f32 %v715_v1, %v55_v54  ;;  %v262_v57 = vld [vmem:[%s1358_s1 + $0x130] sm:$0xff]  ;;  %v63_v58 = vld [vmem:[%s1357_s0 + $0x138] sm:$0xff] }
  0x31   :  { %578 = vst [vmem:[#allocation2 + $0xd0] sm:$0xff] %v514_v61  ;;  %v515_v11 = vmax.f32 %v451_v62, 0.0  ;;  %v453_v12 = vadd.f32 %v389_v0, %v189_v63  ;;  %v323_v13 = vmul.f32 %v729_v5, %v255_v59  ;;  %v124_v14 = vmul.f32 %v715_v1, %v56_v60  ;;  %v263_v63 = vld [vmem:[%s1358_s1 + $0x138] sm:$0xff]  ;;  %v64_v0 = vld [vmem:[%s1357_s0 + $0x140] sm:$0xff] }
  0x32   :  { %v516_v17 = vmax.f32 %v452_v4, 0.0  ;;  %v390_v18 = vadd.f32 %v734_v6, %v322_v8  ;;  %v191_v19 = vadd.f32 %v720_v2, %v123_v9  ;;  %v324_v20 = vmul.f32 %v729_v5, %v256_v3  ;;  %v264_v9 = vld [vmem:[%s1358_s1 + $0x140] sm:$0xff] }
  0x33   :  { %579 = vst [vmem:[#allocation2 + $0xd8] sm:$0xff] %v515_v11  ;;  %v517_v23 = vmax.f32 %v453_v12, 0.0  ;;  %v391_v24 = vadd.f32 %v734_v6, %v323_v13  ;;  %v192_v25 = vadd.f32 %v720_v2, %v124_v14  ;;  %v125_v26 = vmul.f32 %v715_v1, %v57_v10  ;;  %v65_v14 = vld [vmem:[%s1357_s0 + $0x148] sm:$0xff] }
  0x34   :  { %580 = vst [vmem:[#allocation2 + $0xe0] sm:$0xff] %v516_v17  ;;  %v454_v27 = vadd.f32 %v390_v18, %v190_v7  ;;  %v392_v28 = vadd.f32 %v734_v6, %v324_v20  ;;  %v325_v29 = vmul.f32 %v729_v5, %v257_v15  ;;  %v126_v30 = vmul.f32 %v715_v1, %v58_v16  ;;  %v66_v20 = vld [vmem:[%s1357_s0 + $0x150] sm:$0xff] }
  0x35   :  { %581 = vst [vmem:[#allocation2 + $0xe8] sm:$0xff] %v517_v23  ;;  %v455_v32 = vadd.f32 %v391_v24, %v191_v19  ;;  %v193_v33 = vadd.f32 %v720_v2, %v125_v26  ;;  %v326_v34 = vmul.f32 %v729_v5, %v258_v21  ;;  %v127_v35 = vmul.f32 %v715_v1, %v59_v22  ;;  %v265_v19 = vld [vmem:[%s1358_s1 + $0x148] sm:$0xff]  ;;  %v67_v26 = vld [vmem:[%s1357_s0 + $0x158] sm:$0xff] }
  0x36   :  { %v518_v38 = vmax.f32 %v454_v27, 0.0  ;;  %v456_v39 = vadd.f32 %v392_v28, %v192_v25  ;;  %v393_v40 = vadd.f32 %v734_v6, %v325_v29  ;;  %v194_v41 = vadd.f32 %v720_v2, %v126_v30  ;;  %v266_v25 = vld [vmem:[%s1358_s1 + $0x150] sm:$0xff] }
  0x37   :  { %v519_v44 = vmax.f32 %v455_v32, 0.0  ;;  %v394_v45 = vadd.f32 %v734_v6, %v326_v34  ;;  %v195_v46 = vadd.f32 %v720_v2, %v127_v35  ;;  %v327_v47 = vmul.f32 %v729_v5, %v259_v31  ;;  %v267_v35 = vld [vmem:[%s1358_s1 + $0x158] sm:$0xff] }
  0x38   :  { %582 = vst [vmem:[#allocation2 + $0xf0] sm:$0xff] %v518_v38  ;;  %v520_v49 = vmax.f32 %v456_v39, 0.0  ;;  %v457_v50 = vadd.f32 %v393_v40, %v193_v33  ;;  %v128_v51 = vmul.f32 %v715_v1, %v60_v36  ;;  %v328_v52 = vmul.f32 %v729_v5, %v260_v37  ;;  %v68_v40 = vld [vmem:[%s1357_s0 + $0x160] sm:$0xff] }
  0x39   :  { %583 = vst [vmem:[#allocation2 + $0xf8] sm:$0xff] %v519_v44  ;;  %v458_v53 = vadd.f32 %v394_v45, %v194_v41  ;;  %v395_v54 = vadd.f32 %v734_v6, %v327_v47  ;;  %v129_v55 = vmul.f32 %v715_v1, %v61_v42  ;;  %v329_v56 = vmul.f32 %v729_v5, %v261_v43  ;;  %v268_v41 = vld [vmem:[%s1358_s1 + $0x160] sm:$0xff]  ;;  %v269_v47 = vld [vmem:[%s1358_s1 + $0x168] sm:$0xff] }
  0x3a   :  { %584 = vst [vmem:[#allocation2 + $0x100] sm:$0xff] %v520_v49  ;;  %v521_v59 = vmax.f32 %v457_v50, 0.0  ;;  %v196_v60 = vadd.f32 %v720_v2, %v128_v51  ;;  %v396_v61 = vadd.f32 %v734_v6, %v328_v52  ;;  %v130_v62 = vmul.f32 %v715_v1, %v62_v48  ;;  %v70_v52 = vld [vmem:[%s1357_s0 + $0x170] sm:$0xff] }
  0x3b   :  { %v522_v3 = vmax.f32 %v458_v53, 0.0  ;;  %v459_v4 = vadd.f32 %v395_v54, %v195_v46  ;;  %v197_v7 = vadd.f32 %v720_v2, %v129_v55  ;;  %v397_v8 = vadd.f32 %v734_v6, %v329_v56  ;;  %v69_v46 = vld [vmem:[%s1357_s0 + $0x168] sm:$0xff] }
  0x3c   :  { %585 = vst [vmem:[#allocation2 + $0x108] sm:$0xff] %v521_v59  ;;  %v460_v10 = vadd.f32 %v396_v61, %v196_v60  ;;  %v198_v11 = vadd.f32 %v720_v2, %v130_v62  ;;  %v330_v12 = vmul.f32 %v729_v5, %v262_v57  ;;  %v131_v13 = vmul.f32 %v715_v1, %v63_v58  ;;  %v270_v61 = vld [vmem:[%s1358_s1 + $0x170] sm:$0xff]  ;;  %v71_v62 = vld [vmem:[%s1357_s0 + $0x178] sm:$0xff] }
  0x3d   :  { %586 = vst [vmem:[#allocation2 + $0x110] sm:$0xff] %v522_v3  ;;  %v523_v15 = vmax.f32 %v459_v4, 0.0  ;;  %v461_v16 = vadd.f32 %v397_v8, %v197_v7  ;;  %v331_v17 = vmul.f32 %v729_v5, %v263_v63  ;;  %v132_v18 = vmul.f32 %v715_v1, %v64_v0  ;;  %v271_v7 = vld [vmem:[%s1358_s1 + $0x178] sm:$0xff]  ;;  %v72_v8 = vld [vmem:[%s1357_s0 + $0x180] sm:$0xff] }
  0x3e   :  { %v524_v21 = vmax.f32 %v460_v10, 0.0  ;;  %v398_v22 = vadd.f32 %v734_v6, %v330_v12  ;;  %v199_v23 = vadd.f32 %v720_v2, %v131_v13  ;;  %v332_v24 = vmul.f32 %v729_v5, %v264_v9  ;;  %v272_v13 = vld [vmem:[%s1358_s1 + $0x180] sm:$0xff] }
  0x3f   :  { %587 = vst [vmem:[#allocation2 + $0x118] sm:$0xff] %v523_v15  ;;  %v525_v27 = vmax.f32 %v461_v16, 0.0  ;;  %v399_v28 = vadd.f32 %v734_v6, %v331_v17  ;;  %v200_v29 = vadd.f32 %v720_v2, %v132_v18  ;;  %v133_v30 = vmul.f32 %v715_v1, %v65_v14  ;;  %v73_v18 = vld [vmem:[%s1357_s0 + $0x188] sm:$0xff] }
  0x40   :  { %588 = vst [vmem:[#allocation2 + $0x120] sm:$0xff] %v524_v21  ;;  %v462_v31 = vadd.f32 %v398_v22, %v198_v11  ;;  %v400_v32 = vadd.f32 %v734_v6, %v332_v24  ;;  %v333_v33 = vmul.f32 %v729_v5, %v265_v19  ;;  %v134_v34 = vmul.f32 %v715_v1, %v66_v20  ;;  %v74_v24 = vld [vmem:[%s1357_s0 + $0x190] sm:$0xff] }
  0x41   :  { %589 = vst [vmem:[#allocation2 + $0x128] sm:$0xff] %v525_v27  ;;  %v463_v36 = vadd.f32 %v399_v28, %v199_v23  ;;  %v201_v37 = vadd.f32 %v720_v2, %v133_v30  ;;  %v334_v38 = vmul.f32 %v729_v5, %v266_v25  ;;  %v135_v39 = vmul.f32 %v715_v1, %v67_v26  ;;  %v273_v23 = vld [vmem:[%s1358_s1 + $0x188] sm:$0xff]  ;;  %v75_v30 = vld [vmem:[%s1357_s0 + $0x198] sm:$0xff] }
  0x42   :  { %v526_v42 = vmax.f32 %v462_v31, 0.0  ;;  %v464_v43 = vadd.f32 %v400_v32, %v200_v29  ;;  %v401_v44 = vadd.f32 %v734_v6, %v333_v33  ;;  %v202_v45 = vadd.f32 %v720_v2, %v134_v34  ;;  %v274_v29 = vld [vmem:[%s1358_s1 + $0x190] sm:$0xff] }
  0x43   :  { %v527_v48 = vmax.f32 %v463_v36, 0.0  ;;  %v402_v49 = vadd.f32 %v734_v6, %v334_v38  ;;  %v203_v50 = vadd.f32 %v720_v2, %v135_v39  ;;  %v335_v51 = vmul.f32 %v729_v5, %v267_v35  ;;  %v275_v39 = vld [vmem:[%s1358_s1 + $0x198] sm:$0xff] }
  0x44   :  { %590 = vst [vmem:[#allocation2 + $0x130] sm:$0xff] %v526_v42  ;;  %v528_v53 = vmax.f32 %v464_v43, 0.0  ;;  %v465_v54 = vadd.f32 %v401_v44, %v201_v37  ;;  %v136_v55 = vmul.f32 %v715_v1, %v68_v40  ;;  %v336_v56 = vmul.f32 %v729_v5, %v268_v41  ;;  %v76_v44 = vld [vmem:[%s1357_s0 + $0x1a0] sm:$0xff] }
  0x45   :  { %591 = vst [vmem:[#allocation2 + $0x138] sm:$0xff] %v527_v48  ;;  %v466_v57 = vadd.f32 %v402_v49, %v202_v45  ;;  %v403_v58 = vadd.f32 %v734_v6, %v335_v51  ;;  %v137_v59 = vmul.f32 %v715_v1, %v69_v46  ;;  %v337_v60 = vmul.f32 %v729_v5, %v269_v47  ;;  %v276_v45 = vld [vmem:[%s1358_s1 + $0x1a0] sm:$0xff]  ;;  %v277_v51 = vld [vmem:[%s1358_s1 + $0x1a8] sm:$0xff] }
  0x46   :  { %592 = vst [vmem:[#allocation2 + $0x140] sm:$0xff] %v528_v53  ;;  %v529_v63 = vmax.f32 %v465_v54, 0.0  ;;  %v204_v0 = vadd.f32 %v720_v2, %v136_v55  ;;  %v404_v3 = vadd.f32 %v734_v6, %v336_v56  ;;  %v138_v4 = vmul.f32 %v715_v1, %v70_v52  ;;  %v78_v56 = vld [vmem:[%s1357_s0 + $0x1b0] sm:$0xff] }
  0x47   :  { %v530_v9 = vmax.f32 %v466_v57, 0.0  ;;  %v467_v10 = vadd.f32 %v403_v58, %v203_v50  ;;  %v205_v11 = vadd.f32 %v720_v2, %v137_v59  ;;  %v405_v12 = vadd.f32 %v734_v6, %v337_v60  ;;  %v77_v50 = vld [vmem:[%s1357_s0 + $0x1a8] sm:$0xff] }
  0x48   :  { %593 = vst [vmem:[#allocation2 + $0x148] sm:$0xff] %v529_v63  ;;  %v468_v14 = vadd.f32 %v404_v3, %v204_v0  ;;  %v206_v15 = vadd.f32 %v720_v2, %v138_v4  ;;  %v338_v16 = vmul.f32 %v729_v5, %v270_v61  ;;  %v139_v17 = vmul.f32 %v715_v1, %v71_v62  ;;  %v278_v3 = vld [vmem:[%s1358_s1 + $0x1b0] sm:$0xff]  ;;  %v79_v4 = vld [vmem:[%s1357_s0 + $0x1b8] sm:$0xff] }
  0x49   :  { %594 = vst [vmem:[#allocation2 + $0x150] sm:$0xff] %v530_v9  ;;  %v531_v19 = vmax.f32 %v467_v10, 0.0  ;;  %v469_v20 = vadd.f32 %v405_v12, %v205_v11  ;;  %v339_v21 = vmul.f32 %v729_v5, %v271_v7  ;;  %v140_v22 = vmul.f32 %v715_v1, %v72_v8  ;;  %v279_v11 = vld [vmem:[%s1358_s1 + $0x1b8] sm:$0xff]  ;;  %v80_v12 = vld [vmem:[%s1357_s0 + $0x1c0] sm:$0xff] }
  0x4a   :  { %v532_v25 = vmax.f32 %v468_v14, 0.0  ;;  %v406_v26 = vadd.f32 %v734_v6, %v338_v16  ;;  %v207_v27 = vadd.f32 %v720_v2, %v139_v17  ;;  %v340_v28 = vmul.f32 %v729_v5, %v272_v13  ;;  %v280_v17 = vld [vmem:[%s1358_s1 + $0x1c0] sm:$0xff] }
  0x4b   :  { %595 = vst [vmem:[#allocation2 + $0x158] sm:$0xff] %v531_v19  ;;  %v533_v31 = vmax.f32 %v469_v20, 0.0  ;;  %v407_v32 = vadd.f32 %v734_v6, %v339_v21  ;;  %v208_v33 = vadd.f32 %v720_v2, %v140_v22  ;;  %v141_v34 = vmul.f32 %v715_v1, %v73_v18  ;;  %v81_v22 = vld [vmem:[%s1357_s0 + $0x1c8] sm:$0xff] }
  0x4c   :  { %596 = vst [vmem:[#allocation2 + $0x160] sm:$0xff] %v532_v25  ;;  %v470_v35 = vadd.f32 %v406_v26, %v206_v15  ;;  %v408_v36 = vadd.f32 %v734_v6, %v340_v28  ;;  %v341_v37 = vmul.f32 %v729_v5, %v273_v23  ;;  %v142_v38 = vmul.f32 %v715_v1, %v74_v24  ;;  %v82_v28 = vld [vmem:[%s1357_s0 + $0x1d0] sm:$0xff] }
  0x4d   :  { %597 = vst [vmem:[#allocation2 + $0x168] sm:$0xff] %v533_v31  ;;  %v471_v40 = vadd.f32 %v407_v32, %v207_v27  ;;  %v209_v41 = vadd.f32 %v720_v2, %v141_v34  ;;  %v342_v42 = vmul.f32 %v729_v5, %v274_v29  ;;  %v143_v43 = vmul.f32 %v715_v1, %v75_v30  ;;  %v281_v27 = vld [vmem:[%s1358_s1 + $0x1c8] sm:$0xff] }
  0x4e   :  { %v534_v46 = vmax.f32 %v470_v35, 0.0  ;;  %v472_v47 = vadd.f32 %v408_v36, %v208_v33  ;;  %v409_v48 = vadd.f32 %v734_v6, %v341_v37  ;;  %v210_v49 = vadd.f32 %v720_v2, %v142_v38  ;;  %v282_v33 = vld [vmem:[%s1358_s1 + $0x1d0] sm:$0xff]  ;;  %v641_v37 = vld [vmem:[%s1359_s2] ss:$0 sm:$0xff] }
  0x4f   :  { %v535_v52 = vmax.f32 %v471_v40, 0.0  ;;  %v410_v53 = vadd.f32 %v734_v6, %v342_v42  ;;  %v211_v54 = vadd.f32 %v720_v2, %v143_v43  ;;  %v343_v55 = vmul.f32 %v729_v5, %v275_v39  ;;  %v283_v43 = vld [vmem:[%s1358_s1 + $0x1d8] sm:$0xff] }
  0x50   :  { %598 = vst [vmem:[#allocation2 + $0x170] sm:$0xff] %v534_v46  ;;  %v536_v57 = vmax.f32 %v472_v47, 0.0  ;;  %v473_v58 = vadd.f32 %v409_v48, %v209_v41  ;;  %v144_v59 = vmul.f32 %v715_v1, %v76_v44  ;;  %v344_v60 = vmul.f32 %v729_v5, %v276_v45  ;;  %v643_v46 = vld [vmem:[%s1361_s4] ss:$0 sm:$0xff] }
  0x51   :  { %599 = vst [vmem:[#allocation2 + $0x178] sm:$0xff] %v535_v52  ;;  %v474_v61 = vadd.f32 %v410_v53, %v210_v49  ;;  %v411_v62 = vadd.f32 %v734_v6, %v343_v55  ;;  %v145_v63 = vmul.f32 %v715_v1, %v77_v50  ;;  %v345_v0 = vmul.f32 %v729_v5, %v277_v51  ;;  %v284_v48 = vld [vmem:[%s1358_s1 + $0x1e0] sm:$0xff]  ;;  %v285_v55 = vld [vmem:[%s1358_s1 + $0x1e8] sm:$0xff] }
  0x52   :  { %600 = vst [vmem:[#allocation2 + $0x180] sm:$0xff] %v536_v57  ;;  %v537_v7 = vmax.f32 %v473_v58, 0.0  ;;  %v212_v8 = vadd.f32 %v720_v2, %v144_v59  ;;  %v412_v9 = vadd.f32 %v734_v6, %v344_v60  ;;  %v146_v10 = vmul.f32 %v715_v1, %v78_v56  ;;  %v644_v51 = vld [vmem:[%s1362_s5] ss:$0 sm:$0xff]  ;;  %v86_v60 = vld [vmem:[%s1357_s0 + $0x1f0] sm:$0xff] }
  0x53   :  { %v538_v13 = vmax.f32 %v474_v61, 0.0  ;;  %v475_v14 = vadd.f32 %v411_v62, %v211_v54  ;;  %v213_v15 = vadd.f32 %v720_v2, %v145_v63  ;;  %v413_v16 = vadd.f32 %v734_v6, %v345_v0  ;;  %v85_v54 = vld [vmem:[%s1357_s0 + $0x1e8] sm:$0xff] }
  0x54   :  { %601 = vst [vmem:[#allocation2 + $0x188] sm:$0xff] %v537_v7  ;;  %v476_v18 = vadd.f32 %v412_v9, %v212_v8  ;;  %v214_v19 = vadd.f32 %v720_v2, %v146_v10  ;;  %v346_v20 = vmul.f32 %v729_v5, %v278_v3  ;;  %v147_v21 = vmul.f32 %v715_v1, %v79_v4  ;;  %v286_v9 = vld [vmem:[%s1358_s1 + $0x1f0] sm:$0xff]  ;;  %v87_v10 = vld [vmem:[%s1357_s0 + $0x1f8] sm:$0xff] }
  0x55   :  { %602 = vst [vmem:[#allocation2 + $0x190] sm:$0xff] %v538_v13  ;;  %v539_v23 = vmax.f32 %v475_v14, 0.0  ;;  %v477_v24 = vadd.f32 %v413_v16, %v213_v15  ;;  %v347_v25 = vmul.f32 %v729_v5, %v279_v11  ;;  %v148_v26 = vmul.f32 %v715_v1, %v80_v12  ;;  %v83_v1 = vld [vmem:[%s1357_s0 + $0x1d8] sm:$0xff] }
  0x56   :  { %v540_v29 = vmax.f32 %v476_v18, 0.0  ;;  %v414_v30 = vadd.f32 %v734_v6, %v346_v20  ;;  %v215_v31 = vadd.f32 %v720_v2, %v147_v21  ;;  %v348_v32 = vmul.f32 %v729_v5, %v280_v17  ;;  %v287_v15 = vld [vmem:[%s1358_s1 + $0x1f8] sm:$0xff] }
  0x57   :  { %603 = vst [vmem:[#allocation2 + $0x198] sm:$0xff] %v539_v23  ;;  %v541_v34 = vmax.f32 %v477_v24, 0.0  ;;  %v415_v35 = vadd.f32 %v734_v6, %v347_v25  ;;  %v216_v36 = vadd.f32 %v720_v2, %v148_v26  ;;  %v149_v38 = vmul.f32 %v641_v37, %v81_v22  ;;  %v642_v2 = vld [vmem:[%s1360_s3] ss:$0 sm:$0xff] }
  0x58   :  { %604 = vst [vmem:[#allocation2 + $0x1a0] sm:$0xff] %v540_v29  ;;  %v478_v39 = vadd.f32 %v414_v30, %v214_v19  ;;  %v416_v40 = vadd.f32 %v734_v6, %v348_v32  ;;  %v349_v41 = vmul.f32 %v729_v5, %v281_v27  ;;  %v150_v42 = vmul.f32 %v641_v37, %v82_v28  ;;  %v84_v5 = vld [vmem:[%s1357_s0 + $0x1e0] sm:$0xff]  ;;  %s671_s0 = smov [#allocation2]  }
  0x59   :  { %605 = vst [vmem:[#allocation2 + $0x1a8] sm:$0xff] %v541_v34  ;;  %v479_v44 = vadd.f32 %v415_v35, %v215_v31  ;;  %v217_v45 = vadd.f32 %v642_v2, %v149_v38  ;;  %v350_v47 = vmul.f32 %v643_v46, %v282_v33  ;;  %v151_v6 = vmul.f32 %v641_v37, %v83_v1  ;;  %s620_s1 = sshll.u32 %s671_s0, 4  ;;  %s621_s1 = int_to_ptr.vmem [resolvable:$true] %s620_s1 }
  0x5a   :  { %v542_v49 = vmax.f32 %v478_v39, 0.0  ;;  %v480_v50 = vadd.f32 %v416_v40, %v216_v36  ;;  %v417_v52 = vadd.f32 %v644_v51, %v349_v41  ;;  %v218_v53 = vadd.f32 %v642_v2, %v150_v42 }
  0x5b   :  { %v543_v56 = vmax.f32 %v479_v44, 0.0  ;;  %v418_v57 = vadd.f32 %v644_v51, %v350_v47  ;;  %v219_v58 = vadd.f32 %v642_v2, %v151_v6  ;;  %v351_v59 = vmul.f32 %v643_v46, %v283_v43 }
  0x5c   :  { %606 = vst [vmem:[#allocation2 + $0x1b0] sm:$0xff] %v542_v49  ;;  %v544_v61 = vmax.f32 %v480_v50, 0.0  ;;  %v481_v62 = vadd.f32 %v417_v52, %v217_v45  ;;  %v152_v63 = vmul.f32 %v641_v37, %v84_v5  ;;  %v352_v0 = vmul.f32 %v643_v46, %v284_v48 }
  0x5d   :  { %607 = vst [vmem:[#allocation2 + $0x1b8] sm:$0xff] %v543_v56  ;;  %v482_v3 = vadd.f32 %v418_v57, %v218_v53  ;;  %v419_v4 = vadd.f32 %v644_v51, %v351_v59  ;;  %v153_v7 = vmul.f32 %v641_v37, %v85_v54  ;;  %v353_v8 = vmul.f32 %v643_v46, %v285_v55 }
  0x5e   :  { %608 = vst [vmem:[#allocation2 + $0x1c0] sm:$0xff] %v544_v61  ;;  %v545_v11 = vmax.f32 %v481_v62, 0.0  ;;  %v220_v12 = vadd.f32 %v642_v2, %v152_v63  ;;  %v420_v13 = vadd.f32 %v644_v51, %v352_v0  ;;  %v154_v14 = vmul.f32 %v641_v37, %v86_v60 }
  0x5f   :  { %v546_v16 = vmax.f32 %v482_v3, 0.0  ;;  %v483_v17 = vadd.f32 %v419_v4, %v219_v58  ;;  %v221_v18 = vadd.f32 %v642_v2, %v153_v7  ;;  %v421_v19 = vadd.f32 %v644_v51, %v353_v8 }
  0x60   :  { %609 = vst [vmem:[#allocation2 + $0x1c8] sm:$0xff] %v545_v11  ;;  %v484_v20 = vadd.f32 %v420_v13, %v220_v12  ;;  %v222_v21 = vadd.f32 %v642_v2, %v154_v14  ;;  %v354_v22 = vmul.f32 %v643_v46, %v286_v9  ;;  %v155_v23 = vmul.f32 %v641_v37, %v87_v10 }
  0x61   :  { %610 = vst [vmem:[#allocation2 + $0x1d0] sm:$0xff] %v546_v16  ;;  %v547_v24 = vmax.f32 %v483_v17, 0.0  ;;  %v485_v25 = vadd.f32 %v421_v19, %v221_v18  ;;  %v355_v26 = vmul.f32 %v643_v46, %v287_v15 }
  0x62   :  { %v548_v27 = vmax.f32 %v484_v20, 0.0  ;;  %v422_v28 = vadd.f32 %v644_v51, %v354_v22  ;;  %v223_v29 = vadd.f32 %v642_v2, %v155_v23 }
  0x63   :  { %611 = vst [vmem:[#allocation2 + $0x1d8] sm:$0xff] %v547_v24  ;;  %v549_v30 = vmax.f32 %v485_v25, 0.0  ;;  %v423_v31 = vadd.f32 %v644_v51, %v355_v26 }
  0x64   :  { %612 = vst [vmem:[#allocation2 + $0x1e0] sm:$0xff] %v548_v27  ;;  %v486_v32 = vadd.f32 %v422_v28, %v222_v21 }
  0x65   :  { %613 = vst [vmem:[#allocation2 + $0x1e8] sm:$0xff] %v549_v30  ;;  %v487_v33 = vadd.f32 %v423_v31, %v223_v29 }
  0x66   :  { %v550_v1 = vmax.f32 %v486_v32, 0.0 }
  0x67   :  { %v551_v34 = vmax.f32 %v487_v33, 0.0 }
  0x68   :  { %614 = vst [vmem:[#allocation2 + $0x1f0] sm:$0xff] %v550_v1 }
  0x69   :  { %615 = vst [vmem:[#allocation2 + $0x1f8] sm:$0xff] %v551_v34 }
  0x6a   :  { %628 = dma.vmem_to_hbm [thread:$0]  %s621_s1, 8192, %s623_s27, [#allocation3], %s672_s28, %s672_s28, %s673_s29  }
  0x6b   :  { %669 = dma.done.wait [#allocation3], 8192  }
  0x6c   :  { %670 = vsyncadd [#allocation3], 4294959104 }
  0x6d   :  { %633 = vsyncpa [#allocation3], 1 }

// kernel: bottleneck_block.6
= control target key start
LH: loop header
LB: loop body
LE: loop exit
PB: predicated region body
PF: predicated region fallthrough
CT: control target
= control target key end

     0   :  { %s2780_s21 = smov 0   ;;  %s2782_s22 = smov 0   ;;  %s5000_s0 = inlined_call_operand.vmem [shape: f32[1,2,18,18,8], index: 0, kind: input, shape index: {}]   ;;  %s5001_s1 = inlined_call_operand.vmem [shape: f32[1,72,8], index: 1, kind: input, shape index: {}]   ;;  %s5002_s2 = inlined_call_operand.vmem [shape: f32[1,1,8], index: 2, kind: input, shape index: {}]   ;;  %s5003_s3 = inlined_call_operand.vmem [shape: f32[1,1,8], index: 3, kind: input, shape index: {}]   ;;  %s5004_s4 = inlined_call_operand.vmem [shape: f32[1,2,256,8], index: 4, kind: output, shape index: {0}]   ;;  %s5005_s5 = inlined_call_operand.vmem [shape: f32[1,2,1,8], index: 5, kind: output, shape index: {1}]   ;;  %s5006_s6 = inlined_call_operand.vmem [shape: f32[1,2,1,8], index: 6, kind: output, shape index: {2}]  }
   0x1   :  { %s2784_s23 = smov 0  }
   0x2 LB: > { %s26_s24 = sadd.s32 1, %s2730_s22  ;;  %p2598_p0 = scmp.ge.s32.totalorder %s2734_s23, 1  ;;  %s2734_s23 = sphi %s2784_s23, %s17_s23   ;;  %s2730_s22 = sphi %s2782_s22, %s5527_s22   ;;  %s2726_s21 = sphi %s2780_s21, %s5526_s21  }
   0x3   : > { %p27_p1 = scmp.ge.s32.totalorder %s26_s24, 2  ;;  %p267_p2 = scmp.lt.s32.totalorder %s2734_s23, 3 }
   0x5   : > { %s5529_s24 = smov (%p27_p1, %s26_s24), 0  ;;  %p268_p3 = pnand %p2598_p0, %p267_p2 }
   0x7   : > { %271 = sbr.rel (%p268_p3) target bundleno = 968 (0x3c8), region = 36 }
   0xc   : > { %p332_p4 = scmp.lt.s32.totalorder %s2726_s21, 1  ;;  %v597_v0 = vlaneseq  ;;  %v5007_v1 = vmov 0.0   ;;  %v2811_v5 = vld [vmem:[%s5002_s2] ss:$0 sm:$0xff]  ;;  %s2737_s28 = smov 8   ;;  %vm733_vm0 = vcmask 1046528  }
   0xd   : > { %v2799_v2 = vrot.slane %v5007_v1, 1  ;;  %v2825_v7 = vld [vmem:[%s5003_s3] ss:$0 sm:$0xff]  ;;  %vm910_vm3 = vcmask 1045504   ;;  %s2738_s10 = smov 16   ;;  %s2739_s11 = smov 24  }
   0xe   : > { %s5531_s21 = smov (!%p332_p4, %s2726_s21), 1  ;;  %v2803_v3 = vshrl.u32 %v597_v0, 7  ;;  %s2740_s16 = smov 32   ;;  %vm1689_vm4 = vcmask 64512   ;;  %vm1722_vm5 = vcmask 130048   ;;  %vm1755_vm6 = vcmask 195584  }
   0xf   : > { %5145 = vst [vmem:[#allocation2_spill] sm:$0xff] %v2799_v2  ;;  %v2698_v4 = vpack.i.bf16 %v2799_v2, %v2799_v2  ;;  %s2664_s25 = smul.u32 432, %s5531_s21  ;;  %s2741_s17 = smov 40   ;;  %vm1788_vm7 = vcmask 261120   ;;  %vm1821_vm8 = vcmask 326656   ;;  %vm1854_vm9 = vcmask 392192  }
  0x10   : > { %v2815_v6 = vadd.s32 16, %v2803_v3  ;;  %vm601_vm1 = vcmp.ge.s32.totalorder %v2803_v3, 1  ;;  %s2742_s18 = smov 48   ;;  %s2743_s19 = smov 56   ;;  %vm1887_vm10 = vcmask 457728   ;;  %vm1920_vm11 = vcmask 523264  }
  0x11   : > { %2699 = vrot.lane.b32.xlu0 %v2698_v4, %s2737_s28  ;;  %s2820_s7 = scalar_lea.vmem %s5000_s0, %s2664_s25  ;;  %s2744_s20 = smov 64   ;;  %vm1962_vm12 = vcmask 588800   ;;  %vm2273_vm13 = vcmask 57344  }
  0x12   : > { %v380_v8 = vld [vmem:[%s2820_s7 + $0x38] sm:$0xff]  ;;  %v381_v9 = vld [vmem:[%s2820_s7 + $0x40] sm:$0x3]  ;;  %v378_v13 = vld [vmem:[%s2820_s7 + $0x28] sm:$0x3]  ;;  %vm612_vm2 = vcmp.le.s32.totalorder %v2815_v6, 16  ;;  %s372_s8 = scalar_lea.vmem %s5006_s6, %s5531_s21 }
  0x13   : > { %v377_v10 = vld [vmem:[%s2820_s7 + $0x20] sm:$0xff]  ;;  %v438_v11 = vmul.f32 %v2811_v5, %v380_v8  ;;  %v439_v12 = vmul.f32 %v2811_v5, %v381_v9  ;;  %v376_v15 = vld [vmem:[%s2820_s7 + $0x18] sm:$0xff]  ;;  %v382_v16 = vld [vmem:[%s2820_s7 + $0x48] sm:$0xff]  ;;  %v436_v17 = vmul.f32 %v2811_v5, %v378_v13  ;;  %s2636_s26 = sshll.u32 %s5531_s21, 8 }
  0x14   : > { %v435_v14 = vmul.f32 %v2811_v5, %v377_v10  ;;  %v434_v18 = vmul.f32 %v2811_v5, %v376_v15  ;;  %v383_v19 = vld [vmem:[%s2820_s7 + $0x50] sm:$0xff]  ;;  %v440_v20 = vmul.f32 %v2811_v5, %v382_v16  ;;  %v384_v38 = vld [vmem:[%s2820_s7 + $0x58] sm:$0x3]  ;;  %v386_v43 = vld [vmem:[%s2820_s7 + $0x68] sm:$0xff]  ;;  %s4685_s29 = scalar_lea.vmem %s5004_s4, %s2636_s26 }
  0x15   : > { %v379_v21 = vld [vmem:[%s2820_s7 + $0x30] sm:$0xff]  ;;  %v496_v22 = vadd.f32 %v2825_v7, %v438_v11  ;;  %v497_v23 = vadd.f32 %v2825_v7, %v439_v12  ;;  %v441_v25 = vmul.f32 %v2811_v5, %v383_v19  ;;  %v494_v26 = vadd.f32 %v2825_v7, %v436_v17  ;;  %v385_v53 = vld [vmem:[%s2820_s7 + $0x60] sm:$0xff]  ;;  %v388_v58 = vld [vmem:[%s2820_s7 + $0x78] sm:$0xff] }
  0x16   : > { %v493_v24 = vadd.f32 %v2825_v7, %v435_v14  ;;  %v492_v27 = vadd.f32 %v2825_v7, %v434_v18  ;;  %v498_v28 = vadd.f32 %v2825_v7, %v440_v20  ;;  %v437_v29 = vmul.f32 %v2811_v5, %v379_v21  ;;  %v387_v48 = vld [vmem:[%s2820_s7 + $0x70] sm:$0x3]  ;;  %v389_v59 = vld [vmem:[%s2820_s7 + $0x80] sm:$0xff]  ;;  %v392_v15 = vld [vmem:[%s2820_s7 + $0x98] sm:$0xff] }
  0x17   : > { %v2851_v30 = vmax.f32 %v496_v22, 0.0  ;;  %v551_v31 = vmax.f32 %v497_v23, 0.0  ;;  %v499_v33 = vadd.f32 %v2825_v7, %v441_v25  ;;  %v548_v34 = vmax.f32 %v494_v26, 0.0  ;;  %v391_v0 = vld [vmem:[%s2820_s7 + $0x90] sm:$0xff]  ;;  %v410_v1 = vld [vmem:[%s2820_s7 + $0x128] sm:$0xff] }
  0x18   : > { %v2853_v32 = vmax.f32 %v493_v24, 0.0  ;;  %v546_v35 = vmax.f32 %v492_v27, 0.0  ;;  %v552_v36 = vmax.f32 %v498_v28, 0.0  ;;  %v495_v37 = vadd.f32 %v2825_v7, %v437_v29 }
  0x19   : > { %v2860_v39 = vsel %vm612_vm2, %v551_v31, 0.0  ;;  %v745_v40 = vrot.slane %v2851_v30, 1  ;;  %v2864_v42 = vmax.f32 %v499_v33, 0.0  ;;  %v2870_v45 = vsel %vm612_vm2, %v548_v34, 0.0 }
  0x1a   : > { %5146 = vst [vmem:[#allocation3_spill] sm:$0xff] %v2853_v32  ;;  %v740_v41 = vrot.slane %v2853_v32, 1  ;;  %v747_v44 = vrot.slane %v2860_v39, 1  ;;  %v2874_v46 = vsel %vm601_vm1, %v546_v35, 0.0  ;;  %v2878_v47 = vsel %vm601_vm1, %v552_v36, 0.0 }
  0x1b   : > { %5147 = vst [vmem:[#allocation4_spill] sm:$0xff] %v2864_v42  ;;  %v742_v49 = vrot.slane %v2870_v45, 1  ;;  %v739_v50 = vrot.slane %v2874_v46, 1  ;;  %v749_v51 = vrot.slane %v2878_v47, 1  ;;  %v750_v52 = vrot.slane %v2864_v42, 1 }
  0x1c   : > { %5148 = vst [vmem:[#allocation5_spill] sm:$0xff] %v2874_v46  ;;  %v2887_v54 = vsel %vm733_vm0, %v745_v40, %v747_v44  ;;  %v549_v55 = vmax.f32 %v495_v37, 0.0  ;;  %v442_v56 = vmul.f32 %v2811_v5, %v384_v38  ;;  %v444_v57 = vmul.f32 %v2811_v5, %v386_v43  ;;  %v390_v38 = vld [vmem:[%s2820_s7 + $0x88] sm:$0x3]  ;;  %v396_v44 = vld [vmem:[%s2820_s7 + $0xb8] sm:$0x3] }
  0x1d   : > { %5149 = vst [vmem:[#allocation6_spill] sm:$0xff] %v2878_v47  ;;  %824 = vrot.lane.b32.xlu2 %v2887_v54, %s2737_s28  ;;  %v2896_v60 = vsel %vm733_vm0, %v740_v41, %v742_v49  ;;  %v2899_v61 = vsel %vm733_vm0, %v739_v50, %v740_v41  ;;  %v2902_v62 = vsel %vm733_vm0, %v749_v51, %v750_v52  ;;  %v395_v50 = vld [vmem:[%s2820_s7 + $0xb0] sm:$0xff] }
  0x1e   : > { %5150 = vst [vmem:[#allocation7_spill] sm:$0xff] %v2887_v54  ;;  %v445_v63 = vmul.f32 %v2811_v5, %v387_v48  ;;  %820 = vrot.lane.b32.xlu1 %v2896_v60, %s2737_s28  ;;  %818 = vrot.lane.b32.xlu0 %v2899_v61, %s2737_s28  ;;  %v2912_v4 = vsel %vm601_vm1, %v549_v55, 0.0  ;;  %v500_v8 = vadd.f32 %v2825_v7, %v442_v56  ;;  %v394_v56 = vld [vmem:[%s2820_s7 + $0xa8] sm:$0xff] }
  0x1f   : > { %5151 = vst [vmem:[#allocation8_spill] sm:$0xff] %v2896_v60  ;;  %v502_v9 = vadd.f32 %v2825_v7, %v444_v57  ;;  %v443_v10 = vmul.f32 %v2811_v5, %v385_v53  ;;  %v744_v11 = vrot.slane %v2912_v4, 1  ;;  %v446_v13 = vmul.f32 %v2811_v5, %v388_v58  ;;  %v397_v57 = vld [vmem:[%s2820_s7 + $0xc0] sm:$0xff]  ;;  %v398_v58 = vld [vmem:[%s2820_s7 + $0xc8] sm:$0xff] }
  0x20   : > { %5152 = vst [vmem:[#allocation9_spill] sm:$0xff] %v2899_v61  ;;  %v503_v12 = vadd.f32 %v2825_v7, %v445_v63  ;;  %v447_v14 = vmul.f32 %v2811_v5, %v389_v59  ;;  %v554_v16 = vmax.f32 %v500_v8, 0.0  ;;  %v449_v19 = vmul.f32 %v2811_v5, %v391_v0 }
  0x21   : > { %5153 = vst [vmem:[#allocation10_spill] sm:$0xff] %v2902_v62  ;;  %v2922_v17 = vmax.f32 %v502_v9, 0.0  ;;  %v501_v18 = vadd.f32 %v2825_v7, %v443_v10  ;;  %v2927_v20 = vsel %vm733_vm0, %v744_v11, %v745_v40  ;;  %v504_v22 = vadd.f32 %v2825_v7, %v446_v13  ;;  %v393_v40 = vld [vmem:[%s2820_s7 + $0xa0] sm:$0x3] }
  0x22   : > { %5155 = vst [vmem:[#allocation12_spill] sm:$0xff] %v2927_v20  ;;  %v557_v21 = vmax.f32 %v503_v12, 0.0  ;;  %v505_v23 = vadd.f32 %v2825_v7, %v447_v14  ;;  %v2933_v24 = vsel %vm612_vm2, %v554_v16, 0.0  ;;  %v450_v27 = vmul.f32 %v2811_v5, %v392_v15 }
  0x23   : > { %5154 = vst [vmem:[#allocation11_spill] sm:$0xff] %v2922_v17  ;;  %v755_v25 = vrot.slane %v2922_v17, 1  ;;  %v555_v26 = vmax.f32 %v501_v18, 0.0  ;;  %v752_v28 = vrot.slane %v2933_v24, 1  ;;  %v558_v31 = vmax.f32 %v504_v22, 0.0 }
  0x24   : > { %v2940_v29 = vsel %vm612_vm2, %v557_v21, 0.0  ;;  %v2942_v33 = vmax.f32 %v505_v23, 0.0  ;;  %v507_v36 = vadd.f32 %v2825_v7, %v449_v19  ;;  %v508_v37 = vadd.f32 %v2825_v7, %v450_v27  ;;  %v400_v27 = vld [vmem:[%s2820_s7 + $0xd8] sm:$0xff] }
  0x25   : > { %v757_v34 = vrot.slane %v2940_v29, 1  ;;  %v2947_v35 = vsel %vm601_vm1, %v555_v26, 0.0  ;;  %826 = vrot.lane.b32.xlu2 %v2902_v62, %s2737_s28  ;;  %v2956_v41 = vsel %vm733_vm0, %v750_v52, %v752_v28  ;;  %v2960_v43 = vsel %vm601_vm1, %v558_v31, 0.0 }
  0x26   : > { %5156 = vst [vmem:[#allocation13_spill] sm:$0xff] %v2942_v33  ;;  %822 = vrot.lane.b32.xlu1 %v2927_v20, %s2737_s28  ;;  %828 = vrot.lane.b32.xlu0 %v2956_v41, %s2737_s28  ;;  %v754_v48 = vrot.slane %v2947_v35, 1  ;;  %v561_v49 = vmax.f32 %v507_v36, 0.0  ;;  %v759_v51 = vrot.slane %v2960_v43, 1  ;;  %v760_v52 = vrot.slane %v2942_v33, 1  ;;  %v5270_v3 = vld [vmem:[#allocation8_spill] sm:$0xff] }
  0x27   : > { %5157 = vst [vmem:[#allocation14_spill] sm:$0xff] %v2956_v41  ;;  %v448_v53 = vmul.f32 %v2811_v5, %v390_v38  ;;  %v451_v55 = vmul.f32 %v2811_v5, %v393_v40  ;;  %v2977_v59 = vsel %vm733_vm0, %v755_v25, %v757_v34  ;;  %v2979_v63 = vmax.f32 %v508_v37, 0.0  ;;  %v419_v41 = vld [vmem:[%s2820_s7 + $0x170] sm:$0xff] }
  0x28   : > { %5158 = vst [vmem:[#allocation15_spill] sm:$0xff] %v2960_v43  ;;  %v454_v0 = vmul.f32 %v2811_v5, %v396_v44  ;;  %v2984_v8 = vsel %vm601_vm1, %v561_v49, 0.0  ;;  %v453_v11 = vmul.f32 %v2811_v5, %v395_v50  ;;  %v452_v13 = vmul.f32 %v2811_v5, %v394_v56  ;;  %v401_v44 = vld [vmem:[%s2820_s7 + $0xe0] sm:$0xff]  ;;  %v399_v49 = vld [vmem:[%s2820_s7 + $0xd0] sm:$0x3] }
  0x29   : > { %5159 = vst [vmem:[#allocation16_spill] sm:$0xff] %v2977_v59  ;;  %v506_v9 = vadd.f32 %v2825_v7, %v448_v53  ;;  %v509_v10 = vadd.f32 %v2825_v7, %v451_v55  ;;  %v455_v14 = vmul.f32 %v2811_v5, %v397_v57  ;;  %v456_v15 = vmul.f32 %v2811_v5, %v398_v58  ;;  %v402_v53 = vld [vmem:[%s2820_s7 + $0xe8] sm:$0x3] }
  0x2a   : > { %5160 = vst [vmem:[#allocation17_spill] sm:$0xff] %v2984_v8  ;;  %v512_v12 = vadd.f32 %v2825_v7, %v454_v0  ;;  %v2994_v16 = vsel %vm733_vm0, %v754_v48, %v755_v25  ;;  %v2997_v18 = vsel %vm733_vm0, %v759_v51, %v760_v52  ;;  %v765_v22 = vrot.slane %v2979_v63, 1 }
  0x2b   : > { %5161 = vst [vmem:[#allocation18_spill] sm:$0xff] %v2994_v16  ;;  %v560_v19 = vmax.f32 %v506_v9, 0.0  ;;  %v563_v21 = vmax.f32 %v509_v10, 0.0  ;;  %v510_v23 = vadd.f32 %v2825_v7, %v452_v13  ;;  %v513_v26 = vadd.f32 %v2825_v7, %v455_v14  ;;  %v405_v14 = vld [vmem:[%s2820_s7 + $0x100] sm:$0x3] }
  0x2c   : > { %5162 = vst [vmem:[#allocation19_spill] sm:$0xff] %v2997_v18  ;;  %v764_v25 = vrot.slane %v2984_v8, 1  ;;  %v511_v34 = vadd.f32 %v2825_v7, %v453_v11  ;;  %v566_v36 = vmax.f32 %v512_v12, 0.0  ;;  %v514_v37 = vadd.f32 %v2825_v7, %v456_v15 }
  0x2d   : > { %832 = vrot.lane.b32.xlu2 %v2977_v59, %s2737_s28  ;;  %v3008_v28 = vsel %vm612_vm2, %v560_v19, 0.0  ;;  %v3012_v31 = vsel %vm612_vm2, %v563_v21, 0.0  ;;  %v458_v48 = vmul.f32 %v2811_v5, %v400_v27  ;;  %v564_v50 = vmax.f32 %v510_v23, 0.0  ;;  %v406_v23 = vld [vmem:[%s2820_s7 + $0x108] sm:$0xff] }
  0x2e   : > { %830 = vrot.lane.b32.xlu1 %v2994_v16, %s2737_s28  ;;  %834 = vrot.lane.b32.xlu0 %v2997_v18, %s2737_s28  ;;  %v762_v38 = vrot.slane %v3008_v28, 1  ;;  %v767_v40 = vrot.slane %v3012_v31, 1  ;;  %v567_v51 = vmax.f32 %v513_v26, 0.0  ;;  %v3027_v55 = vsel %vm733_vm0, %v764_v25, %v765_v22  ;;  %v416_v18 = vld [vmem:[%s2820_s7 + $0x158] sm:$0xff] }
  0x2f   : > { %5163 = vst [vmem:[#allocation20_spill] sm:$0xff] %v3027_v55  ;;  %v3029_v56 = vmax.f32 %v511_v34, 0.0  ;;  %v3033_v57 = vsel %vm612_vm2, %v566_v36, 0.0  ;;  %v3035_v58 = vmax.f32 %v514_v37, 0.0  ;;  %v459_v0 = vmul.f32 %v2811_v5, %v401_v44  ;;  %v404_v44 = vld [vmem:[%s2820_s7 + $0xf8] sm:$0xff] }
  0x30   : > { %v457_v9 = vmul.f32 %v2811_v5, %v399_v49  ;;  %v3040_v10 = vsel %vm733_vm0, %v760_v52, %v762_v38  ;;  %v3043_v11 = vsel %vm733_vm0, %v765_v22, %v767_v40  ;;  %v516_v12 = vadd.f32 %v2825_v7, %v458_v48  ;;  %v403_v22 = vld [vmem:[%s2820_s7 + $0xf0] sm:$0xff] }
  0x31   : > { %5164 = vst [vmem:[#allocation21_spill] sm:$0xff] %v3040_v10  ;;  %v460_v13 = vmul.f32 %v2811_v5, %v402_v53  ;;  %v3050_v15 = vsel %vm601_vm1, %v564_v50, 0.0  ;;  %v3054_v19 = vsel %vm601_vm1, %v567_v51, 0.0  ;;  %v770_v26 = vrot.slane %v3029_v56, 1  ;;  %v407_v51 = vld [vmem:[%s2820_s7 + $0x110] sm:$0xff] }
  0x32   : > { %5165 = vst [vmem:[#allocation22_spill] sm:$0xff] %v3043_v11  ;;  %v515_v52 = vadd.f32 %v2825_v7, %v457_v9  ;;  %v772_v27 = vrot.slane %v3033_v57, 1  ;;  %v517_v25 = vadd.f32 %v2825_v7, %v459_v0  ;;  %v463_v34 = vmul.f32 %v2811_v5, %v405_v14 }
  0x33   : > { %5166 = vst [vmem:[#allocation23_spill] sm:$0xff] %v3054_v19  ;;  %v518_v21 = vadd.f32 %v2825_v7, %v460_v13  ;;  %v769_v36 = vrot.slane %v3050_v15, 1  ;;  %v774_v37 = vrot.slane %v3054_v19, 1  ;;  %v775_v38 = vrot.slane %v3035_v58, 1 }
  0x34   : > { %v570_v40 = vmax.f32 %v516_v12, 0.0  ;;  %v569_v48 = vmax.f32 %v515_v52, 0.0  ;;  %v461_v50 = vmul.f32 %v2811_v5, %v403_v22  ;;  %v464_v53 = vmul.f32 %v2811_v5, %v406_v23 }
  0x35   : > { %838 = vrot.lane.b32.xlu2 %v3027_v55, %s2737_s28  ;;  %v572_v49 = vmax.f32 %v518_v21, 0.0  ;;  %v3078_v0 = vsel %vm733_vm0, %v770_v26, %v772_v27  ;;  %v3080_v9 = vmax.f32 %v517_v25, 0.0  ;;  %v462_v13 = vmul.f32 %v2811_v5, %v404_v44 }
  0x36   : > { %836 = vrot.lane.b32.xlu1 %v3040_v10, %s2737_s28  ;;  %840 = vrot.lane.b32.xlu0 %v3043_v11, %s2737_s28  ;;  %5167 = vst [vmem:[#allocation24_spill] sm:$0xff] %v3078_v0  ;;  %v521_v12 = vadd.f32 %v2825_v7, %v463_v34  ;;  %v3085_v14 = vsel %vm733_vm0, %v769_v36, %v770_v26  ;;  %v3092_v21 = vsel %vm601_vm1, %v570_v40, 0.0  ;;  %v3097_v23 = vsel %vm612_vm2, %v569_v48, 0.0  ;;  %v409_v34 = vld [vmem:[%s2820_s7 + $0x120] sm:$0xff]  ;;  %v408_v36 = vld [vmem:[%s2820_s7 + $0x118] sm:$0x3] }
  0x37   : > { %5168 = vst [vmem:[#allocation25_spill] sm:$0xff] %v3080_v9  ;;  %v3088_v52 = vsel %vm733_vm0, %v774_v37, %v775_v38  ;;  %v465_v22 = vmul.f32 %v2811_v5, %v407_v51  ;;  %v3101_v27 = vsel %vm612_vm2, %v572_v49, 0.0  ;;  %v519_v26 = vadd.f32 %v2825_v7, %v461_v50  ;;  %v411_v37 = vld [vmem:[%s2820_s7 + $0x130] sm:$0x3] }
  0x38   : > { %5169 = vst [vmem:[#allocation26_spill] sm:$0xff] %v3085_v14  ;;  %v522_v25 = vadd.f32 %v2825_v7, %v464_v53  ;;  %v779_v40 = vrot.slane %v3092_v21, 1  ;;  %v780_v44 = vrot.slane %v3080_v9, 1  ;;  %v520_v48 = vadd.f32 %v2825_v7, %v462_v13 }
  0x39   : > { %5170 = vst [vmem:[#allocation27_spill] sm:$0xff] %v3088_v52  ;;  %v575_v49 = vmax.f32 %v521_v12, 0.0  ;;  %v777_v50 = vrot.slane %v3097_v23, 1  ;;  %v782_v51 = vrot.slane %v3101_v27, 1  ;;  %v523_v53 = vadd.f32 %v2825_v7, %v465_v22 }
  0x3a   : > { %5171 = vst [vmem:[#allocation28_spill] sm:$0xff] %v3092_v21  ;;  %v467_v2 = vmul.f32 %v2811_v5, %v409_v34  ;;  %v469_v11 = vmul.f32 %v2811_v5, %v411_v37  ;;  %v3125_v13 = vsel %vm733_vm0, %v779_v40, %v780_v44  ;;  %v3127_v12 = vmax.f32 %v520_v48, 0.0  ;;  %v414_v37 = vld [vmem:[%s2820_s7 + $0x148] sm:$0x3] }
  0x3b   : > { %5172 = vst [vmem:[#allocation29_spill] sm:$0xff] %v3125_v13  ;;  %v3131_v10 = vsel %vm612_vm2, %v575_v49, 0.0  ;;  %v468_v22 = vmul.f32 %v2811_v5, %v410_v1  ;;  %v3140_v34 = vmax.f32 %v523_v53, 0.0 }
  0x3c   : > { %5173 = vst [vmem:[#allocation30_spill] sm:$0xff] %v3127_v12 }
  0x3d   : > { %844 = vrot.lane.b32.xlu2 %v3078_v0, %s2737_s28  ;;  %v576_v0 = vmax.f32 %v522_v25, 0.0  ;;  %v3138_v25 = vsel %vm733_vm0, %v780_v44, %v782_v51  ;;  %v412_v44 = vld [vmem:[%s2820_s7 + $0x138] sm:$0xff]  ;;  %v790_v51 = vrot.slane %v3140_v34, 1 }
  0x3e   : > { %842 = vrot.lane.b32.xlu1 %v3085_v14, %s2737_s28  ;;  %846 = vrot.lane.b32.xlu0 %v3088_v52, %s2737_s28  ;;  %v573_v14 = vmax.f32 %v519_v26, 0.0  ;;  %v466_v52 = vmul.f32 %v2811_v5, %v408_v36  ;;  %v3135_v26 = vsel %vm733_vm0, %v775_v38, %v777_v50  ;;  %5175 = vst [vmem:[#allocation32_spill] sm:$0xff] %v3138_v25 }
  0x3f   : > { %5174 = vst [vmem:[#allocation31_spill] sm:$0xff] %v3135_v26  ;;  %v525_v36 = vadd.f32 %v2825_v7, %v467_v2  ;;  %v3150_v48 = vsel %vm601_vm1, %v576_v0, 0.0  ;;  %v527_v38 = vadd.f32 %v2825_v7, %v469_v11  ;;  %v415_v2 = vld [vmem:[%s2820_s7 + $0x150] sm:$0xff]  ;;  %v785_v0 = vrot.slane %v3127_v12, 1 }
  0x40   : > { %v3146_v40 = vsel %vm601_vm1, %v573_v14, 0.0  ;;  %5176 = vst [vmem:[#allocation33_spill] sm:$0xff] %v3150_v48  ;;  %v524_v1 = vadd.f32 %v2825_v7, %v466_v52  ;;  %v787_v14 = vrot.slane %v3131_v10, 1  ;;  %v526_v52 = vadd.f32 %v2825_v7, %v468_v22 }
  0x41   : > { %v472_v11 = vmul.f32 %v2811_v5, %v414_v37  ;;  %v784_v49 = vrot.slane %v3146_v40, 1  ;;  %v789_v50 = vrot.slane %v3150_v48, 1  ;;  %v579_v53 = vmax.f32 %v525_v36, 0.0 }
  0x42   : > { %v581_v55 = vmax.f32 %v527_v38, 0.0  ;;  %v473_v16 = vmul.f32 %v2811_v5, %v415_v2  ;;  %v3174_v22 = vsel %vm733_vm0, %v785_v0, %v787_v14  ;;  %v3176_v37 = vmax.f32 %v526_v52, 0.0 }
  0x43   : > { %5177 = vst [vmem:[#allocation34_spill] sm:$0xff] %v3174_v22  ;;  %v530_v36 = vadd.f32 %v2825_v7, %v472_v11  ;;  %v3184_v38 = vsel %vm733_vm0, %v789_v50, %v790_v51  ;;  %v474_v2 = vmul.f32 %v2811_v5, %v416_v18  ;;  %v418_v11 = vld [vmem:[%s2820_s7 + $0x168] sm:$0xff]  ;;  %v420_v50 = vld [vmem:[%s2820_s7 + $0x178] sm:$0x3] }
  0x44   : > { %5178 = vst [vmem:[#allocation35_spill] sm:$0xff] %v3176_v37  ;;  %v531_v52 = vadd.f32 %v2825_v7, %v473_v16  ;;  %v476_v54 = vmul.f32 %v2811_v5, %v418_v11  ;;  %v478_v20 = vmul.f32 %v2811_v5, %v420_v50 }
  0x45   : > { %850 = vrot.lane.b32.xlu2 %v3125_v13, %s2737_s28  ;;  %v413_v13 = vld [vmem:[%s2820_s7 + $0x140] sm:$0xff]  ;;  %5180 = vst [vmem:[#allocation37_spill] sm:$0xff] %v3184_v38 }
  0x46   : > { %848 = vrot.lane.b32.xlu1 %v3135_v26, %s2737_s28  ;;  %852 = vrot.lane.b32.xlu0 %v3138_v25, %s2737_s28  ;;  %v578_v26 = vmax.f32 %v524_v1, 0.0  ;;  %v470_v25 = vmul.f32 %v2811_v5, %v412_v44  ;;  %v471_v59 = vmul.f32 %v2811_v5, %v413_v13  ;;  %v3181_v1 = vsel %vm733_vm0, %v784_v49, %v785_v0  ;;  %v417_v49 = vld [vmem:[%s2820_s7 + $0x160] sm:$0x3] }
  0x47   : > { %5179 = vst [vmem:[#allocation36_spill] sm:$0xff] %v3181_v1  ;;  %v3188_v44 = vsel %vm601_vm1, %v579_v53, 0.0  ;;  %v3197_v13 = vsel %vm612_vm2, %v581_v55, 0.0  ;;  %v795_v55 = vrot.slane %v3176_v37, 1  ;;  %v585_v62 = vmax.f32 %v531_v52, 0.0 }
  0x48   : > { %5181 = vst [vmem:[#allocation38_spill] sm:$0xff] %v3188_v44  ;;  %v3193_v14 = vsel %vm612_vm2, %v578_v26, 0.0  ;;  %v528_v0 = vadd.f32 %v2825_v7, %v470_v25  ;;  %v794_v18 = vrot.slane %v3188_v44, 1  ;;  %v529_v26 = vadd.f32 %v2825_v7, %v471_v59 }
  0x49   : > { %v584_v25 = vmax.f32 %v530_v36, 0.0  ;;  %v792_v16 = vrot.slane %v3193_v14, 1  ;;  %v797_v53 = vrot.slane %v3197_v13, 1  ;;  %v534_v11 = vadd.f32 %v2825_v7, %v476_v54 }
  0x4a   : > { %v3221_v61 = vsel %vm733_vm0, %v794_v18, %v795_v55  ;;  %v3223_v59 = vmax.f32 %v529_v26, 0.0  ;;  %v3245_v50 = vsel %vm601_vm1, %v585_v62, 0.0 }
  0x4b   : > { %5182 = vst [vmem:[#allocation39_spill] sm:$0xff] %v3221_v61  ;;  %v3227_v36 = vsel %vm612_vm2, %v584_v25, 0.0  ;;  %v3231_v60 = vsel %vm733_vm0, %v790_v51, %v792_v16  ;;  %v536_v51 = vadd.f32 %v2825_v7, %v478_v20  ;;  %v588_v18 = vmax.f32 %v534_v11, 0.0 }
  0x4c   : > { %5183 = vst [vmem:[#allocation40_spill] sm:$0xff] %v3223_v59  ;;  %v800_v54 = vrot.slane %v3223_v59, 1 }
  0x4d   : > { %856 = vrot.lane.b32.xlu2 %v3174_v22, %s2737_s28  ;;  %v532_v22 = vadd.f32 %v2825_v7, %v474_v2  ;;  %v477_v2 = vmul.f32 %v2811_v5, %v419_v41  ;;  %5184 = vst [vmem:[#allocation41_spill] sm:$0xff] %v3231_v60  ;;  %v590_v26 = vmax.f32 %v536_v51, 0.0 }
  0x4e   : > { %854 = vrot.lane.b32.xlu1 %v3181_v1, %s2737_s28  ;;  %858 = vrot.lane.b32.xlu0 %v3184_v38, %s2737_s28  ;;  %v582_v1 = vmax.f32 %v528_v0, 0.0  ;;  %v475_v38 = vmul.f32 %v2811_v5, %v417_v49  ;;  %v3234_v0 = vsel %vm733_vm0, %v795_v55, %v797_v53  ;;  %5188 = vst [vmem:[#allocation45_spill] sm:$0xff] %v3245_v50 }
  0x4f   : > { %5185 = vst [vmem:[#allocation42_spill] sm:$0xff] %v3234_v0  ;;  %v3236_v52 = vmax.f32 %v532_v22, 0.0  ;;  %v802_v22 = vrot.slane %v3227_v36, 1  ;;  %v535_v62 = vadd.f32 %v2825_v7, %v477_v2  ;;  %v3274_v2 = vsel %vm601_vm1, %v588_v18, 0.0 }
  0x50   : > { %v3241_v49 = vsel %vm601_vm1, %v582_v1, 0.0  ;;  %v533_v41 = vadd.f32 %v2825_v7, %v475_v38  ;;  %v804_v38 = vrot.slane %v3245_v50, 1  ;;  %5193 = vst [vmem:[#allocation50_spill] sm:$0xff] %v3274_v2  ;;  %v809_v51 = vrot.slane %v3274_v2, 1 }
  0x51   : > { %5186 = vst [vmem:[#allocation43_spill] sm:$0xff] %v3236_v52  ;;  %v799_v1 = vrot.slane %v3241_v49, 1  ;;  %v805_v20 = vrot.slane %v3236_v52, 1  ;;  %v3262_v25 = vsel %vm733_vm0, %v800_v54, %v802_v22  ;;  %v3264_v16 = vmax.f32 %v535_v62, 0.0 }
  0x52   : > { %5187 = vst [vmem:[#allocation44_spill] sm:$0xff] %v3241_v49  ;;  %v587_v55 = vmax.f32 %v533_v41, 0.0  ;;  %v3282_v41 = vsel %vm612_vm2, %v590_v26, 0.0 }
  0x53   : > { %5189 = vst [vmem:[#allocation46_spill] sm:$0xff] %v3262_v25  ;;  %v3267_v53 = vsel %vm733_vm0, %v799_v1, %v800_v54  ;;  %v810_v54 = vrot.slane %v3264_v16, 1  ;;  %v812_v62 = vrot.slane %v3282_v41, 1 }
  0x54   : > { %5190 = vst [vmem:[#allocation47_spill] sm:$0xff] %v3264_v16  ;;  %v3278_v11 = vsel %vm612_vm2, %v587_v55, 0.0  ;;  %v5197_v55 = vmov 0.0  }
  0x55   : > { %862 = vrot.lane.b32.xlu2 %v3221_v61, %s2737_s28  ;;  %5191 = vst [vmem:[#allocation48_spill] sm:$0xff] %v3267_v53  ;;  %v807_v22 = vrot.slane %v3278_v11, 1  ;;  %v3295_v1 = vsel %vm733_vm0, %v809_v51, %v810_v54  ;;  %v3301_v18 = vsel %vm733_vm0, %v810_v54, %v812_v62  ;;  %v3310_v26 = vrot.slane %v5197_v55, 2 }
  0x56   : > { %860 = vrot.lane.b32.xlu1 %v3231_v60, %s2737_s28  ;;  %864 = vrot.lane.b32.xlu0 %v3234_v0, %s2737_s28  ;;  %v3270_v0 = vsel %vm733_vm0, %v804_v38, %v805_v20  ;;  %5194 = vst [vmem:[#allocation51_spill] sm:$0xff] %v3295_v1  ;;  %v916_v51 = vrot.slane %v2874_v46, 2  ;;  %v919_v54 = vrot.slane %v2870_v45, 2  ;;  %v922_v45 = vrot.slane %v2851_v30, 2 }
  0x57   : > { %5192 = vst [vmem:[#allocation49_spill] sm:$0xff] %v3270_v0  ;;  %v3298_v38 = vsel %vm733_vm0, %v805_v20, %v807_v22  ;;  %v917_v20 = vrot.slane %v2853_v32, 2  ;;  %v2703_v22 = vpack.i.bf16 %v3310_v26, %v3310_v26  ;;  %v924_v55 = vrot.slane %v2860_v39, 2 }
  0x58   : > { %5195 = vst [vmem:[#allocation52_spill] sm:$0xff] %v3298_v38  ;;  %v931_v39 = vrot.slane %v2947_v35, 2 }
  0x59   : > { %5196 = vst [vmem:[#allocation53_spill] sm:$0xff] %v3301_v18  ;;  %v3318_v62 = vsel %vm910_vm3, %v916_v51, %v917_v20  ;;  %v926_v51 = vrot.slane %v2878_v47, 2 }
  0x5a   : > { %5198 = vst [vmem:[#allocation54_spill] sm:$0xff] %v3310_v26  ;;  %v921_v26 = vrot.slane %v2912_v4, 2 }
  0x5b   : > { %5199 = vst [vmem:[#allocation55_spill] sm:$0xff] %v3318_v62 }
  0x5d   : > { %868 = vrot.lane.b32.xlu2 %v3262_v25, %s2737_s28 }
  0x5e   : > { %866 = vrot.lane.b32.xlu1 %v3267_v53, %s2737_s28  ;;  %870 = vrot.lane.b32.xlu0 %v3270_v0, %s2737_s28 }
  0x65   : > { %874 = vrot.lane.b32.xlu2 %v3295_v1, %s2737_s28 }
  0x66   : > { %872 = vrot.lane.b32.xlu1 %v3298_v38, %s2737_s28  ;;  %876 = vrot.lane.b32.xlu0 %v3301_v18, %s2737_s28  ;;  %v3321_v38 = vsel %vm910_vm3, %v917_v20, %v919_v54  ;;  %v927_v20 = vrot.slane %v2864_v42, 2  ;;  %v3334_v54 = vsel %vm910_vm3, %v922_v45, %v924_v55  ;;  %v932_v55 = vrot.slane %v2922_v17, 2 }
  0x67   : > { %5200 = vst [vmem:[#allocation56_spill] sm:$0xff] %v3321_v38 }
  0x68   : > { %5201 = vst [vmem:[#allocation57_spill] sm:$0xff] %v3334_v54 }
  0x6d   : > { %995 = vrot.lane.b32.xlu2 %v3318_v62, %s2738_s10  ;;  %v3337_v62 = vsel %vm910_vm3, %v921_v26, %v922_v45  ;;  %v929_v26 = vrot.slane %v2933_v24, 2  ;;  %v934_v45 = vrot.slane %v2940_v29, 2  ;;  %v937_v24 = vrot.slane %v2942_v33, 2 }
  0x6e   : > { %2704 = vrot.lane.b32.xlu1 %v2703_v22, %s2738_s10  ;;  %997 = vrot.lane.b32.xlu0 %v3321_v38, %s2738_s10  ;;  %5202 = vst [vmem:[#allocation58_spill] sm:$0xff] %v3337_v62  ;;  %v3340_v22 = vsel %vm910_vm3, %v926_v51, %v927_v20  ;;  %v3355_v51 = vsel %vm910_vm3, %v931_v39, %v932_v55  ;;  %v939_v29 = vrot.slane %v3008_v28, 2 }
  0x6f   : > { %5204 = vst [vmem:[#allocation60_spill] sm:$0xff] %v3355_v51 }
  0x75   : > { %1001 = vrot.lane.b32.xlu2 %v3334_v54, %s2738_s10  ;;  %v3358_v54 = vsel %vm910_vm3, %v927_v20, %v929_v26  ;;  %v936_v20 = vrot.slane %v2960_v43, 2  ;;  %v942_v26 = vrot.slane %v2979_v63, 2 }
  0x76   : > { %999 = vrot.lane.b32.xlu1 %v3337_v62, %s2738_s10  ;;  %1003 = vrot.lane.b32.xlu0 %v3340_v22, %s2738_s10  ;;  %v3361_v62 = vsel %vm910_vm3, %v932_v55, %v934_v45  ;;  %v941_v55 = vrot.slane %v2984_v8, 2  ;;  %v3377_v45 = vsel %vm910_vm3, %v937_v24, %v939_v29  ;;  %v946_v29 = vrot.slane %v3050_v15, 2 }
  0x77   : > { %v3350_v38 = vpop.permute.xlu2 %824  ;;  %5205 = vst [vmem:[#allocation61_spill] sm:$0xff] %v3361_v62 }
  0x78   : > { %5203 = vst [vmem:[#allocation59_spill] sm:$0xff] %v3350_v38  ;;  %v3380_v38 = vsel %vm910_vm3, %v936_v20, %v937_v24  ;;  %v944_v20 = vrot.slane %v3012_v31, 2  ;;  %v952_v31 = vrot.slane %v3035_v58, 2 }
  0x79   : > { %5207 = vst [vmem:[#allocation63_spill] sm:$0xff] %v3377_v45 }
  0x7a   : > { %5208 = vst [vmem:[#allocation64_spill] sm:$0xff] %v3380_v38 }
  0x7d   : > { %1007 = vrot.lane.b32.xlu2 %v3355_v51, %s2738_s10 }
  0x7e   : > { %1005 = vrot.lane.b32.xlu1 %v3358_v54, %s2738_s10  ;;  %1009 = vrot.lane.b32.xlu0 %v3361_v62, %s2738_s10  ;;  %v3383_v62 = vsel %vm910_vm3, %v941_v55, %v942_v26  ;;  %v949_v55 = vrot.slane %v3033_v57, 2  ;;  %v954_v57 = vrot.slane %v3097_v23, 2 }
  0x7f   : > { %v3371_v39 = vpop.permute.xlu2 %826  ;;  %5209 = vst [vmem:[#allocation65_spill] sm:$0xff] %v3383_v62 }
  0x80   : > { %5206 = vst [vmem:[#allocation62_spill] sm:$0xff] %v3371_v39  ;;  %v947_v39 = vrot.slane %v3029_v56, 2 }
  0x83   : > { %v3391_v28 = vpop.permute.xlu0 %2699 }
  0x84   : > { %5210 = vst [vmem:[#allocation66_spill] sm:$0xff] %v3391_v28  ;;  %v3426_v28 = vsel %vm910_vm3, %v952_v31, %v954_v57  ;;  %v962_v57 = vrot.slane %v3127_v12, 2 }
  0x85   : > { %1013 = vrot.lane.b32.xlu2 %v3377_v45, %s2738_s10  ;;  %v3400_v45 = vsel %vm910_vm3, %v946_v29, %v947_v39  ;;  %5216 = vst [vmem:[#allocation72_spill] sm:$0xff] %v3426_v28 }
  0x86   : > { %1011 = vrot.lane.b32.xlu1 %v3380_v38, %s2738_s10  ;;  %1015 = vrot.lane.b32.xlu0 %v3383_v62, %s2738_s10  ;;  %v3403_v38 = vsel %vm910_vm3, %v942_v26, %v944_v20  ;;  %v3406_v62 = vsel %vm910_vm3, %v947_v39, %v949_v55  ;;  %v951_v26 = vrot.slane %v3054_v19, 2  ;;  %v956_v39 = vrot.slane %v3092_v21, 2 }
  0x87   : > { %v3395_v24 = vpop.permute.xlu2 %832  ;;  %5212 = vst [vmem:[#allocation68_spill] sm:$0xff] %v3406_v62  ;;  %v957_v20 = vrot.slane %v3080_v9, 2 }
  0x88   : > { %5211 = vst [vmem:[#allocation67_spill] sm:$0xff] %v3395_v24 }
  0x89   : > { %v3432_v23 = vsel %vm910_vm3, %v956_v39, %v957_v20 }
  0x8a   : > { %5218 = vst [vmem:[#allocation74_spill] sm:$0xff] %v3432_v23 }
  0x8d   : > { %1019 = vrot.lane.b32.xlu2 %v3400_v45, %s2738_s10 }
  0x8e   : > { %1017 = vrot.lane.b32.xlu1 %v3403_v38, %s2738_s10  ;;  %1021 = vrot.lane.b32.xlu0 %v3406_v62, %s2738_s10  ;;  %v3429_v62 = vsel %vm910_vm3, %v951_v26, %v952_v31  ;;  %v959_v31 = vrot.slane %v3101_v27, 2  ;;  %v964_v26 = vrot.slane %v3131_v10, 2  ;;  %v967_v10 = vrot.slane %v3140_v34, 2 }
  0x8f   : > { %v3416_v29 = vpop.permute.xlu2 %838  ;;  %5217 = vst [vmem:[#allocation73_spill] sm:$0xff] %v3429_v62  ;;  %v969_v27 = vrot.slane %v3193_v14, 2 }
  0x90   : > { %5213 = vst [vmem:[#allocation69_spill] sm:$0xff] %v3416_v29  ;;  %v3421_v55 = vpop.permute.xlu1 %820  ;;  %v3423_v24 = vpop.permute.xlu0 %818  ;;  %v961_v29 = vrot.slane %v3146_v40, 2 }
  0x91   : > { %5214 = vst [vmem:[#allocation70_spill] sm:$0xff] %v3421_v55 }
  0x92   : > { %5215 = vst [vmem:[#allocation71_spill] sm:$0xff] %v3423_v24 }
  0x95   : > { %1025 = vrot.lane.b32.xlu2 %v3426_v28, %s2738_s10  ;;  %v3451_v28 = vsel %vm910_vm3, %v961_v29, %v962_v57 }
  0x96   : > { %1023 = vrot.lane.b32.xlu1 %v3429_v62, %s2738_s10  ;;  %1027 = vrot.lane.b32.xlu0 %v3432_v23, %s2738_s10  ;;  %v3454_v62 = vsel %vm910_vm3, %v957_v20, %v959_v31  ;;  %v3457_v23 = vsel %vm910_vm3, %v962_v57, %v964_v26  ;;  %v966_v20 = vrot.slane %v3150_v48, 2  ;;  %v971_v57 = vrot.slane %v3188_v44, 2 }
  0x97   : > { %v3442_v55 = vpop.permute.xlu2 %844  ;;  %5222 = vst [vmem:[#allocation78_spill] sm:$0xff] %v3454_v62  ;;  %v972_v31 = vrot.slane %v3176_v37, 2 }
  0x98   : > { %5219 = vst [vmem:[#allocation75_spill] sm:$0xff] %v3442_v55  ;;  %v3446_v39 = vpop.permute.xlu1 %822  ;;  %v3448_v24 = vpop.permute.xlu0 %828  ;;  %v3480_v55 = vsel %vm910_vm3, %v966_v20, %v967_v10  ;;  %v979_v20 = vrot.slane %v3227_v36, 2  ;;  %v984_v36 = vrot.slane %v3278_v11, 2 }
  0x99   : > { %5220 = vst [vmem:[#allocation76_spill] sm:$0xff] %v3446_v39  ;;  %v3477_v39 = vsel %vm910_vm3, %v967_v10, %v969_v27  ;;  %v3483_v14 = vsel %vm910_vm3, %v971_v57, %v972_v31  ;;  %v977_v27 = vrot.slane %v3223_v59, 2  ;;  %v974_v10 = vrot.slane %v3197_v13, 2 }
  0x9a   : > { %5221 = vst [vmem:[#allocation77_spill] sm:$0xff] %v3448_v24  ;;  %v982_v13 = vrot.slane %v3236_v52, 2 }
  0x9b   : > { %5223 = vst [vmem:[#allocation79_spill] sm:$0xff] %v3457_v23 }
  0x9c   : > { %5227 = vst [vmem:[#allocation83_spill] sm:$0xff] %v3477_v39 }
  0x9d   : > { %1031 = vrot.lane.b32.xlu2 %v3451_v28, %s2738_s10  ;;  %5228 = vst [vmem:[#allocation84_spill] sm:$0xff] %v3480_v55 }
  0x9e   : > { %1029 = vrot.lane.b32.xlu1 %v3454_v62, %s2738_s10  ;;  %1033 = vrot.lane.b32.xlu0 %v3457_v23, %s2738_s10  ;;  %5229 = vst [vmem:[#allocation85_spill] sm:$0xff] %v3483_v14  ;;  %v3505_v23 = vsel %vm910_vm3, %v972_v31, %v974_v10  ;;  %v981_v31 = vrot.slane %v3245_v50, 2  ;;  %v987_v10 = vrot.slane %v3264_v16, 2 }
  0x9f   : > { %v3467_v29 = vpop.permute.xlu2 %850  ;;  %5234 = vst [vmem:[#allocation90_spill] sm:$0xff] %v3505_v23 }
  0xa0   : > { %5224 = vst [vmem:[#allocation80_spill] sm:$0xff] %v3467_v29  ;;  %v3472_v26 = vpop.permute.xlu1 %830  ;;  %v3474_v24 = vpop.permute.xlu0 %834 }
  0xa1   : > { %5225 = vst [vmem:[#allocation81_spill] sm:$0xff] %v3472_v26 }
  0xa2   : > { %5226 = vst [vmem:[#allocation82_spill] sm:$0xff] %v3474_v24  ;;  %v976_v24 = vrot.slane %v3241_v49, 2 }
  0xa5   : > { %1037 = vrot.lane.b32.xlu2 %v3477_v39, %s2738_s10  ;;  %v3502_v39 = vsel %vm910_vm3, %v976_v24, %v977_v27 }
  0xa6   : > { %1035 = vrot.lane.b32.xlu1 %v3480_v55, %s2738_s10  ;;  %1039 = vrot.lane.b32.xlu0 %v3483_v14, %s2738_s10  ;;  %5233 = vst [vmem:[#allocation89_spill] sm:$0xff] %v3502_v39  ;;  %v3508_v14 = vsel %vm910_vm3, %v977_v27, %v979_v20  ;;  %v986_v27 = vrot.slane %v3274_v2, 2 }
  0xa7   : > { %v3493_v26 = vpop.permute.xlu2 %856  ;;  %5235 = vst [vmem:[#allocation91_spill] sm:$0xff] %v3508_v14 }
  0xa8   : > { %5230 = vst [vmem:[#allocation86_spill] sm:$0xff] %v3493_v26  ;;  %v3497_v57 = vpop.permute.xlu1 %836  ;;  %v3499_v29 = vpop.permute.xlu0 %840  ;;  %v3528_v26 = vsel %vm910_vm3, %v982_v13, %v984_v36  ;;  %v3534_v11 = vsel %vm910_vm3, %v986_v27, %v987_v10  ;;  %v989_v36 = vrot.slane %v3282_v41, 2 }
  0xa9   : > { %5231 = vst [vmem:[#allocation87_spill] sm:$0xff] %v3497_v57 }
  0xaa   : > { %5232 = vst [vmem:[#allocation88_spill] sm:$0xff] %v3499_v29  ;;  %v3531_v29 = vsel %vm910_vm3, %v981_v31, %v982_v13  ;;  %v3550_v31 = vsel %vm910_vm3, %v987_v10, %v989_v36 }
  0xab   : > { %5238 = vst [vmem:[#allocation94_spill] sm:$0xff] %v3528_v26 }
  0xac   : > { %5241 = vst [vmem:[#allocation97_spill] sm:$0xff] %v3550_v31 }
  0xad   : > { %1043 = vrot.lane.b32.xlu2 %v3502_v39, %s2738_s10 }
  0xae   : > { %1041 = vrot.lane.b32.xlu1 %v3505_v23, %s2738_s10  ;;  %1045 = vrot.lane.b32.xlu0 %v3508_v14, %s2738_s10 }
  0xaf   : > { %v3518_v24 = vpop.permute.xlu2 %862 }
  0xb0   : > { %5236 = vst [vmem:[#allocation92_spill] sm:$0xff] %v3518_v24  ;;  %v3523_v20 = vpop.permute.xlu1 %842  ;;  %v3525_v57 = vpop.permute.xlu0 %846 }
  0xb1   : > { %5237 = vst [vmem:[#allocation93_spill] sm:$0xff] %v3525_v57 }
  0xb5   : > { %1049 = vrot.lane.b32.xlu2 %v3528_v26, %s2738_s10 }
  0xb6   : > { %1047 = vrot.lane.b32.xlu1 %v3531_v29, %s2738_s10  ;;  %1051 = vrot.lane.b32.xlu0 %v3534_v11, %s2738_s10 }
  0xb7   : > { %v3542_v24 = vpop.permute.xlu2 %868 }
  0xb8   : > { %5239 = vst [vmem:[#allocation95_spill] sm:$0xff] %v3542_v24  ;;  %v3545_v57 = vpop.permute.xlu1 %848  ;;  %v3547_v13 = vpop.permute.xlu0 %852 }
  0xb9   : > { %5240 = vst [vmem:[#allocation96_spill] sm:$0xff] %v3547_v13  ;;  %v421_v13 = vld [vmem:[%s2820_s7 + $0x180] sm:$0xff] }
  0xbd   : > { %1089 = vrot.lane.b32.xlu2 %v2874_v46, %s2739_s11 }
  0xbe   : > { %1053 = vrot.lane.b32.xlu1 %v3550_v31, %s2738_s10  ;;  %1091 = vrot.lane.b32.xlu0 %v2853_v32, %s2739_s11 }
  0xbf   : > { %v3558_v27 = vpop.permute.xlu2 %874 }
  0xc0   : > { %5242 = vst [vmem:[#allocation98_spill] sm:$0xff] %v3558_v27  ;;  %v3560_v41 = vpop.permute.xlu1 %854  ;;  %v3562_v24 = vpop.permute.xlu0 %858 }
  0xc1   : > { %5243 = vst [vmem:[#allocation99_spill] sm:$0xff] %v3562_v24 }
  0xc5   : > { %1095 = vrot.lane.b32.xlu2 %v2851_v30, %s2739_s11 }
  0xc6   : > { %1093 = vrot.lane.b32.xlu1 %v2912_v4, %s2739_s11  ;;  %1097 = vrot.lane.b32.xlu0 %v2878_v47, %s2739_s11 }
  0xc7   : > { %v3570_v10 = vpop.permute.xlu2 %995 }
  0xc8   : > { %5244 = vst [vmem:[#allocation100_spill] sm:$0xff] %v3570_v10  ;;  %v3572_v36 = vpop.permute.xlu1 %860  ;;  %v3574_v32 = vpop.permute.xlu0 %864 }
  0xc9   : > { %5245 = vst [vmem:[#allocation101_spill] sm:$0xff] %v3574_v32 }
  0xcd   : > { %1101 = vrot.lane.b32.xlu2 %v2947_v35, %s2739_s11 }
  0xce   : > { %1099 = vrot.lane.b32.xlu1 %v2864_v42, %s2739_s11  ;;  %1103 = vrot.lane.b32.xlu0 %v2922_v17, %s2739_s11 }
  0xcf   : > { %v3582_v46 = vpop.permute.xlu2 %1001 }
  0xd0   : > { %5246 = vst [vmem:[#allocation102_spill] sm:$0xff] %v3582_v46  ;;  %v3584_v27 = vpop.permute.xlu1 %866  ;;  %v3586_v24 = vpop.permute.xlu0 %870 }
  0xd1   : > { %5247 = vst [vmem:[#allocation103_spill] sm:$0xff] %v3584_v27 }
  0xd2   : > { %5248 = vst [vmem:[#allocation104_spill] sm:$0xff] %v3586_v24 }
  0xd5   : > { %1107 = vrot.lane.b32.xlu2 %v2942_v33, %s2739_s11 }
  0xd6   : > { %1105 = vrot.lane.b32.xlu1 %v2960_v43, %s2739_s11  ;;  %1109 = vrot.lane.b32.xlu0 %v2984_v8, %s2739_s11 }
  0xd7   : > { %v3594_v10 = vpop.permute.xlu2 %1007 }
  0xd8   : > { %5249 = vst [vmem:[#allocation105_spill] sm:$0xff] %v3594_v10  ;;  %v3596_v32 = vpop.permute.xlu1 %872  ;;  %v3598_v17 = vpop.permute.xlu0 %876 }
  0xd9   : > { %5250 = vst [vmem:[#allocation106_spill] sm:$0xff] %v3596_v32  ;;  %v3667_v32 = vld [vmem:[%s5002_s2] ss:$0 sm:$0xff] }
  0xda   : > { %5251 = vst [vmem:[#allocation107_spill] sm:$0xff] %v3598_v17 }
  0xdd   : > { %1113 = vrot.lane.b32.xlu2 %v3050_v15, %s2739_s11 }
  0xde   : > { %1111 = vrot.lane.b32.xlu1 %v2979_v63, %s2739_s11  ;;  %1115 = vrot.lane.b32.xlu0 %v3029_v56, %s2739_s11 }
  0xdf   : > { %v3606_v46 = vpop.permute.xlu2 %1013 }
  0xe0   : > { %5252 = vst [vmem:[#allocation108_spill] sm:$0xff] %v3606_v46  ;;  %v3608_v33 = vpop.permute.xlu1 %2704  ;;  %v3610_v43 = vpop.permute.xlu0 %997 }
  0xe1   : > { %5253 = vst [vmem:[#allocation109_spill] sm:$0xff] %v3608_v33 }
  0xe2   : > { %5254 = vst [vmem:[#allocation110_spill] sm:$0xff] %v3610_v43 }
  0xe5   : > { %1119 = vrot.lane.b32.xlu2 %v3035_v58, %s2739_s11 }
  0xe6   : > { %1117 = vrot.lane.b32.xlu1 %v3054_v19, %s2739_s11  ;;  %1121 = vrot.lane.b32.xlu0 %v3092_v21, %s2739_s11 }
  0xe7   : > { %v3618_v10 = vpop.permute.xlu2 %1019 }
  0xe8   : > { %v3620_v17 = vpop.permute.xlu1 %999  ;;  %v3622_v24 = vpop.permute.xlu0 %1003 }
  0xe9   : > { %5255 = vst [vmem:[#allocation111_spill] sm:$0xff] %v3620_v17 }
  0xea   : > { %5256 = vst [vmem:[#allocation112_spill] sm:$0xff] %v3622_v24 }
  0xed   : > { %1125 = vrot.lane.b32.xlu2 %v3146_v40, %s2739_s11 }
  0xee   : > { %1123 = vrot.lane.b32.xlu1 %v3080_v9, %s2739_s11  ;;  %1127 = vrot.lane.b32.xlu0 %v3127_v12, %s2739_s11 }
  0xef   : > { %v3630_v46 = vpop.permute.xlu2 %1025 }
  0xf0   : > { %v3632_v43 = vpop.permute.xlu1 %1005  ;;  %v3634_v33 = vpop.permute.xlu0 %1009 }
  0xf1   : > { %5257 = vst [vmem:[#allocation113_spill] sm:$0xff] %v3632_v43  ;;  %v479_v43 = vmul.f32 %v2811_v5, %v421_v13 }
  0xf2   : > { %5258 = vst [vmem:[#allocation114_spill] sm:$0xff] %v3634_v33 }
  0xf5   : > { %1131 = vrot.lane.b32.xlu2 %v3140_v34, %s2739_s11 }
  0xf6   : > { %1129 = vrot.lane.b32.xlu1 %v3150_v48, %s2739_s11  ;;  %1133 = vrot.lane.b32.xlu0 %v3188_v44, %s2739_s11  ;;  %v422_v48 = vld [vmem:[%s2820_s7 + $0x188] sm:$0xff] }
  0xf7   : > { %v3642_v24 = vpop.permute.xlu2 %1031 }
  0xf8   : > { %v3644_v17 = vpop.permute.xlu1 %1011  ;;  %v3646_v9 = vpop.permute.xlu0 %1015 }
  0xf9   : > { %5259 = vst [vmem:[#allocation115_spill] sm:$0xff] %v3644_v17 }
  0xfa   : > { %5260 = vst [vmem:[#allocation116_spill] sm:$0xff] %v3646_v9  ;;  %v537_v9 = vadd.f32 %v2825_v7, %v479_v43  ;;  %v3679_v7 = vld [vmem:[%s5003_s3] ss:$0 sm:$0xff] }
  0xfc   : > { %v591_v5 = vmax.f32 %v537_v9, 0.0 }
  0xfd   : > { %1137 = vrot.lane.b32.xlu2 %v3241_v49, %s2739_s11 }
  0xfe   : > { %1135 = vrot.lane.b32.xlu1 %v3176_v37, %s2739_s11  ;;  %1139 = vrot.lane.b32.xlu0 %v3223_v59, %s2739_s11  ;;  %v480_v37 = vmul.f32 %v3667_v32, %v422_v48 }
  0xff   : > { %v3656_v33 = vpop.permute.xlu2 %1037 }
 0x100   : > { %v3659_v44 = vpop.permute.xlu1 %1017  ;;  %v3661_v17 = vpop.permute.xlu0 %1021  ;;  %v538_v43 = vadd.f32 %v3679_v7, %v480_v37 }
 0x101   : > { %5261 = vst [vmem:[#allocation117_spill] sm:$0xff] %v3661_v17 }
 0x105   : > { %1143 = vrot.lane.b32.xlu2 %v3236_v52, %s2739_s11  ;;  %v3692_v52 = vmax.f32 %v538_v43, 0.0  ;;  %v5272_v43 = vld [vmem:[#allocation12_spill] sm:$0xff] }
 0x106   : > { %1141 = vrot.lane.b32.xlu1 %v3245_v50, %s2739_s11  ;;  %1145 = vrot.lane.b32.xlu0 %v3274_v2, %s2739_s11  ;;  %v3690_v50 = vsel %vm601_vm1, %v591_v5, 0.0  ;;  %v5271_v5 = vld [vmem:[#allocation9_spill] sm:$0xff] }
 0x107   : > { %v3682_v13 = vpop.permute.xlu2 %1043  ;;  %5265 = vst [vmem:[#allocation121_spill] sm:$0xff] %v3690_v50 }
 0x108   : > { %5262 = vst [vmem:[#allocation118_spill] sm:$0xff] %v3682_v13  ;;  %v3684_v48 = vpop.permute.xlu1 %1023  ;;  %v3686_v59 = vpop.permute.xlu0 %1027 }
 0x109   : > { %5263 = vst [vmem:[#allocation119_spill] sm:$0xff] %v3684_v48 }
 0x10a   : > { %5264 = vst [vmem:[#allocation120_spill] sm:$0xff] %v3686_v59 }
 0x10b   : > { %5266 = vst [vmem:[#allocation122_spill] sm:$0xff] %v3692_v52 }
 0x10d   : > { %1149 = vrot.lane.b32.xlu2 %v3690_v50, %s2739_s11 }
 0x10e   : > { %1147 = vrot.lane.b32.xlu1 %v3264_v16, %s2739_s11  ;;  %1151 = vrot.lane.b32.xlu0 %v3692_v52, %s2739_s11 }
 0x10f   : > { %v3700_v9 = vpop.permute.xlu2 %1049 }
 0x110   : > { %5267 = vst [vmem:[#allocation123_spill] sm:$0xff] %v3700_v9  ;;  %v3702_v37 = vpop.permute.xlu1 %1029  ;;  %v3704_v2 = vpop.permute.xlu0 %1033 }
 0x111   : > { %5268 = vst [vmem:[#allocation124_spill] sm:$0xff] %v3702_v37  ;;  %v5276_v37 = vld [vmem:[#allocation10_spill] sm:$0xff] }
 0x112   : > { %5269 = vst [vmem:[#allocation125_spill] sm:$0xff] %v3704_v2  ;;  %v5277_v2 = vld [vmem:[#allocation7_spill] sm:$0xff] }
 0x115   : > { %1193 = vrot.lane.b32.xlu2 %v5270_v3, %s2740_s16  ;;  %v5278_v3 = vld [vmem:[#allocation14_spill] sm:$0xff] }
 0x116   : > { %1191 = vrot.lane.b32.xlu1 %v5271_v5, %s2740_s16  ;;  %1195 = vrot.lane.b32.xlu0 %v5272_v43, %s2740_s16 }
 0x117   : > { %v3712_v16 = vpop.permute.xlu2 %1089 }
 0x118   : > { %5273 = vst [vmem:[#allocation8_spill] sm:$0xff] %v3712_v16  ;;  %v3714_v59 = vpop.permute.xlu1 %1035  ;;  %v3716_v48 = vpop.permute.xlu0 %1039  ;;  %v5282_v16 = vld [vmem:[#allocation16_spill] sm:$0xff] }
 0x119   : > { %5274 = vst [vmem:[#allocation9_spill] sm:$0xff] %v3714_v59  ;;  %v5284_v59 = vld [vmem:[#allocation19_spill] sm:$0xff] }
 0x11a   : > { %5275 = vst [vmem:[#allocation12_spill] sm:$0xff] %v3716_v48  ;;  %v5283_v48 = vld [vmem:[#allocation18_spill] sm:$0xff] }
 0x11d   : > { %1199 = vrot.lane.b32.xlu2 %v5276_v37, %s2740_s16 }
 0x11e   : > { %1197 = vrot.lane.b32.xlu1 %v5277_v2, %s2740_s16  ;;  %1201 = vrot.lane.b32.xlu0 %v5278_v3, %s2740_s16 }
 0x11f   : > { %v3724_v9 = vpop.permute.xlu2 %1095 }
 0x120   : > { %5279 = vst [vmem:[#allocation10_spill] sm:$0xff] %v3724_v9  ;;  %v3726_v5 = vpop.permute.xlu1 %1041  ;;  %v3728_v13 = vpop.permute.xlu0 %1045  ;;  %v5288_v9 = vld [vmem:[#allocation20_spill] sm:$0xff] }
 0x121   : > { %5280 = vst [vmem:[#allocation7_spill] sm:$0xff] %v3726_v5  ;;  %v5290_v5 = vld [vmem:[#allocation22_spill] sm:$0xff] }
 0x122   : > { %5281 = vst [vmem:[#allocation14_spill] sm:$0xff] %v3728_v13  ;;  %v5289_v13 = vld [vmem:[#allocation21_spill] sm:$0xff] }
 0x125   : > { %1205 = vrot.lane.b32.xlu2 %v5282_v16, %s2740_s16 }
 0x126   : > { %1203 = vrot.lane.b32.xlu1 %v5283_v48, %s2740_s16  ;;  %1207 = vrot.lane.b32.xlu0 %v5284_v59, %s2740_s16 }
 0x127   : > { %v3736_v19 = vpop.permute.xlu2 %1101 }
 0x128   : > { %5285 = vst [vmem:[#allocation126_spill] sm:$0xff] %v3736_v19  ;;  %v3738_v21 = vpop.permute.xlu1 %1047  ;;  %v3740_v49 = vpop.permute.xlu0 %1051  ;;  %v5294_v19 = vld [vmem:[#allocation24_spill] sm:$0xff] }
 0x129   : > { %5286 = vst [vmem:[#allocation127_spill] sm:$0xff] %v3738_v21  ;;  %v5296_v21 = vld [vmem:[#allocation27_spill] sm:$0xff] }
 0x12a   : > { %5287 = vst [vmem:[#allocation128_spill] sm:$0xff] %v3740_v49  ;;  %v5295_v49 = vld [vmem:[#allocation26_spill] sm:$0xff] }
 0x12d   : > { %1211 = vrot.lane.b32.xlu2 %v5288_v9, %s2740_s16 }
 0x12e   : > { %1209 = vrot.lane.b32.xlu1 %v5289_v13, %s2740_s16  ;;  %1213 = vrot.lane.b32.xlu0 %v5290_v5, %s2740_s16 }
 0x12f   : > { %v3748_v16 = vpop.permute.xlu2 %1107 }
 0x130   : > { %5291 = vst [vmem:[#allocation20_spill] sm:$0xff] %v3748_v16  ;;  %v3750_v27 = vpop.permute.xlu1 %1053  ;;  %v3752_v59 = vpop.permute.xlu0 %1091  ;;  %v5300_v16 = vld [vmem:[#allocation29_spill] sm:$0xff] }
 0x131   : > { %5292 = vst [vmem:[#allocation22_spill] sm:$0xff] %v3750_v27  ;;  %v5302_v27 = vld [vmem:[#allocation32_spill] sm:$0xff] }
 0x132   : > { %5293 = vst [vmem:[#allocation129_spill] sm:$0xff] %v3752_v59  ;;  %v5301_v59 = vld [vmem:[#allocation31_spill] sm:$0xff] }
 0x135   : > { %1217 = vrot.lane.b32.xlu2 %v5294_v19, %s2740_s16 }
 0x136   : > { %1215 = vrot.lane.b32.xlu1 %v5295_v49, %s2740_s16  ;;  %1219 = vrot.lane.b32.xlu0 %v5296_v21, %s2740_s16 }
 0x137   : > { %v3760_v13 = vpop.permute.xlu2 %1113 }
 0x138   : > { %5297 = vst [vmem:[#allocation26_spill] sm:$0xff] %v3760_v13  ;;  %v3762_v12 = vpop.permute.xlu1 %1093  ;;  %v3764_v48 = vpop.permute.xlu0 %1097  ;;  %v5306_v13 = vld [vmem:[#allocation34_spill] sm:$0xff] }
 0x139   : > { %5298 = vst [vmem:[#allocation130_spill] sm:$0xff] %v3762_v12 }
 0x13a   : > { %5299 = vst [vmem:[#allocation131_spill] sm:$0xff] %v3764_v48  ;;  %v5307_v48 = vld [vmem:[#allocation36_spill] sm:$0xff] }
 0x13d   : > { %1223 = vrot.lane.b32.xlu2 %v5300_v16, %s2740_s16  ;;  %v5308_v16 = vld [vmem:[#allocation37_spill] sm:$0xff] }
 0x13e   : > { %1221 = vrot.lane.b32.xlu1 %v5301_v59, %s2740_s16  ;;  %1225 = vrot.lane.b32.xlu0 %v5302_v27, %s2740_s16 }
 0x13f   : > { %v3772_v19 = vpop.permute.xlu2 %1119 }
 0x140   : > { %5303 = vst [vmem:[#allocation132_spill] sm:$0xff] %v3772_v19  ;;  %v3774_v17 = vpop.permute.xlu1 %1099  ;;  %v3776_v21 = vpop.permute.xlu0 %1103  ;;  %v423_v19 = vld [vmem:[%s2820_s7 + $0x190] sm:$0x3] }
 0x141   : > { %5304 = vst [vmem:[#allocation133_spill] sm:$0xff] %v3774_v17 }
 0x142   : > { %5305 = vst [vmem:[#allocation134_spill] sm:$0xff] %v3776_v21  ;;  %v5312_v21 = vld [vmem:[#allocation42_spill] sm:$0xff] }
 0x145   : > { %1229 = vrot.lane.b32.xlu2 %v5306_v13, %s2740_s16 }
 0x146   : > { %1227 = vrot.lane.b32.xlu1 %v5307_v48, %s2740_s16  ;;  %1231 = vrot.lane.b32.xlu0 %v5308_v16, %s2740_s16  ;;  %v481_v16 = vmul.f32 %v3667_v32, %v423_v19 }
 0x147   : > { %v3784_v12 = vpop.permute.xlu2 %1125 }
 0x148   : > { %5309 = vst [vmem:[#allocation36_spill] sm:$0xff] %v3784_v12  ;;  %v3786_v59 = vpop.permute.xlu1 %1105  ;;  %v3788_v27 = vpop.permute.xlu0 %1109 }
 0x149   : > { %5310 = vst [vmem:[#allocation135_spill] sm:$0xff] %v3786_v59 }
 0x14a   : > { %5311 = vst [vmem:[#allocation136_spill] sm:$0xff] %v3788_v27  ;;  %v539_v27 = vadd.f32 %v3679_v7, %v481_v16  ;;  %v5317_v16 = vld [vmem:[#allocation52_spill] sm:$0xff]  ;;  %v1187_v7 = vrot.slane %v3692_v52, 1 }
 0x14d   : > { %1235 = vrot.lane.b32.xlu2 %v3221_v61, %s2740_s16  ;;  %v593_v61 = vmax.f32 %v539_v27, 0.0 }
 0x14e   : > { %1233 = vrot.lane.b32.xlu1 %v3231_v60, %s2740_s16  ;;  %1237 = vrot.lane.b32.xlu0 %v5312_v21, %s2740_s16 }
 0x14f   : > { %v3797_v17 = vpop.permute.xlu2 %1131  ;;  %v3819_v19 = vsel %vm612_vm2, %v593_v61, 0.0 }
 0x150   : > { %5313 = vst [vmem:[#allocation137_spill] sm:$0xff] %v3797_v17  ;;  %v3800_v13 = vpop.permute.xlu1 %1111  ;;  %v3802_v12 = vpop.permute.xlu0 %1115  ;;  %v1189_v27 = vrot.slane %v3819_v19, 1 }
 0x151   : > { %5314 = vst [vmem:[#allocation138_spill] sm:$0xff] %v3800_v13 }
 0x152   : > { %v3837_v13 = vsel %vm733_vm0, %v1187_v7, %v1189_v27  ;;  %v5325_v27 = vld [vmem:[#allocation58_spill] sm:$0xff] }
 0x153   : > { %5320 = vst [vmem:[#allocation143_spill] sm:$0xff] %v3837_v13 }
 0x155   : > { %1241 = vrot.lane.b32.xlu2 %v3262_v25, %s2740_s16 }
 0x156   : > { %1239 = vrot.lane.b32.xlu1 %v3267_v53, %s2740_s16  ;;  %1243 = vrot.lane.b32.xlu0 %v3270_v0, %s2740_s16  ;;  %v1186_v53 = vrot.slane %v3690_v50, 1 }
 0x157   : > { %v3811_v21 = vpop.permute.xlu2 %1137 }
 0x158   : > { %5315 = vst [vmem:[#allocation139_spill] sm:$0xff] %v3811_v21  ;;  %v3813_v59 = vpop.permute.xlu1 %1117  ;;  %v3815_v32 = vpop.permute.xlu0 %1121 }
 0x159   : > { %5316 = vst [vmem:[#allocation140_spill] sm:$0xff] %v3815_v32 }
 0x15d   : > { %1247 = vrot.lane.b32.xlu2 %v3295_v1, %s2740_s16  ;;  %v3840_v1 = vsel %vm733_vm0, %v1186_v53, %v1187_v7  ;;  %v5326_v53 = vld [vmem:[#allocation56_spill] sm:$0xff]  ;;  %v5327_v7 = vld [vmem:[#allocation57_spill] sm:$0xff] }
 0x15e   : > { %1245 = vrot.lane.b32.xlu1 %v5317_v16, %s2740_s16  ;;  %1249 = vrot.lane.b32.xlu0 %v3301_v18, %s2740_s16  ;;  %5321 = vst [vmem:[#allocation144_spill] sm:$0xff] %v3840_v1  ;;  %v5322_v18 = vld [vmem:[#allocation55_spill] sm:$0xff] }
 0x15f   : > { %v3829_v25 = vpop.permute.xlu2 %1143 }
 0x160   : > { %5318 = vst [vmem:[#allocation141_spill] sm:$0xff] %v3829_v25  ;;  %v3832_v6 = vpop.permute.xlu1 %1123  ;;  %v3834_v61 = vpop.permute.xlu0 %1127 }
 0x161   : > { %5319 = vst [vmem:[#allocation142_spill] sm:$0xff] %v3834_v61 }
 0x165   : > { %1253 = vrot.lane.b32.xlu2 %v3837_v13, %s2740_s16 }
 0x166   : > { %1251 = vrot.lane.b32.xlu1 %v3840_v1, %s2740_s16  ;;  %1292 = vrot.lane.b32.xlu0 %v5322_v18, %s2741_s17 }
 0x167   : > { %v3848_v60 = vpop.permute.xlu2 %1149 }
 0x168   : > { %5323 = vst [vmem:[#allocation55_spill] sm:$0xff] %v3848_v60  ;;  %v3850_v16 = vpop.permute.xlu1 %1129  ;;  %v3852_v0 = vpop.permute.xlu0 %1133 }
 0x169   : > { %5324 = vst [vmem:[#allocation145_spill] sm:$0xff] %v3852_v0  ;;  %v5334_v0 = vld [vmem:[#allocation63_spill] sm:$0xff] }
 0x16d   : > { %1296 = vrot.lane.b32.xlu2 %v5325_v27, %s2741_s17 }
 0x16e   : > { %1294 = vrot.lane.b32.xlu1 %v5326_v53, %s2741_s17  ;;  %1298 = vrot.lane.b32.xlu0 %v5327_v7, %s2741_s17 }
 0x16f   : > { %v3860_v13 = vpop.permute.xlu2 %1193 }
 0x170   : > { %5328 = vst [vmem:[#allocation58_spill] sm:$0xff] %v3860_v13  ;;  %v3862_v1 = vpop.permute.xlu1 %1135  ;;  %v3864_v18 = vpop.permute.xlu0 %1139  ;;  %v5332_v13 = vld [vmem:[#allocation64_spill] sm:$0xff] }
 0x171   : > { %5329 = vst [vmem:[#allocation56_spill] sm:$0xff] %v3864_v18  ;;  %v5333_v18 = vld [vmem:[#allocation61_spill] sm:$0xff] }
 0x175   : > { %1302 = vrot.lane.b32.xlu2 %v3358_v54, %s2741_s17 }
 0x176   : > { %1300 = vrot.lane.b32.xlu1 %v3340_v22, %s2741_s17  ;;  %1304 = vrot.lane.b32.xlu0 %v3355_v51, %s2741_s17 }
 0x177   : > { %v3872_v60 = vpop.permute.xlu2 %1199 }
 0x178   : > { %5330 = vst [vmem:[#allocation57_spill] sm:$0xff] %v3872_v60  ;;  %v3874_v53 = vpop.permute.xlu1 %1141  ;;  %v3876_v25 = vpop.permute.xlu0 %1145  ;;  %v5338_v60 = vld [vmem:[#allocation65_spill] sm:$0xff] }
 0x179   : > { %5331 = vst [vmem:[#allocation146_spill] sm:$0xff] %v3876_v25 }
 0x17d   : > { %1308 = vrot.lane.b32.xlu2 %v5332_v13, %s2741_s17 }
 0x17e   : > { %1306 = vrot.lane.b32.xlu1 %v5333_v18, %s2741_s17  ;;  %1310 = vrot.lane.b32.xlu0 %v5334_v0, %s2741_s17  ;;  %v5344_v18 = vld [vmem:[#allocation72_spill] sm:$0xff] }
 0x17f   : > { %v3884_v21 = vpop.permute.xlu2 %1205 }
 0x180   : > { %5335 = vst [vmem:[#allocation147_spill] sm:$0xff] %v3884_v21  ;;  %v3886_v61 = vpop.permute.xlu1 %1147  ;;  %v3888_v17 = vpop.permute.xlu0 %1151  ;;  %v5342_v21 = vld [vmem:[#allocation73_spill] sm:$0xff] }
 0x181   : > { %5336 = vst [vmem:[#allocation148_spill] sm:$0xff] %v3886_v61 }
 0x182   : > { %5337 = vst [vmem:[#allocation149_spill] sm:$0xff] %v3888_v17  ;;  %v5343_v17 = vld [vmem:[#allocation68_spill] sm:$0xff] }
 0x185   : > { %1314 = vrot.lane.b32.xlu2 %v3403_v38, %s2741_s17 }
 0x186   : > { %1312 = vrot.lane.b32.xlu1 %v5338_v60, %s2741_s17  ;;  %1316 = vrot.lane.b32.xlu0 %v3400_v45, %s2741_s17 }
 0x187   : > { %v3896_v13 = vpop.permute.xlu2 %1211 }
 0x188   : > { %5339 = vst [vmem:[#allocation65_spill] sm:$0xff] %v3896_v13  ;;  %v3898_v25 = vpop.permute.xlu1 %1191  ;;  %v3900_v0 = vpop.permute.xlu0 %1195  ;;  %v5347_v13 = vld [vmem:[#allocation74_spill] sm:$0xff] }
 0x189   : > { %5340 = vst [vmem:[#allocation150_spill] sm:$0xff] %v3898_v25 }
 0x18a   : > { %5341 = vst [vmem:[#allocation151_spill] sm:$0xff] %v3900_v0 }
 0x18d   : > { %1320 = vrot.lane.b32.xlu2 %v5342_v21, %s2741_s17 }
 0x18e   : > { %1318 = vrot.lane.b32.xlu1 %v5343_v17, %s2741_s17  ;;  %1322 = vrot.lane.b32.xlu0 %v5344_v18, %s2741_s17 }
 0x18f   : > { %v3908_v61 = vpop.permute.xlu2 %1217 }
 0x190   : > { %v3910_v32 = vpop.permute.xlu1 %1197  ;;  %v3912_v51 = vpop.permute.xlu0 %1201 }
 0x191   : > { %5345 = vst [vmem:[#allocation68_spill] sm:$0xff] %v3910_v32 }
 0x192   : > { %5346 = vst [vmem:[#allocation152_spill] sm:$0xff] %v3912_v51  ;;  %v5350_v51 = vld [vmem:[#allocation79_spill] sm:$0xff] }
 0x195   : > { %1326 = vrot.lane.b32.xlu2 %v3454_v62, %s2741_s17  ;;  %v5351_v62 = vld [vmem:[#allocation83_spill] sm:$0xff] }
 0x196   : > { %1324 = vrot.lane.b32.xlu1 %v5347_v13, %s2741_s17  ;;  %1328 = vrot.lane.b32.xlu0 %v3451_v28, %s2741_s17 }
 0x197   : > { %v3920_v0 = vpop.permute.xlu2 %1223 }
 0x198   : > { %v3922_v21 = vpop.permute.xlu1 %1203  ;;  %v3924_v18 = vpop.permute.xlu0 %1207 }
 0x199   : > { %5348 = vst [vmem:[#allocation153_spill] sm:$0xff] %v3922_v21  ;;  %v5354_v21 = vld [vmem:[#allocation85_spill] sm:$0xff] }
 0x19a   : > { %5349 = vst [vmem:[#allocation154_spill] sm:$0xff] %v3924_v18 }
 0x19d   : > { %1332 = vrot.lane.b32.xlu2 %v3480_v55, %s2741_s17 }
 0x19e   : > { %1330 = vrot.lane.b32.xlu1 %v5350_v51, %s2741_s17  ;;  %1334 = vrot.lane.b32.xlu0 %v5351_v62, %s2741_s17 }
 0x19f   : > { %v3932_v32 = vpop.permute.xlu2 %1229 }
 0x1a0   : > { %v3934_v13 = vpop.permute.xlu1 %1209  ;;  %v3936_v25 = vpop.permute.xlu0 %1213 }
 0x1a1   : > { %5352 = vst [vmem:[#allocation79_spill] sm:$0xff] %v3934_v13 }
 0x1a2   : > { %5353 = vst [vmem:[#allocation155_spill] sm:$0xff] %v3936_v25  ;;  %v1287_v25 = vrot.slane %v3690_v50, 2 }
 0x1a5   : > { %1338 = vrot.lane.b32.xlu2 %v3505_v23, %s2741_s17 }
 0x1a6   : > { %1336 = vrot.lane.b32.xlu1 %v5354_v21, %s2741_s17  ;;  %1340 = vrot.lane.b32.xlu0 %v3502_v39, %s2741_s17  ;;  %v1288_v39 = vrot.slane %v3692_v52, 2  ;;  %v1290_v52 = vrot.slane %v3819_v19, 2 }
 0x1a7   : > { %v3944_v18 = vpop.permute.xlu2 %1235 }
 0x1a8   : > { %v3946_v55 = vpop.permute.xlu1 %1215  ;;  %v1220_v62 = vpop.permute.xlu0 %1219 }
 0x1a9   : > { %5355 = vst [vmem:[#allocation156_spill] sm:$0xff] %v3946_v55  ;;  %v3963_v55 = vsel %vm910_vm3, %v1287_v25, %v1288_v39  ;;  %v3979_v25 = vsel %vm910_vm3, %v1288_v39, %v1290_v52 }
 0x1aa   : > { %5356 = vst [vmem:[#allocation157_spill] sm:$0xff] %v3963_v55 }
 0x1ab   : > { %5357 = vst [vmem:[#allocation158_spill] sm:$0xff] %v3979_v25 }
 0x1ad   : > { %1344 = vrot.lane.b32.xlu2 %v3531_v29, %s2741_s17 }
 0x1ae   : > { %1342 = vrot.lane.b32.xlu1 %v3508_v14, %s2741_s17  ;;  %1346 = vrot.lane.b32.xlu0 %v3528_v26, %s2741_s17 }
 0x1af   : > { %v3955_v23 = vpop.permute.xlu2 %1241 }
 0x1b0   : > { %v3958_v21 = vpop.permute.xlu1 %1221  ;;  %v3960_v13 = vpop.permute.xlu0 %1225 }
 0x1b5   : > { %1350 = vrot.lane.b32.xlu2 %v3550_v31, %s2741_s17 }
 0x1b6   : > { %1348 = vrot.lane.b32.xlu1 %v3534_v11, %s2741_s17  ;;  %1352 = vrot.lane.b32.xlu0 %v3963_v55, %s2741_s17 }
 0x1b7   : > { %v3971_v14 = vpop.permute.xlu2 %1247 }
 0x1b8   : > { %v3974_v50 = vpop.permute.xlu1 %1227  ;;  %v3976_v26 = vpop.permute.xlu0 %1231 }
 0x1bd   : > { %1390 = vrot.lane.b32.xlu2 %v2912_v4, %s2742_s18 }
 0x1be   : > { %1354 = vrot.lane.b32.xlu1 %v3979_v25, %s2741_s17  ;;  %1492 = vrot.lane.b32.xlu0 %v5272_v43, %s2743_s19 }
 0x1bf   : > { %v3987_v55 = vpop.permute.xlu2 %1253 }
 0x1c0   : > { %v3989_v19 = vpop.permute.xlu1 %1233  ;;  %v3991_v31 = vpop.permute.xlu0 %1237 }
 0x1c5   : > { %1392 = vrot.lane.b32.xlu2 %v2851_v30, %s2742_s18 }
 0x1c6   : > { %1593 = vrot.lane.b32.xlu1 %v5325_v27, %s2744_s20  ;;  %1494 = vrot.lane.b32.xlu0 %v5277_v2, %s2743_s19 }
 0x1c7   : > { %v3999_v52 = vpop.permute.xlu2 %1296 }
 0x1c8   : > { %v4001_v39 = vpop.permute.xlu1 %1239  ;;  %v4003_v43 = vpop.permute.xlu0 %1243 }
 0x1cd   : > { %1394 = vrot.lane.b32.xlu2 %v2878_v47, %s2742_s18 }
 0x1ce   : > { %1595 = vrot.lane.b32.xlu1 %v5327_v7, %s2744_s20  ;;  %1406 = vrot.lane.b32.xlu0 %v2984_v8, %s2742_s18 }
 0x1cf   : > { %v4011_v25 = vpop.permute.xlu2 %1302 }
 0x1d0   : > { %5358 = vst [vmem:[#allocation159_spill] sm:$0xff] %v4011_v25  ;;  %v4013_v27 = vpop.permute.xlu1 %1245  ;;  %v4015_v2 = vpop.permute.xlu0 %1249  ;;  %v1704_v25 = vsel %vm1689_vm4, %v3050_v15, %v3523_v20 }
 0x1d5   : > { %1508 = vrot.lane.b32.xlu2 %v5288_v9, %s2743_s19 }
 0x1d6   : > { %1496 = vrot.lane.b32.xlu1 %v5276_v37, %s2743_s19  ;;  %1597 = vrot.lane.b32.xlu0 %v3340_v22, %s2744_s20 }
 0x1d7   : > { %v4023_v47 = vpop.permute.xlu2 %1308 }
 0x1d8   : > { %v4025_v7 = vpop.permute.xlu1 %1251  ;;  %v4027_v8 = vpop.permute.xlu0 %1292 }
 0x1dd   : > { %1396 = vrot.lane.b32.xlu2 %v2864_v42, %s2742_s18  ;;  %v1737_v42 = vsel %vm1722_vm5, %v1704_v25, %v3618_v10 }
 0x1de   : > { %1609 = vrot.lane.b32.xlu1 %v5338_v60, %s2744_s20  ;;  %1408 = vrot.lane.b32.xlu0 %v2979_v63, %s2742_s18  ;;  %v1770_v60 = vsel %vm1755_vm6, %v1737_v42, %v3813_v59  ;;  %v1707_v42 = vsel %vm1689_vm4, %v3035_v58, %v3545_v57 }
 0x1df   : > { %v4035_v9 = vpop.permute.xlu2 %1314  ;;  %v1803_v20 = vsel %vm1788_vm7, %v1770_v60, %v1220_v62  ;;  %v1740_v59 = vsel %vm1722_vm5, %v1707_v42, %v3630_v46 }
 0x1e0   : > { %5359 = vst [vmem:[#allocation160_spill] sm:$0xff] %v4035_v9  ;;  %v4037_v37 = vpop.permute.xlu1 %1294  ;;  %v4039_v22 = vpop.permute.xlu0 %1298  ;;  %v1773_v62 = vsel %vm1755_vm6, %v1740_v59, %v3832_v6 }
 0x1e5   : > { %1510 = vrot.lane.b32.xlu2 %v5290_v5, %s2743_s19 }
 0x1e6   : > { %1498 = vrot.lane.b32.xlu1 %v5278_v3, %s2743_s19  ;;  %1422 = vrot.lane.b32.xlu0 %v3146_v40, %s2742_s18  ;;  %v1806_v3 = vsel %vm1788_vm7, %v1773_v62, %v3960_v13  ;;  %v5362_v62 = vld [vmem:[#allocation117_spill] sm:$0xff] }
 0x1e7   : > { %v1321_v9 = vpop.permute.xlu2 %1320 }
 0x1e8   : > { %v4056_v10 = vsel %vm1821_vm8, %v1803_v20, %v1321_v9  ;;  %v4058_v25 = vpop.permute.xlu1 %1300  ;;  %v4060_v5 = vpop.permute.xlu0 %1304  ;;  %v5360_v20 = vld [vmem:[#allocation75_spill] sm:$0xff] }
 0x1ed   : > { %1611 = vrot.lane.b32.xlu2 %v3403_v38, %s2744_s20  ;;  %v1710_v38 = vsel %vm1689_vm4, %v3146_v40, %v3560_v41 }
 0x1ee   : > { %1599 = vrot.lane.b32.xlu1 %v3358_v54, %s2744_s20  ;;  %1524 = vrot.lane.b32.xlu0 %v5307_v48, %s2743_s19  ;;  %v1743_v54 = vsel %vm1722_vm5, %v1710_v38, %v3642_v24  ;;  %v5365_v38 = vld [vmem:[#allocation132_spill] sm:$0xff] }
 0x1ef   : > { %v1327_v9 = vpop.permute.xlu2 %1326  ;;  %v1776_v13 = vsel %vm1755_vm6, %v1743_v54, %v3850_v16  ;;  %v1713_v16 = vsel %vm1689_vm4, %v3140_v34, %v3572_v36 }
 0x1f0   : > { %v4078_v57 = vsel %vm1821_vm8, %v1806_v3, %v1327_v9  ;;  %v4080_v46 = vpop.permute.xlu1 %1306  ;;  %v4082_v60 = vpop.permute.xlu0 %1310  ;;  %v1809_v48 = vsel %vm1788_vm7, %v1776_v13, %v3976_v26  ;;  %v1746_v42 = vsel %vm1722_vm5, %v1713_v16, %v3656_v33  ;;  %v5363_v9 = vld [vmem:[#allocation18_spill] sm:$0xff] }
 0x1f1   : > { %v1779_v3 = vsel %vm1755_vm6, %v1746_v42, %v3862_v1 }
 0x1f5   : > { %1398 = vrot.lane.b32.xlu2 %v2947_v35, %s2742_s18 }
 0x1f6   : > { %1625 = vrot.lane.b32.xlu1 %v3451_v28, %s2744_s20  ;;  %1410 = vrot.lane.b32.xlu0 %v3050_v15, %s2742_s18  ;;  %v1705_v28 = vsel %vm1689_vm4, %v3029_v56, %v5360_v20  ;;  %v5361_v15 = vld [vmem:[#allocation88_spill] sm:$0xff] }
 0x1f7   : > { %v1333_v6 = vpop.permute.xlu2 %1332  ;;  %v1703_v26 = vsel %vm1689_vm4, %v2979_v63, %v5361_v15  ;;  %v1738_v36 = vsel %vm1722_vm5, %v1705_v28, %v5362_v62  ;;  %v5364_v63 = vld [vmem:[#allocation30_spill] sm:$0xff]  ;;  %v5367_v28 = vld [vmem:[#allocation103_spill] sm:$0xff] }
 0x1f8   : > { %v4100_v40 = vsel %vm1821_vm8, %v1809_v48, %v1333_v6  ;;  %v4102_v24 = vpop.permute.xlu1 %1312  ;;  %v4104_v41 = vpop.permute.xlu0 %1316  ;;  %v1736_v59 = vsel %vm1722_vm5, %v1703_v26, %v3659_v44  ;;  %v1771_v33 = vsel %vm1755_vm6, %v1738_v36, %v5365_v38  ;;  %v1812_v44 = vsel %vm1788_vm7, %v1779_v3, %v3991_v31  ;;  %v5368_v31 = vld [vmem:[#allocation44_spill] sm:$0xff]  ;;  %v5373_v36 = vld [vmem:[#allocation118_spill] sm:$0xff] }
 0x1f9   : > { %v1804_v1 = vsel %vm1788_vm7, %v1771_v33, %v3958_v21  ;;  %v1716_v15 = vsel %vm1689_vm4, %v5368_v31, %v5367_v28  ;;  %v5369_v26 = vld [vmem:[#allocation80_spill] sm:$0xff]  ;;  %v5371_v21 = vld [vmem:[#allocation93_spill] sm:$0xff] }
 0x1fa   : > { %v1749_v3 = vsel %vm1722_vm5, %v1716_v15, %v5373_v36  ;;  %v5375_v33 = vld [vmem:[#allocation120_spill] sm:$0xff]  ;;  %v1961_v36 = vld [vmem:[%s5001_s1 + $0x40] sm:$0xff] }
 0x1fb   : > { %2066 = vmatpush.msra.mxu0 %v1961_v36  ;;  %2637 = vmatpush.msra.mxu1 %v1961_v36 }
 0x1fc   : > { %2638 = vmatpush.msra.mxu2 %v1961_v36  ;;  %2639 = vmatpush.msra.mxu3 %v1961_v36  ;;  %v5390_v36 = vld [vmem:[#allocation137_spill] sm:$0xff] }
 0x1fd   : > { %1512 = vrot.lane.b32.xlu2 %v5295_v49, %s2743_s19  ;;  %v1769_v49 = vsel %vm1755_vm6, %v1736_v59, %v3802_v12  ;;  %v5372_v59 = vld [vmem:[#allocation23_spill] sm:$0xff] }
 0x1fe   : > { %1500 = vrot.lane.b32.xlu1 %v5363_v9, %s2743_s19  ;;  %1424 = vrot.lane.b32.xlu0 %v5364_v63, %s2742_s18  ;;  %v1802_v13 = vsel %vm1788_vm7, %v1769_v49, %v3908_v61  ;;  %v5370_v61 = vld [vmem:[#allocation28_spill] sm:$0xff]  ;;  %v1706_v62 = vsel %vm1689_vm4, %v5372_v59, %v5371_v21  ;;  %v5374_v9 = vld [vmem:[#allocation119_spill] sm:$0xff] }
 0x1ff   : > { %v1339_v54 = vpop.permute.xlu2 %1338  ;;  %v1708_v42 = vsel %vm1689_vm4, %v5370_v61, %v5369_v26  ;;  %v1739_v38 = vsel %vm1722_vm5, %v1706_v62, %v5374_v9  ;;  %v5380_v9 = vld [vmem:[#allocation106_spill] sm:$0xff] }
 0x200   : > { %v4140_v48 = vsel %vm1821_vm8, %v1812_v44, %v1339_v54  ;;  %v1319_v6 = vpop.permute.xlu1 %1318  ;;  %v1323_v16 = vpop.permute.xlu0 %1322  ;;  %v1741_v49 = vsel %vm1722_vm5, %v1708_v42, %v5375_v33  ;;  %v1782_v44 = vsel %vm1755_vm6, %v1749_v3, %v3874_v53  ;;  %v5376_v54 = vld [vmem:[#allocation60_spill] sm:$0xff] }
 0x201   : > { %5366 = vst [vmem:[#allocation75_spill] sm:$0xff] %v4140_v48  ;;  %v4143_v20 = vsel %vm1821_vm8, %v1802_v13, %v1319_v6  ;;  %v4146_v12 = vsel %vm1821_vm8, %v1804_v1, %v1323_v16  ;;  %v5377_v13 = vld [vmem:[#allocation34_spill] sm:$0xff]  ;;  %v5378_v1 = vld [vmem:[#allocation36_spill] sm:$0xff]  ;;  %v1815_v28 = vsel %vm1788_vm7, %v1782_v44, %v4003_v43 }
 0x202   : > { %v1774_v6 = vsel %vm1755_vm6, %v1741_v49, %v5378_v1  ;;  %v5379_v16 = vld [vmem:[#allocation140_spill] sm:$0xff]  ;;  %v5382_v49 = vld [vmem:[#allocation86_spill] sm:$0xff] }
 0x203   : > { %v1807_v53 = vsel %vm1788_vm7, %v1774_v6, %v3974_v50  ;;  %v1959_v50 = vld [vmem:[%s5001_s1 + $0x30] sm:$0xff]  ;;  %v1711_v44 = vsel %vm1689_vm4, %v5364_v63, %v5382_v49  ;;  %v5385_v6 = vld [vmem:[#allocation123_spill] sm:$0xff]  ;;  %v5432_v48 = vld [vmem:[#allocation150_spill] sm:$0xff] }
 0x205   : > { %1613 = vrot.lane.b32.xlu2 %v3400_v45, %s2744_s20  ;;  %v1772_v45 = vsel %vm1755_vm6, %v1739_v38, %v5379_v16  ;;  %v5381_v38 = vld [vmem:[#allocation43_spill] sm:$0xff] }
 0x206   : > { %1601 = vrot.lane.b32.xlu1 %v5376_v54, %s2744_s20  ;;  %1526 = vrot.lane.b32.xlu0 %v5377_v13, %s2743_s19  ;;  %v1805_v26 = vsel %vm1788_vm7, %v1772_v45, %v3920_v0  ;;  %v1960_v0 = vld [vmem:[%s5001_s1 + $0x38] sm:$0xff]  ;;  %v1719_v33 = vsel %vm1689_vm4, %v5381_v38, %v5380_v9  ;;  %v5383_v54 = vld [vmem:[#allocation96_spill] sm:$0xff]  ;;  %v5386_v45 = vld [vmem:[#allocation11_spill] sm:$0xff] }
 0x207   : > { %v1345_v15 = vpop.permute.xlu2 %1344  ;;  %2067 = vmatpush.msra.mxu0 %v1960_v0  ;;  %2640 = vmatpush.msra.mxu1 %v1960_v0  ;;  %v5384_v13 = vld [vmem:[#allocation25_spill] sm:$0xff]  ;;  %v1752_v16 = vsel %vm1722_vm5, %v1719_v33, %v5385_v6  ;;  %v5391_v9 = vld [vmem:[#allocation142_spill] sm:$0xff] }
 0x208   : > { %v4182_v42 = vsel %vm1821_vm8, %v1815_v28, %v1345_v15  ;;  %v1325_v21 = vpop.permute.xlu1 %1324  ;;  %v1329_v62 = vpop.permute.xlu0 %1328  ;;  %2641 = vmatpush.msra.mxu2 %v1960_v0  ;;  %2642 = vmatpush.msra.mxu3 %v1960_v0  ;;  %v1709_v1 = vsel %vm1689_vm4, %v5384_v13, %v5383_v54  ;;  %v5387_v28 = vld [vmem:[#allocation124_spill] sm:$0xff] }
 0x209   : > { %v4188_v3 = vsel %vm1821_vm8, %v1805_v26, %v1325_v21  ;;  %v4191_v43 = vsel %vm1821_vm8, %v1807_v53, %v1329_v62  ;;  %2068 = vmatpush.msra.mxu0 %v1959_v50  ;;  %v1742_v15 = vsel %vm1722_vm5, %v1709_v1, %v5387_v28  ;;  %v5388_v26 = vld [vmem:[#allocation125_spill] sm:$0xff]  ;;  %v5389_v21 = vld [vmem:[#allocation148_spill] sm:$0xff]  ;;  %v1958_v62 = vld [vmem:[%s5001_s1 + $0x28] sm:$0xff]  ;;  %2643 = vmatpush.msra.mxu1 %v1959_v50 }
 0x20a   : > { %v1744_v53 = vsel %vm1722_vm5, %v1711_v44, %v5388_v26  ;;  %v1785_v63 = vsel %vm1755_vm6, %v1752_v16, %v5389_v21  ;;  %v1775_v33 = vsel %vm1755_vm6, %v1742_v15, %v5391_v9  ;;  %v1957_v16 = vld [vmem:[%s5001_s1 + $0x20] sm:$0xff]  ;;  %2644 = vmatpush.msra.mxu2 %v1959_v50  ;;  %2645 = vmatpush.msra.mxu3 %v1959_v50  ;;  %v5393_v50 = vld [vmem:[#allocation92_spill] sm:$0xff]  ;;  %v5396_v21 = vld [vmem:[#allocation33_spill] sm:$0xff] }
 0x20b   : > { %v1777_v0 = vsel %vm1755_vm6, %v1744_v53, %v5390_v36  ;;  %v1818_v49 = vsel %vm1788_vm7, %v1785_v63, %v4015_v2  ;;  %2069 = vmatpush.msra.mxu0 %v1958_v62  ;;  %2646 = vmatpush.msra.mxu1 %v1958_v62  ;;  %v5394_v15 = vld [vmem:[#allocation38_spill] sm:$0xff]  ;;  %v5395_v53 = vld [vmem:[#allocation99_spill] sm:$0xff]  ;;  %v5397_v36 = vld [vmem:[#allocation24_spill] sm:$0xff] }
 0x20c   : > { %2647 = vmatpush.msra.mxu2 %v1958_v62  ;;  %2648 = vmatpush.msra.mxu3 %v1958_v62  ;;  %v1714_v26 = vsel %vm1689_vm4, %v5394_v15, %v5393_v50  ;;  %v1712_v63 = vsel %vm1689_vm4, %v5396_v21, %v5395_v53  ;;  %v5399_v62 = vld [vmem:[#allocation12_spill] sm:$0xff] }
 0x20d   : > { %1400 = vrot.lane.b32.xlu2 %v5386_v45, %s2742_s18  ;;  %2070 = vmatpush.msra.mxu0 %v1957_v16 }
 0x20e   : > { %1627 = vrot.lane.b32.xlu1 %v5350_v51, %s2744_s20  ;;  %1412 = vrot.lane.b32.xlu0 %v3029_v56, %s2742_s18  ;;  %v1808_v51 = vsel %vm1788_vm7, %v1775_v33, %v3932_v32  ;;  %v1810_v56 = vsel %vm1788_vm7, %v1777_v0, %v3989_v19  ;;  %v1956_v32 = vld [vmem:[%s5001_s1 + $0x18] sm:$0xff]  ;;  %v1955_v19 = vld [vmem:[%s5001_s1 + $0x10] sm:$0xff]  ;;  %v1747_v33 = vsel %vm1722_vm5, %v1714_v26, %v5399_v62 }
 0x20f   : > { %v1351_v44 = vpop.permute.xlu2 %1350  ;;  %2071 = vmatpush.msra.mxu0 %v1956_v32  ;;  %2649 = vmatpush.msra.mxu1 %v1957_v16  ;;  %v5398_v0 = vld [vmem:[#allocation9_spill] sm:$0xff] }
 0x210   : > { %v4236_v54 = vsel %vm1821_vm8, %v1818_v49, %v1351_v44  ;;  %v1331_v1 = vpop.permute.xlu1 %1330  ;;  %v1335_v6 = vpop.permute.xlu0 %1334  ;;  %2650 = vmatpush.msra.mxu2 %v1957_v16  ;;  %2651 = vmatpush.msra.mxu3 %v1957_v16  ;;  %v1745_v9 = vsel %vm1722_vm5, %v1712_v63, %v5398_v0  ;;  %v5400_v49 = vld [vmem:[#allocation16_spill] sm:$0xff]  ;;  %v1954_v44 = vld [vmem:[%s5001_s1 + $0x8] sm:$0xff]  ;;  %v1953_v63 = vld [vmem:[%s5001_s1] sm:$0xff] }
 0x211   : > { %5392 = vst [vmem:[#allocation88_spill] sm:$0xff] %v4236_v54  ;;  %v4242_v2 = vsel %vm1821_vm8, %v1808_v51, %v1331_v1  ;;  %v4245_v28 = vsel %vm1821_vm8, %v1810_v56, %v1335_v6  ;;  %2072 = vmatpush.msra.mxu0 %v1955_v19  ;;  %v5401_v51 = vld [vmem:[#allocation139_spill] sm:$0xff]  ;;  %v5402_v1 = vld [vmem:[#allocation145_spill] sm:$0xff]  ;;  %2652 = vmatpush.msra.mxu1 %v1956_v32 }
 0x212   : > { %v1780_v56 = vsel %vm1755_vm6, %v1747_v33, %v5401_v51  ;;  %v1778_v6 = vsel %vm1755_vm6, %v1745_v9, %v5402_v1  ;;  %2653 = vmatpush.msra.mxu2 %v1956_v32  ;;  %2654 = vmatpush.msra.mxu3 %v1956_v32  ;;  %v5405_v62 = vld [vmem:[#allocation101_spill] sm:$0xff]  ;;  %v5406_v33 = vld [vmem:[#allocation35_spill] sm:$0xff]  ;;  %v5409_v1 = vld [vmem:[#allocation14_spill] sm:$0xff] }
 0x213   : > { %2073 = vmatpush.msra.mxu0 %v1954_v44  ;;  %v1811_v50 = vsel %vm1788_vm7, %v1778_v6, %v3944_v18  ;;  %v1813_v26 = vsel %vm1788_vm7, %v1780_v56, %v4001_v39  ;;  %2655 = vmatpush.msra.mxu1 %v1955_v19  ;;  %v5403_v18 = vld [vmem:[#allocation95_spill] sm:$0xff]  ;;  %v5404_v39 = vld [vmem:[#allocation40_spill] sm:$0xff]  ;;  %v1715_v32 = vsel %vm1689_vm4, %v5406_v33, %v5405_v62  ;;  %v5411_v6 = vld [vmem:[#allocation141_spill] sm:$0xff] }
 0x214   : > { %2656 = vmatpush.msra.mxu2 %v1955_v19  ;;  %2657 = vmatpush.msra.mxu3 %v1955_v19  ;;  %v1717_v9 = vsel %vm1689_vm4, %v5404_v39, %v5403_v18  ;;  %v5408_v51 = vld [vmem:[#allocation7_spill] sm:$0xff] }
 0x215   : > { %1514 = vrot.lane.b32.xlu2 %v5397_v36, %s2743_s19  ;;  %2074 = vmatpush.msra.mxu0 %v1953_v63  ;;  %v1748_v56 = vsel %vm1722_vm5, %v1715_v32, %v5408_v51  ;;  %v1750_v19 = vsel %vm1722_vm5, %v1717_v9, %v5409_v1  ;;  %v5413_v51 = vld [vmem:[#allocation98_spill] sm:$0xff] }
 0x216   : > { %1502 = vrot.lane.b32.xlu1 %v5400_v49, %s2743_s19  ;;  %1426 = vrot.lane.b32.xlu0 %v5396_v21, %s2742_s18  ;;  %v5407_v49 = vld [vmem:[#allocation61_spill] sm:$0xff] }
 0x217   : > { %v4276_v16 = vpop.permute.xlu2 %1390  ;;  %2658 = vmatpush.msra.mxu1 %v1954_v44  ;;  %2659 = vmatpush.msra.mxu2 %v1954_v44 }
 0x218   : > { %v1337_v53 = vpop.permute.xlu1 %1336  ;;  %v1341_v21 = vpop.permute.xlu0 %1340  ;;  %2660 = vmatpush.msra.mxu3 %v1954_v44  ;;  %v5410_v44 = vld [vmem:[#allocation45_spill] sm:$0xff] }
 0x219   : > { %v4286_v36 = vsel %vm1821_vm8, %v1811_v50, %v1337_v53  ;;  %v4289_v0 = vsel %vm1821_vm8, %v1813_v26, %v1341_v21  ;;  %2661 = vmatpush.msra.mxu1 %v1953_v63  ;;  %v1783_v50 = vsel %vm1755_vm6, %v1750_v19, %v5411_v6  ;;  %v5412_v26 = vld [vmem:[#allocation56_spill] sm:$0xff]  ;;  %2662 = vmatpush.msra.mxu2 %v1953_v63 }
 0x21a   : > { %v1781_v53 = vsel %vm1755_vm6, %v1748_v56, %v5412_v26  ;;  %2663 = vmatpush.msra.mxu3 %v1953_v63  ;;  %v1816_v9 = vsel %vm1788_vm7, %v1783_v50, %v4013_v27  ;;  %v5414_v56 = vld [vmem:[#allocation50_spill] sm:$0xff]  ;;  %v5415_v19 = vld [vmem:[#allocation104_spill] sm:$0xff]  ;;  %v5417_v27 = vld [vmem:[#allocation127_spill] sm:$0xff] }
 0x21b   : > { %v1814_v18 = vsel %vm1788_vm7, %v1781_v53, %v3955_v23  ;;  %v1720_v1 = vsel %vm1689_vm4, %v5414_v56, %v5413_v51  ;;  %v1718_v63 = vsel %vm1689_vm4, %v5410_v44, %v5415_v19  ;;  %v5416_v23 = vld [vmem:[#allocation49_spill] sm:$0xff]  ;;  %v5418_v50 = vld [vmem:[#allocation128_spill] sm:$0xff] }
 0x21c   : > { %v1751_v6 = vsel %vm1722_vm5, %v1718_v63, %v5417_v27  ;;  %v1753_v26 = vsel %vm1722_vm5, %v1720_v1, %v5418_v50  ;;  %v5419_v53 = vld [vmem:[#allocation37_spill] sm:$0xff] }
 0x21d   : > { %1603 = vrot.lane.b32.xlu2 %v5407_v49, %s2744_s20 }
 0x21e   : > { %1438 = vrot.lane.b32.xlu1 %v5410_v44, %s2742_s18  ;;  %1615 = vrot.lane.b32.xlu0 %v5343_v17, %s2744_s20 }
 0x21f   : > { %v4311_v21 = vpop.permute.xlu2 %1392 }
 0x220   : > { %v1343_v62 = vpop.permute.xlu1 %1342  ;;  %v1347_v32 = vpop.permute.xlu0 %1346 }
 0x221   : > { %v4318_v17 = vsel %vm1821_vm8, %v1814_v18, %v1343_v62  ;;  %v4321_v49 = vsel %vm1821_vm8, %v1816_v9, %v1347_v32  ;;  %v5420_v18 = vld [vmem:[#allocation84_spill] sm:$0xff]  ;;  %v5421_v9 = vld [vmem:[#allocation55_spill] sm:$0xff]  ;;  %v5422_v32 = vld [vmem:[#allocation146_spill] sm:$0xff] }
 0x222   : > { %v1786_v62 = vsel %vm1755_vm6, %v1753_v26, %v5421_v9  ;;  %v1784_v44 = vsel %vm1755_vm6, %v1751_v6, %v5422_v32  ;;  %v5424_v26 = vld [vmem:[#allocation107_spill] sm:$0xff]  ;;  %v5427_v9 = vld [vmem:[#allocation66_spill] sm:$0xff] }
 0x223   : > { %v1817_v19 = vsel %vm1788_vm7, %v1784_v44, %v3971_v14  ;;  %v1819_v1 = vsel %vm1788_vm7, %v1786_v62, %v4025_v7  ;;  %v2701_v14 = vunpack.i.l.bf16 %v5427_v9  ;;  %v5428_v32 = vld [vmem:[#allocation22_spill] sm:$0xff]  ;;  %v5429_v62 = vld [vmem:[#allocation109_spill] sm:$0xff] }
 0x224   : > { %v2706_v44 = vunpack.i.l.bf16 %v5429_v62 }
 0x225   : > { %1540 = vrot.lane.b32.xlu2 %v5416_v23, %s2743_s19 }
 0x226   : > { %1528 = vrot.lane.b32.xlu1 %v5419_v53, %s2743_s19  ;;  %1629 = vrot.lane.b32.xlu0 %v5420_v18, %s2744_s20  ;;  %v5425_v53 = vld [vmem:[#allocation47_spill] sm:$0xff] }
 0x227   : > { %v4343_v51 = vpop.permute.xlu2 %1394  ;;  %v1721_v6 = vsel %vm1689_vm4, %v5425_v53, %v5424_v26  ;;  %v5426_v18 = vld [vmem:[#allocation15_spill] sm:$0xff] }
 0x228   : > { %v1349_v63 = vpop.permute.xlu1 %1348  ;;  %v1353_v23 = vpop.permute.xlu0 %1352  ;;  %v1754_v7 = vsel %vm1722_vm5, %v1721_v6, %v5428_v32 }
 0x229   : > { %v4350_v27 = vsel %vm1821_vm8, %v1817_v19, %v1349_v63  ;;  %v4353_v50 = vsel %vm1821_vm8, %v1819_v1, %v1353_v23  ;;  %v5430_v19 = vld [vmem:[#allocation149_spill] sm:$0xff] }
 0x22a   : > { %5423 = vst [vmem:[#allocation117_spill] sm:$0xff] %v4353_v50  ;;  %v1787_v1 = vsel %vm1755_vm6, %v1754_v7, %v5430_v19  ;;  %v5433_v19 = vld [vmem:[#allocation27_spill] sm:$0xff] }
 0x22b   : > { %v1820_v23 = vsel %vm1788_vm7, %v1787_v1, %v3987_v55  ;;  %v2702_v55 = vunpack.i.h.bf16 %v5427_v9 }
 0x22d   : > { %1402 = vrot.lane.b32.xlu2 %v5426_v18, %s2742_s18 }
 0x22e   : > { %1641 = vrot.lane.b32.xlu1 %v3531_v29, %s2744_s20  ;;  %1414 = vrot.lane.b32.xlu0 %v5372_v59, %s2742_s18  ;;  %v1690_v29 = vsel %vm1689_vm4, 0.0, %v2701_v14  ;;  %v5431_v59 = vld [vmem:[#allocation8_spill] sm:$0xff]  ;;  %v5434_v14 = vld [vmem:[#allocation19_spill] sm:$0xff] }
 0x22f   : > { %v4370_v63 = vpop.permute.xlu2 %1508  ;;  %v1723_v32 = vsel %vm1722_vm5, %v1690_v29, %v2706_v44  ;;  %v2707_v44 = vunpack.i.h.bf16 %v5429_v62  ;;  %v1691_v29 = vsel %vm1689_vm4, 0.0, %v2702_v55 }
 0x230   : > { %v1355_v26 = vpop.permute.xlu1 %1354  ;;  %v1493_v50 = vpop.permute.xlu0 %1492  ;;  %v1756_v54 = vsel %vm1755_vm6, %v1723_v32, %v5431_v59  ;;  %v5435_v32 = vld [vmem:[#allocation129_spill] sm:$0xff]  ;;  %v5436_v59 = vld [vmem:[#allocation58_spill] sm:$0xff] }
 0x231   : > { %v4375_v6 = vsel %vm1821_vm8, %v1820_v23, %v1355_v26  ;;  %v1789_v7 = vsel %vm1788_vm7, %v1756_v54, %v5432_v48 }
 0x232   : > { %v1822_v1 = vsel %vm1821_vm8, %v1789_v7, %v4027_v8  ;;  %v5437_v7 = vld [vmem:[#allocation64_spill] sm:$0xff] }
 0x233   : > { %v1855_v48 = vsel %vm1854_vm9, %v1822_v1, %v4276_v16 }
 0x234   : > { %v1888_v9 = vsel %vm1887_vm10, %v1855_v48, %v1493_v50 }
 0x235   : > { %1516 = vrot.lane.b32.xlu2 %v5433_v19, %s2743_s19  ;;  %v5438_v19 = vld [vmem:[#allocation73_spill] sm:$0xff] }
 0x236   : > { %1504 = vrot.lane.b32.xlu1 %v5434_v14, %s2743_s19  ;;  %1428 = vrot.lane.b32.xlu0 %v3140_v34, %s2742_s18  ;;  %v1724_v34 = vsel %vm1722_vm5, %v1691_v29, %v2707_v44 }
 0x237   : > { %v4395_v54 = vpop.permute.xlu2 %1396  ;;  %v1757_v62 = vsel %vm1755_vm6, %v1724_v34, %v5435_v32  ;;  %v5442_v34 = vld [vmem:[#allocation130_spill] sm:$0xff] }
 0x238   : > { %v1594_v23 = vpop.permute.xlu1 %1593  ;;  %v1495_v26 = vpop.permute.xlu0 %1494  ;;  %v1790_v16 = vsel %vm1788_vm7, %v1757_v62, %v5436_v59  ;;  %v5445_v59 = vld [vmem:[#allocation41_spill] sm:$0xff] }
 0x239   : > { %v1921_v8 = vsel %vm1920_vm11, %v1888_v9, %v1594_v23  ;;  %v1823_v50 = vsel %vm1821_vm8, %v1790_v16, %v4037_v37  ;;  %v5439_v23 = vld [vmem:[#allocation71_spill] sm:$0xff]  ;;  %v5440_v37 = vld [vmem:[#allocation5_spill] sm:$0xff] }
 0x23a   : > { %2602 = vmatmul.msk.f32.vlgmr.msra.gmra.mxu0 %vm1962_vm12, %v1921_v8  ;;  %v1856_v55 = vsel %vm1854_vm9, %v1823_v50, %v4311_v21  ;;  %v1692_v8 = vsel %vm1689_vm4, %v5440_v37, %v5439_v23  ;;  %v5443_v21 = vld [vmem:[#allocation52_spill] sm:$0xff]  ;;  %v5446_v16 = vld [vmem:[#allocation83_spill] sm:$0xff]  ;;  %v5448_v23 = vld [vmem:[#allocation105_spill] sm:$0xff] }
 0x23b   : > { %v1889_v14 = vsel %vm1887_vm10, %v1856_v55, %v1495_v26  ;;  %v5444_v26 = vld [vmem:[#allocation151_spill] sm:$0xff] }
 0x23d   : > { %1605 = vrot.lane.b32.xlu2 %v5437_v7, %s2744_s20 }
 0x23e   : > { %1440 = vrot.lane.b32.xlu1 %v5381_v38, %s2742_s18  ;;  %1617 = vrot.lane.b32.xlu0 %v5438_v19, %s2744_s20  ;;  %v5441_v38 = vld [vmem:[#allocation100_spill] sm:$0xff]  ;;  %v5447_v19 = vld [vmem:[#allocation81_spill] sm:$0xff] }
 0x23f   : > { %v1511_v1 = vpop.permute.xlu2 %1510  ;;  %v1725_v29 = vsel %vm1722_vm5, %v1692_v8, %v5441_v38  ;;  %v1698_v55 = vsel %vm1689_vm4, %v2947_v35, %v5447_v19  ;;  %v5449_v38 = vld [vmem:[#allocation135_spill] sm:$0xff] }
 0x240   : > { %v1596_v44 = vpop.permute.xlu1 %1595  ;;  %v1407_v48 = vpop.permute.xlu0 %1406  ;;  %v1758_v32 = vsel %vm1755_vm6, %v1725_v29, %v5442_v34  ;;  %v1731_v37 = vsel %vm1722_vm5, %v1698_v55, %v5448_v23  ;;  %v5450_v34 = vld [vmem:[#allocation154_spill] sm:$0xff] }
 0x241   : > { %v1922_v9 = vsel %vm1920_vm11, %v1889_v14, %v1596_v44  ;;  %v1791_v62 = vsel %vm1788_vm7, %v1758_v32, %v5444_v26  ;;  %v1764_v29 = vsel %vm1755_vm6, %v1731_v37, %v5449_v38  ;;  %v5452_v26 = vld [vmem:[#allocation67_spill] sm:$0xff]  ;;  %v5458_v38 = vld [vmem:[#allocation21_spill] sm:$0xff] }
 0x242   : > { %2603 = vmatmul.msk.f32.gmra.mxu0 %vm1962_vm12, %v1922_v9  ;;  %v1824_v7 = vsel %vm1821_vm8, %v1791_v62, %v3999_v52  ;;  %v1797_v32 = vsel %vm1788_vm7, %v1764_v29, %v5450_v34  ;;  %v1699_v62 = vsel %vm1689_vm4, %v5386_v45, %v5452_v26  ;;  %v5456_v45 = vld [vmem:[#allocation79_spill] sm:$0xff]  ;;  %v5461_v26 = vld [vmem:[#allocation110_spill] sm:$0xff] }
 0x243   : > { %v1857_v14 = vsel %vm1854_vm9, %v1824_v7, %v4343_v51  ;;  %v1830_v35 = vsel %vm1821_vm8, %v1797_v32, %v4023_v47  ;;  %v5455_v47 = vld [vmem:[#allocation20_spill] sm:$0xff]  ;;  %v5459_v32 = vld [vmem:[#allocation70_spill] sm:$0xff] }
 0x244   : > { %v1863_v51 = vsel %vm1854_vm9, %v1830_v35, %v1407_v48  ;;  %v5460_v35 = vld [vmem:[#allocation3_spill] sm:$0xff] }
 0x245   : > { %1542 = vrot.lane.b32.xlu2 %v5443_v21, %s2743_s19  ;;  %v5451_v21 = vld [vmem:[#allocation13_spill] sm:$0xff] }
 0x246   : > { %1530 = vrot.lane.b32.xlu1 %v5445_v59, %s2743_s19  ;;  %1631 = vrot.lane.b32.xlu0 %v5446_v16, %s2744_s20  ;;  %v5453_v59 = vld [vmem:[#allocation94_spill] sm:$0xff] }
 0x247   : > { %v1612_v50 = vpop.permute.xlu2 %1611  ;;  %v5454_v16 = vld [vmem:[#allocation114_spill] sm:$0xff] }
 0x248   : > { %v1497_v44 = vpop.permute.xlu1 %1496  ;;  %v1598_v9 = vpop.permute.xlu0 %1597  ;;  %v1732_v7 = vsel %vm1722_vm5, %v1699_v62, %v5454_v16 }
 0x249   : > { %v1890_v8 = vsel %vm1887_vm10, %v1857_v14, %v1497_v44  ;;  %v1765_v48 = vsel %vm1755_vm6, %v1732_v7, %v5455_v47  ;;  %v1896_v44 = vsel %vm1887_vm10, %v1863_v51, %v4370_v63  ;;  %v1693_v51 = vsel %vm1689_vm4, %v5460_v35, %v5459_v32  ;;  %v5464_v7 = vld [vmem:[#allocation63_spill] sm:$0xff]  ;;  %v5465_v47 = vld [vmem:[#allocation72_spill] sm:$0xff] }
 0x24a   : > { %v1923_v52 = vsel %vm1920_vm11, %v1890_v8, %v1598_v9  ;;  %v1798_v9 = vsel %vm1788_vm7, %v1765_v48, %v5456_v45  ;;  %v5457_v8 = vld [vmem:[#allocation31_spill] sm:$0xff]  ;;  %v1726_v62 = vsel %vm1722_vm5, %v1693_v51, %v5461_v26 }
 0x24b   : > { %2604 = vmatmul.msk.f32.gmra.mxu0 %vm1962_vm12, %v1923_v52 }
 0x24d   : > { %1404 = vrot.lane.b32.xlu2 %v5451_v21, %s2742_s18 }
 0x24e   : > { %1643 = vrot.lane.b32.xlu1 %v5453_v59, %s2744_s20  ;;  %1416 = vrot.lane.b32.xlu0 %v3035_v58, %s2742_s18  ;;  %v1831_v58 = vsel %vm1821_vm8, %v1798_v9, %v4082_v60  ;;  %v5462_v59 = vld [vmem:[#allocation10_spill] sm:$0xff] }
 0x24f   : > { %v4464_v19 = vpop.permute.xlu2 %1398  ;;  %v1759_v16 = vsel %vm1755_vm6, %v1726_v62, %v5462_v59 }
 0x250   : > { %v1610_v55 = vpop.permute.xlu1 %1609  ;;  %v1409_v14 = vpop.permute.xlu0 %1408 }
 0x251   : > { %v1929_v23 = vsel %vm1920_vm11, %v1896_v44, %v1610_v55  ;;  %v1864_v37 = vsel %vm1854_vm9, %v1831_v58, %v1409_v14 }
 0x252   : > { %2610 = vmatmul.msk.f32.vlgmr.msra.gmra.mxu1 %vm1962_vm12, %v1929_v23  ;;  %v1897_v63 = vsel %vm1887_vm10, %v1864_v37, %v1511_v1  ;;  %v5466_v23 = vld [vmem:[#allocation82_spill] sm:$0xff]  ;;  %v5468_v37 = vld [vmem:[#allocation51_spill] sm:$0xff] }
 0x253   : > { %v1930_v60 = vsel %vm1920_vm11, %v1897_v63, %v1612_v50  ;;  %v5471_v63 = vld [vmem:[#allocation85_spill] sm:$0xff] }
 0x255   : > { %1518 = vrot.lane.b32.xlu2 %v5457_v8, %s2743_s19 }
 0x256   : > { %1506 = vrot.lane.b32.xlu1 %v5458_v38, %s2743_s19  ;;  %1430 = vrot.lane.b32.xlu0 %v5394_v15, %s2742_s18  ;;  %v5463_v15 = vld [vmem:[#allocation68_spill] sm:$0xff]  ;;  %v5470_v38 = vld [vmem:[#allocation39_spill] sm:$0xff] }
 0x257   : > { %v1513_v29 = vpop.permute.xlu2 %1512  ;;  %v1792_v1 = vsel %vm1788_vm7, %v1759_v16, %v5463_v15 }
 0x258   : > { %v1499_v52 = vpop.permute.xlu1 %1498  ;;  %v1423_v34 = vpop.permute.xlu0 %1422  ;;  %v1825_v50 = vsel %vm1821_vm8, %v1792_v1, %v4039_v22  ;;  %v1700_v22 = vsel %vm1689_vm4, %v5426_v18, %v5466_v23 }
 0x259   : > { %v1858_v48 = vsel %vm1854_vm9, %v1825_v50, %v4395_v54  ;;  %v5469_v54 = vld [vmem:[#allocation136_spill] sm:$0xff]  ;;  %v1871_v18 = vsel %vm1854_vm9, %v4188_v3, %v1423_v34 }
 0x25a   : > { %2611 = vmatmul.msk.f32.gmra.mxu1 %vm1962_vm12, %v1930_v60  ;;  %v1891_v14 = vsel %vm1887_vm10, %v1858_v48, %v1499_v52  ;;  %v5472_v52 = vld [vmem:[#allocation65_spill] sm:$0xff]  ;;  %v5474_v50 = vld [vmem:[#allocation76_spill] sm:$0xff] }
 0x25d   : > { %1607 = vrot.lane.b32.xlu2 %v5464_v7, %s2744_s20 }
 0x25e   : > { %1442 = vrot.lane.b32.xlu1 %v5414_v56, %s2742_s18  ;;  %1619 = vrot.lane.b32.xlu0 %v5465_v47, %s2744_s20  ;;  %v5467_v56 = vld [vmem:[#allocation115_spill] sm:$0xff] }
 0x25f   : > { %v1614_v55 = vpop.permute.xlu2 %1613  ;;  %v1733_v58 = vsel %vm1722_vm5, %v1700_v22, %v5467_v56  ;;  %v5475_v47 = vld [vmem:[#allocation111_spill] sm:$0xff] }
 0x260   : > { %v1600_v44 = vpop.permute.xlu1 %1599  ;;  %v1525_v45 = vpop.permute.xlu0 %1524  ;;  %v1766_v8 = vsel %vm1755_vm6, %v1733_v58, %v5469_v54 }
 0x261   : > { %v1924_v9 = vsel %vm1920_vm11, %v1891_v14, %v1600_v44  ;;  %v1799_v60 = vsel %vm1788_vm7, %v1766_v8, %v5472_v52  ;;  %v1904_v51 = vsel %vm1887_vm10, %v1871_v18, %v1525_v45  ;;  %v5482_v52 = vld [vmem:[#allocation59_spill] sm:$0xff]  ;;  %v5483_v18 = vld [vmem:[#allocation102_spill] sm:$0xff] }
 0x262   : > { %2605 = vmatmul.msk.f32.gmra.mxu0 %vm1962_vm12, %v1924_v9  ;;  %v1832_v35 = vsel %vm1821_vm8, %v1799_v60, %v4102_v24  ;;  %v5473_v24 = vld [vmem:[#allocation29_spill] sm:$0xff]  ;;  %v1695_v60 = vsel %vm1689_vm4, %v2851_v30, %v5482_v52 }
 0x265   : > { %1544 = vrot.lane.b32.xlu2 %v5468_v37, %s2743_s19 }
 0x266   : > { %1532 = vrot.lane.b32.xlu1 %v5470_v38, %s2743_s19  ;;  %1633 = vrot.lane.b32.xlu0 %v5471_v63, %s2744_s20 }
 0x267   : > { %v1401_v32 = vpop.permute.xlu2 %1400 }
 0x268   : > { %v1626_v26 = vpop.permute.xlu1 %1625  ;;  %v1411_v62 = vpop.permute.xlu0 %1410 }
 0x269   : > { %v1865_v59 = vsel %vm1854_vm9, %v1832_v35, %v1411_v62  ;;  %v1937_v16 = vsel %vm1920_vm11, %v1904_v51, %v1626_v26  ;;  %v1728_v35 = vsel %vm1722_vm5, %v1695_v60, %v5483_v18  ;;  %v5484_v51 = vld [vmem:[#allocation133_spill] sm:$0xff]  ;;  %v5500_v18 = vld [vmem:[#allocation122_spill] sm:$0xff] }
 0x26a   : > { %2618 = vmatmul.msk.f32.vlgmr.msra.gmra.mxu2 %vm1962_vm12, %v1937_v16  ;;  %v1898_v15 = vsel %vm1887_vm10, %v1865_v59, %v1513_v29  ;;  %v1694_v29 = vsel %vm1689_vm4, %v2912_v4, %v5474_v50  ;;  %v5478_v4 = vld [vmem:[#allocation74_spill] sm:$0xff]  ;;  %v1761_v26 = vsel %vm1755_vm6, %v1728_v35, %v5484_v51  ;;  %v5486_v59 = vld [vmem:[#allocation97_spill] sm:$0xff]  ;;  %v5487_v16 = vld [vmem:[#allocation32_spill] sm:$0xff] }
 0x26b   : > { %v1931_v1 = vsel %vm1920_vm11, %v1898_v15, %v1614_v55  ;;  %v1727_v48 = vsel %vm1722_vm5, %v1694_v29, %v5475_v47  ;;  %v5476_v55 = vld [vmem:[#allocation131_spill] sm:$0xff]  ;;  %v5490_v29 = vld [vmem:[#allocation108_spill] sm:$0xff]  ;;  %v5499_v60 = vld [vmem:[#allocation157_spill] sm:$0xff] }
 0x26c   : > { %2612 = vmatmul.msk.f32.gmra.mxu1 %vm1962_vm12, %v1931_v1  ;;  %v1760_v14 = vsel %vm1755_vm6, %v1727_v48, %v5476_v55  ;;  %v5488_v15 = vld [vmem:[#allocation159_spill] sm:$0xff]  ;;  %v5491_v55 = vld [vmem:[#allocation138_spill] sm:$0xff] }
 0x26d   : > { %1418 = vrot.lane.b32.xlu2 %v5370_v61, %s2742_s18  ;;  %v5477_v61 = vld [vmem:[#allocation57_spill] sm:$0xff] }
 0x26e   : > { %1645 = vrot.lane.b32.xlu1 %v3534_v11, %s2744_s20  ;;  %1520 = vrot.lane.b32.xlu0 %v5473_v24, %s2743_s19  ;;  %v1793_v44 = vsel %vm1788_vm7, %v1760_v14, %v5477_v61  ;;  %v5489_v24 = vld [vmem:[#allocation87_spill] sm:$0xff] }
 0x26f   : > { %v1515_v3 = vpop.permute.xlu2 %1514  ;;  %v1826_v11 = vsel %vm1821_vm8, %v1793_v44, %v4058_v25  ;;  %v5479_v25 = vld [vmem:[#allocation53_spill] sm:$0xff]  ;;  %v5492_v44 = vld [vmem:[#allocation155_spill] sm:$0xff] }
 0x270   : > { %v1501_v34 = vpop.permute.xlu1 %1500  ;;  %v1425_v7 = vpop.permute.xlu0 %1424  ;;  %v1859_v45 = vsel %vm1854_vm9, %v1826_v11, %v4464_v19 }
 0x271   : > { %v1892_v23 = vsel %vm1887_vm10, %v1859_v45, %v1501_v34  ;;  %v1872_v19 = vsel %vm1854_vm9, %v4078_v57, %v1425_v7  ;;  %v5485_v57 = vld [vmem:[#allocation152_spill] sm:$0xff]  ;;  %v1701_v34 = vsel %vm1689_vm4, %v5451_v21, %v5489_v24  ;;  %v5494_v45 = vld [vmem:[#allocation121_spill] sm:$0xff]  ;;  %v5505_v24 = vld [vmem:[#allocation143_spill] sm:$0xff] }
 0x272   : > { %v1794_v62 = vsel %vm1788_vm7, %v1761_v26, %v5485_v57  ;;  %v1734_v47 = vsel %vm1722_vm5, %v1701_v34, %v5490_v29  ;;  %v5493_v21 = vld [vmem:[#allocation160_spill] sm:$0xff]  ;;  %v5506_v34 = vld [vmem:[#allocation153_spill] sm:$0xff] }
 0x273   : > { %v1827_v30 = vsel %vm1821_vm8, %v1794_v62, %v5488_v15  ;;  %v1767_v14 = vsel %vm1755_vm6, %v1734_v47, %v5491_v55  ;;  %v5501_v62 = vld [vmem:[#allocation62_spill] sm:$0xff]  ;;  %v5509_v29 = vld [vmem:[#allocation69_spill] sm:$0xff] }
 0x274   : > { %v1860_v7 = vsel %vm1854_vm9, %v1827_v30, %v1401_v32  ;;  %v1800_v11 = vsel %vm1788_vm7, %v1767_v14, %v5492_v44  ;;  %v5504_v15 = vld [vmem:[#allocation126_spill] sm:$0xff]  ;;  %v5510_v47 = vld [vmem:[#allocation17_spill] sm:$0xff]  ;;  %v5511_v44 = vld [vmem:[#allocation116_spill] sm:$0xff] }
 0x275   : > { %1444 = vrot.lane.b32.xlu2 %v5425_v53, %s2742_s18  ;;  %v5481_v53 = vld [vmem:[#allocation90_spill] sm:$0xff]  ;;  %v1833_v32 = vsel %vm1821_vm8, %v1800_v11, %v5493_v21 }
 0x276   : > { %1432 = vrot.lane.b32.xlu1 %v5406_v33, %s2742_s18  ;;  %1621 = vrot.lane.b32.xlu0 %v5478_v4, %s2744_s20  ;;  %v5480_v33 = vld [vmem:[#allocation42_spill] sm:$0xff] }
 0x277   : > { %v1604_v9 = vpop.permute.xlu2 %1603 }
 0x278   : > { %v1602_v22 = vpop.permute.xlu1 %1601  ;;  %v1527_v56 = vpop.permute.xlu0 %1526 }
 0x279   : > { %v1925_v58 = vsel %vm1920_vm11, %v1892_v23, %v1602_v22  ;;  %v1905_v54 = vsel %vm1887_vm10, %v1872_v19, %v1527_v56  ;;  %v5495_v23 = vld [vmem:[#allocation78_spill] sm:$0xff] }
 0x27a   : > { %2606 = vmatmul.msk.f32.gmra.mxu0 %vm1962_vm12, %v1925_v58 }
 0x27d   : > { %1546 = vrot.lane.b32.xlu2 %v5479_v25, %s2743_s19 }
 0x27e   : > { %1534 = vrot.lane.b32.xlu1 %v5480_v33, %s2743_s19  ;;  %1635 = vrot.lane.b32.xlu0 %v5481_v53, %s2744_s20  ;;  %v5496_v33 = vld [vmem:[#allocation144_spill] sm:$0xff] }
 0x27f   : > { %v1541_v37 = vpop.permute.xlu2 %1540  ;;  %v5497_v53 = vld [vmem:[#allocation48_spill] sm:$0xff] }
 0x280   : > { %v1628_v8 = vpop.permute.xlu1 %1627  ;;  %v1413_v38 = vpop.permute.xlu0 %1412 }
 0x281   : > { %v1938_v63 = vsel %vm1920_vm11, %v1905_v54, %v1628_v8  ;;  %v1866_v4 = vsel %vm1854_vm9, %v1833_v32, %v1413_v38 }
 0x282   : > { %2619 = vmatmul.msk.f32.gmra.mxu2 %vm1962_vm12, %v1938_v63  ;;  %v1899_v58 = vsel %vm1887_vm10, %v1866_v4, %v1515_v3  ;;  %v5512_v4 = vld [vmem:[#allocation26_spill] sm:$0xff] }
 0x285   : > { %1420 = vrot.lane.b32.xlu2 %v5384_v13, %s2742_s18 }
 0x286   : > { %1647 = vrot.lane.b32.xlu1 %v5486_v59, %s2744_s20  ;;  %1522 = vrot.lane.b32.xlu0 %v5487_v16, %s2743_s19 }
 0x287   : > { %v1403_v1 = vpop.permute.xlu2 %1402 }
 0x288   : > { %v1503_v13 = vpop.permute.xlu1 %1502  ;;  %v1427_v50 = vpop.permute.xlu0 %1426 }
 0x289   : > { %v1893_v48 = vsel %vm1887_vm10, %v1860_v7, %v1503_v13  ;;  %v1873_v54 = vsel %vm1854_vm9, %v4191_v43, %v1427_v50  ;;  %v5507_v7 = vld [vmem:[#allocation46_spill] sm:$0xff]  ;;  %v5508_v13 = vld [vmem:[#allocation91_spill] sm:$0xff] }
 0x28a   : > { %v1926_v61 = vsel %vm1920_vm11, %v1893_v48, %v1604_v9  ;;  %v1702_v48 = vsel %vm1689_vm4, %v5510_v47, %v5509_v29  ;;  %v5521_v29 = vld [vmem:[#allocation134_spill] sm:$0xff]  ;;  %v5522_v47 = vld [vmem:[#allocation147_spill] sm:$0xff] }
 0x28b   : > { %2607 = vmatmul.msk.f32.gmra.mxu0 %vm1962_vm12, %v1926_v61  ;;  %v1735_v11 = vsel %vm1722_vm5, %v1702_v48, %v5511_v44 }
 0x28d   : > { %1446 = vrot.lane.b32.xlu2 %v5494_v45, %s2742_s18  ;;  %v1768_v45 = vsel %vm1755_vm6, %v1735_v11, %v5512_v4 }
 0x28e   : > { %1434 = vrot.lane.b32.xlu1 %v5368_v31, %s2742_s18  ;;  %1623 = vrot.lane.b32.xlu0 %v5495_v23, %s2744_s20  ;;  %v5498_v31 = vld [vmem:[#allocation89_spill] sm:$0xff]  ;;  %v5513_v23 = vld [vmem:[#allocation156_spill] sm:$0xff] }
 0x28f   : > { %v1517_v9 = vpop.permute.xlu2 %1516 }
 0x290   : > { %v1439_v22 = vpop.permute.xlu1 %1438  ;;  %v1616_v56 = vpop.permute.xlu0 %1615 }
 0x291   : > { %v1932_v25 = vsel %vm1920_vm11, %v1899_v58, %v1616_v56  ;;  %v1879_v52 = vsel %vm1854_vm9, %v4289_v0, %v1439_v22  ;;  %v5502_v0 = vld [vmem:[#allocation6_spill] sm:$0xff]  ;;  %v1801_v22 = vsel %vm1788_vm7, %v1768_v45, %v5513_v23  ;;  %v5514_v58 = vmov 0.0  }
 0x292   : > { %2613 = vmatmul.msk.f32.gmra.mxu1 %vm1962_vm12, %v1932_v25  ;;  %v1912_v26 = vsel %vm1887_vm10, %v1879_v52, %v1541_v37  ;;  %v1696_v59 = vsel %vm1689_vm4, %v5502_v0, %v5501_v62  ;;  %v5515_v25 = vld [vmem:[#allocation158_spill] sm:$0xff] }
 0x295   : > { %1548 = vrot.lane.b32.xlu2 %v5496_v33, %s2743_s19  ;;  %v5516_v33 = vld [vmem:[#allocation2_spill] sm:$0xff] }
 0x296   : > { %1536 = vrot.lane.b32.xlu1 %v5497_v53, %s2743_s19  ;;  %1637 = vrot.lane.b32.xlu0 %v5498_v31, %s2744_s20 }
 0x297   : > { %v1606_v19 = vpop.permute.xlu2 %1605 }
 0x298   : > { %v1529_v8 = vpop.permute.xlu1 %1528  ;;  %v1630_v38 = vpop.permute.xlu0 %1629 }
 0x299   : > { %v1906_v3 = vsel %vm1887_vm10, %v1873_v54, %v1529_v8  ;;  %v5517_v8 = vld [vmem:[#allocation54_spill] sm:$0xff] }
 0x29a   : > { %v1939_v63 = vsel %vm1920_vm11, %v1906_v3, %v1630_v38 }
 0x29b   : > { %2620 = vmatmul.msk.f32.gmra.mxu2 %vm1962_vm12, %v1939_v63 }
 0x29d   : > { %1436 = vrot.lane.b32.xlu2 %v5404_v39, %s2742_s18  ;;  %v5503_v39 = vld [vmem:[#allocation112_spill] sm:$0xff] }
 0x29e   : > { %1649 = vrot.lane.b32.xlu1 %v5499_v60, %s2744_s20  ;;  %1448 = vrot.lane.b32.xlu0 %v5500_v18, %s2742_s18  ;;  %v1729_v16 = vsel %vm1722_vm5, %v1696_v59, %v5503_v39 }
 0x29f   : > { %v1543_v43 = vpop.permute.xlu2 %1542  ;;  %v1762_v30 = vsel %vm1755_vm6, %v1729_v16, %v5504_v15 }
 0x2a0   : > { %v1642_v35 = vpop.permute.xlu1 %1641  ;;  %v1415_v51 = vpop.permute.xlu0 %1414  ;;  %v1795_v37 = vsel %vm1788_vm7, %v1762_v30, %v5506_v34  ;;  %v5519_v34 = vld [vmem:[#allocation4_spill] sm:$0xff] }
 0x2a1   : > { %v1945_v57 = vsel %vm1920_vm11, %v1912_v26, %v1642_v35  ;;  %v1828_v50 = vsel %vm1821_vm8, %v1795_v37, %v4060_v5 }
 0x2a2   : > { %2626 = vmatmul.msk.f32.vlgmr.msra.gmra.mxu3 %vm1962_vm12, %v1945_v57  ;;  %v1861_v55 = vsel %vm1854_vm9, %v1828_v50, %v1403_v1  ;;  %v1834_v1 = vsel %vm1821_vm8, %v1801_v22, %v4104_v41 }
 0x2a3   : > { %v1867_v56 = vsel %vm1854_vm9, %v1834_v1, %v1415_v51 }
 0x2a5   : > { %1550 = vrot.lane.b32.xlu2 %v5505_v24, %s2743_s19  ;;  %v5518_v24 = vld [vmem:[#allocation77_spill] sm:$0xff] }
 0x2a6   : > { %1538 = vrot.lane.b32.xlu1 %v5507_v7, %s2743_s19  ;;  %1639 = vrot.lane.b32.xlu0 %v5508_v13, %s2744_s20  ;;  %v1697_v37 = vsel %vm1689_vm4, %v5519_v34, %v5518_v24  ;;  %v5520_v13 = vld [vmem:[#allocation113_spill] sm:$0xff] }
 0x2a7   : > { %v1405_v21 = vpop.permute.xlu2 %1404  ;;  %v1730_v50 = vsel %vm1722_vm5, %v1697_v37, %v5520_v13 }
 0x2a8   : > { %v1505_v14 = vpop.permute.xlu1 %1504  ;;  %v1429_v61 = vpop.permute.xlu0 %1428 }
 0x2a9   : > { %v1894_v32 = vsel %vm1887_vm10, %v1861_v55, %v1505_v14  ;;  %v1874_v38 = vsel %vm1854_vm9, %v4242_v2, %v1429_v61 }
 0x2aa   : > { %v1927_v5 = vsel %vm1920_vm11, %v1894_v32, %v1606_v19  ;;  %v1900_v19 = vsel %vm1887_vm10, %v1867_v56, %v1517_v9 }
 0x2ab   : > { %2608 = vmatmul.msk.f32.gmra.mxu0 %vm1962_vm12, %v1927_v5 }
 0x2ad   : > { %1450 = vrot.lane.b32.xlu2 %v5514_v58, %s2742_s18 }
 0x2ae   : > { %1651 = vrot.lane.b32.xlu1 %v5515_v25, %s2744_s20  ;;  %1552 = vrot.lane.b32.xlu0 %v5516_v33, %s2743_s19 }
 0x2af   : > { %v1519_v41 = vpop.permute.xlu2 %1518 }
 0x2b0   : > { %v1441_v53 = vpop.permute.xlu1 %1440  ;;  %v1618_v31 = vpop.permute.xlu0 %1617 }
 0x2b1   : > { %v1933_v54 = vsel %vm1920_vm11, %v1900_v19, %v1618_v31  ;;  %v1880_v18 = vsel %vm1854_vm9, %v4318_v17, %v1441_v53 }
 0x2b2   : > { %2614 = vmatmul.msk.f32.gmra.mxu1 %vm1962_vm12, %v1933_v54  ;;  %v1913_v39 = vsel %vm1887_vm10, %v1880_v18, %v1543_v43  ;;  %v1763_v43 = vsel %vm1755_vm6, %v1730_v50, %v5521_v29 }
 0x2b3   : > { %v1796_v48 = vsel %vm1788_vm7, %v1763_v43, %v5522_v47 }
 0x2b4   : > { %v1829_v55 = vsel %vm1821_vm8, %v1796_v48, %v4080_v46 }
 0x2b5   : > { %1452 = vrot.lane.b32.xlu2 %v5514_v58, %s2742_s18  ;;  %v1862_v61 = vsel %vm1854_vm9, %v1829_v55, %v1405_v21 }
 0x2b6   : > { %1653 = vrot.lane.b32.xlu1 %v5517_v8, %s2744_s20  ;;  %1554 = vrot.lane.b32.xlu0 %v5516_v33, %s2743_s19 }
 0x2b7   : > { %v2076_v9 = vpop.f32.mrf.mxu0  ;;  %v1608_v35 = vpop.permute.xlu2 %1607 }
 0x2b8   : > { %2172 = vst.msk [vmem:[%s4685_s29] sm:$0xff] %vm1689_vm4, %v2076_v9  ;;  %v1531_v3 = vpop.permute.xlu1 %1530  ;;  %v1632_v63 = vpop.permute.xlu0 %1631  ;;  %v2275_v51 = vmul.f32 %v2076_v9, %v2076_v9  ;;  %v2204_v2 = vsel %vm1689_vm4, %v2076_v9, 0.0 }
 0x2b9   : > { %v1907_v52 = vsel %vm1887_vm10, %v1874_v38, %v1531_v3 }
 0x2ba   : > { %v1940_v60 = vsel %vm1920_vm11, %v1907_v52, %v1632_v63  ;;  %v2307_v15 = vsel %vm1689_vm4, %v2275_v51, 0.0 }
 0x2bb   : > { %2621 = vmatmul.msk.f32.gmra.mxu2 %vm1962_vm12, %v1940_v60 }
 0x2be   : > { %1655 = vrot.lane.b32.xlu1 %v5517_v8, %s2744_s20  ;;  %s365_s20 = scalar_lea.vmem %s5005_s5, %s5531_s21 }
 0x2bf   : > { %v2079_v26 = vpop.f32.mrf.mxu0  ;;  %v1545_v14 = vpop.permute.xlu2 %1544 }
 0x2c0   : > { %2173 = vst.msk [vmem:[%s4685_s29 + $0x8] sm:$0xff] %vm1689_vm4, %v2079_v26  ;;  %v2205_v57 = vsel %vm1689_vm4, %v2079_v26, 0.0  ;;  %v2276_v62 = vmul.f32 %v2079_v26, %v2079_v26  ;;  %v1644_v0 = vpop.permute.xlu1 %1643  ;;  %v1417_v59 = vpop.permute.xlu0 %1416 }
 0x2c1   : > { %v2206_v16 = vadd.f32 %v2205_v57, %v2204_v2  ;;  %v1946_v17 = vsel %vm1920_vm11, %v1913_v39, %v1644_v0  ;;  %v1868_v21 = vsel %vm1854_vm9, %v4143_v20, %v1417_v59 }
 0x2c2   : > { %v2308_v30 = vsel %vm1689_vm4, %v2276_v62, 0.0  ;;  %2627 = vmatmul.msk.f32.gmra.mxu3 %vm1962_vm12, %v1946_v17  ;;  %v1901_v33 = vsel %vm1887_vm10, %v1868_v21, %v1519_v41 }
 0x2c3   : > { %v2309_v7 = vadd.f32 %v2308_v30, %v2307_v15 }
 0x2c7   : > { %v1419_v53 = vpop.permute.xlu2 %1418 }
 0x2c8   : > { %v1507_v44 = vpop.permute.xlu1 %1506  ;;  %v2082_v11 = vpop.f32.mrf.mxu0  ;;  %v1869_v62 = vsel %vm1854_vm9, %v4056_v10, %v1419_v53 }
 0x2c9   : > { %v1895_v32 = vsel %vm1887_vm10, %v1862_v61, %v1507_v44  ;;  %2174 = vst.msk [vmem:[%s4685_s29 + $0x10] sm:$0xff] %vm1689_vm4, %v2082_v11  ;;  %v2207_v4 = vsel %vm1689_vm4, %v2082_v11, 0.0  ;;  %v2277_v45 = vmul.f32 %v2082_v11, %v2082_v11  ;;  %v1431_v5 = vpop.permute.xlu0 %1430 }
 0x2ca   : > { %v2208_v23 = vadd.f32 %v2207_v4, %v2206_v16  ;;  %v1928_v22 = vsel %vm1920_vm11, %v1895_v32, %v1608_v35  ;;  %v1875_v20 = vsel %vm1854_vm9, %v4100_v40, %v1431_v5 }
 0x2cb   : > { %v2310_v46 = vsel %vm1689_vm4, %v2277_v45, 0.0  ;;  %2609 = vmatmul.msk.f32.gmra.mxu0 %vm1962_vm12, %v1928_v22 }
 0x2cc   : > { %v2311_v1 = vadd.f32 %v2310_v46, %v2309_v7 }
 0x2cf   : > { %v4732_v56 = vpop.f32.mrf.mxu1  ;;  %v1445_v41 = vpop.permute.xlu2 %1444 }
 0x2d0   : > { %2180 = vst.msk [vmem:[%s4685_s29 + $0x40] sm:$0xff] %vm1689_vm4, %v4732_v56  ;;  %v1443_v58 = vpop.permute.xlu1 %1442  ;;  %v1882_v13 = vsel %vm1854_vm9, %v4321_v49, %v1445_v41 }
 0x2d1   : > { %v1620_v25 = vpop.permute.xlu0 %1619  ;;  %v1881_v3 = vsel %vm1854_vm9, %v4182_v42, %v1443_v58 }
 0x2d2   : > { %v1934_v31 = vsel %vm1920_vm11, %v1901_v33, %v1620_v25  ;;  %v1914_v18 = vsel %vm1887_vm10, %v1881_v3, %v1545_v14 }
 0x2d3   : > { %2615 = vmatmul.msk.f32.gmra.mxu1 %vm1962_vm12, %v1934_v31 }
 0x2d7   : > { %v4740_v19 = vpop.f32.mrf.mxu1  ;;  %v1547_v57 = vpop.permute.xlu2 %1546 }
 0x2d8   : > { %2181 = vst.msk [vmem:[%s4685_s29 + $0x48] sm:$0xff] %vm1689_vm4, %v4740_v19  ;;  %v1533_v54 = vpop.permute.xlu1 %1532  ;;  %v1915_v29 = vsel %vm1887_vm10, %v1882_v13, %v1547_v57 }
 0x2d9   : > { %v1908_v8 = vsel %vm1887_vm10, %v1875_v20, %v1533_v54  ;;  %v1634_v9 = vpop.permute.xlu0 %1633 }
 0x2da   : > { %v1941_v38 = vsel %vm1920_vm11, %v1908_v8, %v1634_v9 }
 0x2db   : > { %2622 = vmatmul.msk.f32.gmra.mxu2 %vm1962_vm12, %v1941_v38 }
 0x2df   : > { %v2085_v63 = vpop.f32.mrf.mxu0  ;;  %v1421_v10 = vpop.permute.xlu2 %1420 }
 0x2e0   : > { %2175 = vst.msk [vmem:[%s4685_s29 + $0x18] sm:$0xff] %vm1689_vm4, %v2085_v63  ;;  %v2209_v40 = vsel %vm1689_vm4, %v2085_v63, 0.0  ;;  %v2278_v52 = vmul.f32 %v2085_v63, %v2085_v63  ;;  %v1646_v60 = vpop.permute.xlu1 %1645  ;;  %v1870_v11 = vsel %vm1854_vm9, %v4146_v12, %v1421_v10  ;;  %v5525_v10 = vld [vmem:[#allocation117_spill] sm:$0xff] }
 0x2e1   : > { %v2210_v35 = vadd.f32 %v2209_v40, %v2208_v23  ;;  %v1521_v51 = vpop.permute.xlu0 %1520  ;;  %v1947_v26 = vsel %vm1920_vm11, %v1914_v18, %v1646_v60  ;;  %v5523_v40 = vld [vmem:[#allocation75_spill] sm:$0xff] }
 0x2e2   : > { %v2312_v2 = vsel %vm1689_vm4, %v2278_v52, 0.0  ;;  %2628 = vmatmul.msk.f32.gmra.mxu3 %vm1962_vm12, %v1947_v26  ;;  %v1902_v59 = vsel %vm1887_vm10, %v1869_v62, %v1521_v51  ;;  %v5524_v26 = vld [vmem:[#allocation88_spill] sm:$0xff] }
 0x2e3   : > { %v2313_v42 = vadd.f32 %v2312_v2, %v2311_v1 }
 0x2e7   : > { %v1447_v61 = vpop.permute.xlu2 %1446 }
 0x2e8   : > { %v1433_v0 = vpop.permute.xlu1 %1432  ;;  %v1883_v8 = vsel %vm1854_vm9, %v4350_v27, %v1447_v61 }
 0x2e9   : > { %v1622_v39 = vpop.permute.xlu0 %1621  ;;  %v4762_v16 = vpop.f32.mrf.mxu1  ;;  %v1876_v30 = vsel %vm1854_vm9, %v4245_v28, %v1433_v0 }
 0x2ea   : > { %2182 = vst.msk [vmem:[%s4685_s29 + $0x50] sm:$0xff] %vm1689_vm4, %v4762_v16  ;;  %v1935_v17 = vsel %vm1920_vm11, %v1902_v59, %v1622_v39 }
 0x2eb   : > { %2616 = vmatmul.msk.f32.gmra.mxu1 %vm1962_vm12, %v1935_v17 }
 0x2ed   : > { %v4769_v15 = vpop.f32.mrf.mxu2 }
 0x2ee   : > { %2188 = vst.msk [vmem:[%s4685_s29 + $0x80] sm:$0xff] %vm1689_vm4, %v4769_v15 }
 0x2ef   : > { %v1549_v23 = vpop.permute.xlu2 %1548 }
 0x2f0   : > { %v1535_v24 = vpop.permute.xlu1 %1534  ;;  %v1916_v38 = vsel %vm1887_vm10, %v1883_v8, %v1549_v23 }
 0x2f1   : > { %v1909_v34 = vsel %vm1887_vm10, %v1876_v30, %v1535_v24  ;;  %v1636_v37 = vpop.permute.xlu0 %1635 }
 0x2f2   : > { %v1942_v7 = vsel %vm1920_vm11, %v1909_v34, %v1636_v37 }
 0x2f3   : > { %2623 = vmatmul.msk.f32.gmra.mxu2 %vm1962_vm12, %v1942_v7 }
 0x2f7   : > { %v2088_v50 = vpop.f32.mrf.mxu0 }
 0x2f8   : > { %2176 = vst.msk [vmem:[%s4685_s29 + $0x20] sm:$0xff] %vm1689_vm4, %v2088_v50  ;;  %v2211_v43 = vsel %vm1689_vm4, %v2088_v50, 0.0  ;;  %v2279_v47 = vmul.f32 %v2088_v50, %v2088_v50  ;;  %v1648_v28 = vpop.permute.xlu1 %1647 }
 0x2f9   : > { %v2212_v48 = vadd.f32 %v2211_v43, %v2210_v35  ;;  %v1523_v55 = vpop.permute.xlu0 %1522  ;;  %v1948_v14 = vsel %vm1920_vm11, %v1915_v29, %v1648_v28 }
 0x2fa   : > { %v2314_v44 = vsel %vm1689_vm4, %v2279_v47, 0.0  ;;  %2629 = vmatmul.msk.f32.gmra.mxu3 %vm1962_vm12, %v1948_v14  ;;  %v1903_v4 = vsel %vm1887_vm10, %v1870_v11, %v1523_v55 }
 0x2fb   : > { %v2315_v49 = vadd.f32 %v2314_v44, %v2313_v42 }
 0x300   : > { %v1435_v32 = vpop.permute.xlu1 %1434 }
 0x301   : > { %v1624_v45 = vpop.permute.xlu0 %1623  ;;  %v1877_v46 = vsel %vm1854_vm9, %v4286_v36, %v1435_v32  ;;  %v1437_v36 = vpop.permute.xlu2 %1436 }
 0x302   : > { %v1936_v5 = vsel %vm1920_vm11, %v1903_v4, %v1624_v45  ;;  %v1878_v52 = vsel %vm1854_vm9, %v5523_v40, %v1437_v36  ;;  %v2283_v4 = vmul.f32 %v4732_v56, %v4732_v56 }
 0x303   : > { %2617 = vmatmul.msk.f32.gmra.mxu1 %vm1962_vm12, %v1936_v5 }
 0x305   : > { %v4793_v22 = vpop.f32.mrf.mxu2 }
 0x306   : > { %2189 = vst.msk [vmem:[%s4685_s29 + $0x88] sm:$0xff] %vm1689_vm4, %v4793_v22 }
 0x308   : > { %v1537_v1 = vpop.permute.xlu1 %1536  ;;  %v2091_v12 = vpop.f32.mrf.mxu0 }
 0x309   : > { %v1910_v21 = vsel %vm1887_vm10, %v1877_v46, %v1537_v1  ;;  %2177 = vst.msk [vmem:[%s4685_s29 + $0x28] sm:$0xff] %vm1689_vm4, %v2091_v12  ;;  %v2213_v58 = vsel %vm1689_vm4, %v2091_v12, 0.0  ;;  %v2280_v25 = vmul.f32 %v2091_v12, %v2091_v12  ;;  %v1638_v33 = vpop.permute.xlu0 %1637  ;;  %v1551_v60 = vpop.permute.xlu2 %1550  ;;  %v2219_v46 = vsel %vm1689_vm4, %v4732_v56, 0.0 }
 0x30a   : > { %v2214_v53 = vadd.f32 %v2213_v58, %v2212_v48  ;;  %v1943_v31 = vsel %vm1920_vm11, %v1910_v21, %v1638_v33  ;;  %v2284_v1 = vmul.f32 %v4740_v19, %v4740_v19  ;;  %v2221_v33 = vsel %vm1689_vm4, %v4740_v19, 0.0 }
 0x30b   : > { %v2316_v20 = vsel %vm1689_vm4, %v2280_v25, 0.0  ;;  %2624 = vmatmul.msk.f32.gmra.mxu2 %vm1962_vm12, %v1943_v31  ;;  %v2322_v25 = vsel %vm1689_vm4, %v2283_v4, 0.0 }
 0x30c   : > { %v2317_v54 = vadd.f32 %v2316_v20, %v2315_v49  ;;  %v2324_v56 = vsel %vm1689_vm4, %v2284_v1, 0.0 }
 0x30f   : > { %v4809_v9 = vpop.f32.mrf.mxu1 }
 0x310   : > { %2183 = vst.msk [vmem:[%s4685_s29 + $0x58] sm:$0xff] %vm1689_vm4, %v4809_v9  ;;  %v1650_v41 = vpop.permute.xlu1 %1649  ;;  %v2286_v36 = vmul.f32 %v4809_v9, %v4809_v9  ;;  %v2225_v19 = vsel %vm1689_vm4, %v4809_v9, 0.0 }
 0x311   : > { %v1449_v3 = vpop.permute.xlu0 %1448  ;;  %v1949_v63 = vsel %vm1920_vm11, %v1916_v38, %v1650_v41  ;;  %v1451_v59 = vpop.permute.xlu2 %1450 }
 0x312   : > { %2630 = vmatmul.msk.f32.gmra.mxu3 %vm1962_vm12, %v1949_v63  ;;  %v1884_v2 = vsel %vm1854_vm9, %v5524_v26, %v1449_v3  ;;  %v1885_v30 = vsel %vm1854_vm9, %v5525_v10, %v1451_v59 }
 0x313   : > { %v1917_v62 = vsel %vm1887_vm10, %v1884_v2, %v1551_v60 }
 0x318   : > { %v1539_v27 = vpop.permute.xlu1 %1538 }
 0x319   : > { %v1911_v18 = vsel %vm1887_vm10, %v1878_v52, %v1539_v27  ;;  %v1640_v35 = vpop.permute.xlu0 %1639  ;;  %v1453_v47 = vpop.permute.xlu2 %1452 }
 0x31a   : > { %v1944_v51 = vsel %vm1920_vm11, %v1911_v18, %v1640_v35  ;;  %v1886_v55 = vsel %vm1854_vm9, %v4375_v6, %v1453_v47 }
 0x31b   : > { %2625 = vmatmul.msk.f32.gmra.mxu2 %vm1962_vm12, %v1944_v51 }
 0x31e   : > { %v4824_v42 = vpop.f32.mrf.mxu2 }
 0x31f   : > { %2190 = vst.msk [vmem:[%s4685_s29 + $0x90] sm:$0xff] %vm1689_vm4, %v4824_v42  ;;  %v2293_v4 = vmul.f32 %v4824_v42, %v4824_v42 }
 0x320   : > { %v1652_v57 = vpop.permute.xlu1 %1651 }
 0x321   : > { %v1950_v0 = vsel %vm1920_vm11, %v1917_v62, %v1652_v57  ;;  %v1553_v39 = vpop.permute.xlu0 %1552 }
 0x322   : > { %2631 = vmatmul.msk.f32.gmra.mxu3 %vm1962_vm12, %v1950_v0  ;;  %v1918_v24 = vsel %vm1887_vm10, %v1885_v30, %v1553_v39 }
 0x325   : > { %v4832_v17 = vpop.f32.mrf.mxu3 }
 0x326   : > { %2196 = vst.msk [vmem:[%s4685_s29 + $0xc0] sm:$0xff] %vm1689_vm4, %v4832_v17 }
 0x328   : > { %v1654_v34 = vpop.permute.xlu1 %1653  ;;  %v2094_v37 = vpop.f32.mrf.mxu0 }
 0x329   : > { %2178 = vst.msk [vmem:[%s4685_s29 + $0x30] sm:$0xff] %vm1689_vm4, %v2094_v37  ;;  %v2215_v7 = vsel %vm1689_vm4, %v2094_v37, 0.0  ;;  %v2281_v13 = vmul.f32 %v2094_v37, %v2094_v37  ;;  %v1951_v50 = vsel %vm1920_vm11, %v1918_v24, %v1654_v34  ;;  %v1555_v48 = vpop.permute.xlu0 %1554 }
 0x32a   : > { %v2216_v29 = vadd.f32 %v2215_v7, %v2214_v53  ;;  %2632 = vmatmul.msk.f32.gmra.mxu3 %vm1962_vm12, %v1951_v50  ;;  %v1919_v61 = vsel %vm1887_vm10, %v1886_v55, %v1555_v48  ;;  %v2285_v53 = vmul.f32 %v4762_v16, %v4762_v16  ;;  %v2291_v50 = vmul.f32 %v4769_v15, %v4769_v15 }
 0x32b   : > { %v2318_v43 = vsel %vm1689_vm4, %v2281_v13, 0.0  ;;  %v2235_v48 = vsel %vm1689_vm4, %v4769_v15, 0.0  ;;  %v2292_v55 = vmul.f32 %v4793_v22, %v4793_v22  ;;  %v2239_v15 = vsel %vm1689_vm4, %v4824_v42, 0.0 }
 0x32c   : > { %v2319_v28 = vadd.f32 %v2318_v43, %v2317_v54  ;;  %v2223_v54 = vsel %vm1689_vm4, %v4762_v16, 0.0  ;;  %v2326_v3 = vsel %vm1689_vm4, %v2285_v53, 0.0  ;;  %v2328_v16 = vsel %vm1689_vm4, %v2286_v36, 0.0 }
 0x32f   : > { %v2112_v14 = vpop.f32.mrf.mxu1 }
 0x330   : > { %2184 = vst.msk [vmem:[%s4685_s29 + $0x60] sm:$0xff] %vm1689_vm4, %v2112_v14  ;;  %v1656_v44 = vpop.permute.xlu1 %1655  ;;  %v2287_v63 = vmul.f32 %v2112_v14, %v2112_v14  ;;  %v2227_v60 = vsel %vm1689_vm4, %v2112_v14, 0.0 }
 0x331   : > { %v1952_v49 = vsel %vm1920_vm11, %v1919_v61, %v1656_v44 }
 0x332   : > { %2633 = vmatmul.msk.f32.gmra.mxu3 %vm1962_vm12, %v1952_v49  ;;  %v2330_v51 = vsel %vm1689_vm4, %v2287_v63, 0.0  ;;  %v2338_v49 = vsel %vm1689_vm4, %v2291_v50, 0.0 }
 0x33e   : > { %v4853_v11 = vpop.f32.mrf.mxu2 }
 0x33f   : > { %2191 = vst.msk [vmem:[%s4685_s29 + $0x98] sm:$0xff] %vm1689_vm4, %v4853_v11 }
 0x345   : > { %v4858_v32 = vpop.f32.mrf.mxu3 }
 0x346   : > { %2197 = vst.msk [vmem:[%s4685_s29 + $0xc8] sm:$0xff] %vm1689_vm4, %v4858_v32 }
 0x348   : > { %v2097_v6 = vpop.f32.mrf.mxu0 }
 0x349   : > { %2179 = vst.msk [vmem:[%s4685_s29 + $0x38] sm:$0xff] %vm1689_vm4, %v2097_v6  ;;  %v2217_v45 = vsel %vm1689_vm4, %v2097_v6, 0.0  ;;  %v2282_v5 = vmul.f32 %v2097_v6, %v2097_v6  ;;  %v2237_v6 = vsel %vm1689_vm4, %v4793_v22, 0.0  ;;  %v2241_v22 = vsel %vm1689_vm4, %v4853_v11, 0.0 }
 0x34a   : > { %v2218_v23 = vadd.f32 %v2217_v45, %v2216_v29 }
 0x34b   : > { %v2320_v12 = vsel %vm1689_vm4, %v2282_v5, 0.0 }
 0x34c   : > { %v2220_v21 = vadd.f32 %v2219_v46, %v2218_v23  ;;  %v2321_v58 = vadd.f32 %v2320_v12, %v2319_v28  ;;  %v2340_v23 = vsel %vm1689_vm4, %v2292_v55, 0.0  ;;  %v2294_v46 = vmul.f32 %v4853_v11, %v4853_v11 }
 0x34e   : > { %v2222_v31 = vadd.f32 %v2221_v33, %v2220_v21  ;;  %v2323_v20 = vadd.f32 %v2322_v25, %v2321_v58  ;;  %v2342_v21 = vsel %vm1689_vm4, %v2293_v4, 0.0  ;;  %v2344_v53 = vsel %vm1689_vm4, %v2294_v46, 0.0 }
 0x350   : > { %v2224_v8 = vadd.f32 %v2223_v54, %v2222_v31  ;;  %v2325_v38 = vadd.f32 %v2324_v56, %v2323_v20  ;;  %v2115_v41 = vpop.f32.mrf.mxu1 }
 0x351   : > { %2185 = vst.msk [vmem:[%s4685_s29 + $0x68] sm:$0xff] %vm1689_vm4, %v2115_v41  ;;  %v2288_v27 = vmul.f32 %v2115_v41, %v2115_v41  ;;  %v2229_v9 = vsel %vm1689_vm4, %v2115_v41, 0.0 }
 0x352   : > { %v2327_v40 = vadd.f32 %v2326_v3, %v2325_v38  ;;  %v2226_v52 = vadd.f32 %v2225_v19, %v2224_v8 }
 0x353   : > { %v2332_v57 = vsel %vm1689_vm4, %v2288_v27, 0.0  ;;  %v2299_v27 = vmul.f32 %v4832_v17, %v4832_v17 }
 0x354   : > { %v2228_v18 = vadd.f32 %v2227_v60, %v2226_v52  ;;  %v2329_v35 = vadd.f32 %v2328_v16, %v2327_v40 }
 0x356   : > { %v2230_v26 = vadd.f32 %v2229_v9, %v2228_v18  ;;  %v2331_v2 = vadd.f32 %v2330_v51, %v2329_v35 }
 0x358   : > { %v2333_v62 = vadd.f32 %v2332_v57, %v2331_v2  ;;  %v2300_v2 = vmul.f32 %v4858_v32, %v4858_v32 }
 0x35e   : > { %v2136_v0 = vpop.f32.mrf.mxu2 }
 0x35f   : > { %2192 = vst.msk [vmem:[%s4685_s29 + $0xa0] sm:$0xff] %vm1689_vm4, %v2136_v0  ;;  %v2295_v58 = vmul.f32 %v2136_v0, %v2136_v0  ;;  %v2243_v31 = vsel %vm1689_vm4, %v2136_v0, 0.0 }
 0x361   : > { %v2346_v56 = vsel %vm1689_vm4, %v2295_v58, 0.0 }
 0x365   : > { %v4895_v59 = vpop.f32.mrf.mxu3 }
 0x366   : > { %2198 = vst.msk [vmem:[%s4685_s29 + $0xd0] sm:$0xff] %vm1689_vm4, %v4895_v59 }
 0x368   : > { %v2118_v39 = vpop.f32.mrf.mxu1 }
 0x369   : > { %2186 = vst.msk [vmem:[%s4685_s29 + $0x70] sm:$0xff] %vm1689_vm4, %v2118_v39  ;;  %v2289_v30 = vmul.f32 %v2118_v39, %v2118_v39  ;;  %v2231_v24 = vsel %vm1689_vm4, %v2118_v39, 0.0  ;;  %v2354_v39 = vsel %vm1689_vm4, %v2299_v27, 0.0 }
 0x36a   : > { %v2232_v7 = vadd.f32 %v2231_v24, %v2230_v26  ;;  %v2251_v26 = vsel %vm1689_vm4, %v4832_v17, 0.0  ;;  %v2356_v17 = vsel %vm1689_vm4, %v2300_v2, 0.0 }
 0x36b   : > { %v2334_v37 = vsel %vm1689_vm4, %v2289_v30, 0.0  ;;  %v2301_v30 = vmul.f32 %v4895_v59, %v4895_v59 }
 0x36c   : > { %v2335_v47 = vadd.f32 %v2334_v37, %v2333_v62 }
 0x376   : > { %v2139_v10 = vpop.f32.mrf.mxu2 }
 0x377   : > { %2193 = vst.msk [vmem:[%s4685_s29 + $0xa8] sm:$0xff] %vm1689_vm4, %v2139_v10  ;;  %v2296_v11 = vmul.f32 %v2139_v10, %v2139_v10  ;;  %v2245_v38 = vsel %vm1689_vm4, %v2139_v10, 0.0  ;;  %v2253_v10 = vsel %vm1689_vm4, %v4858_v32, 0.0  ;;  %v2358_v32 = vsel %vm1689_vm4, %v2301_v30, 0.0 }
 0x379   : > { %v2348_v19 = vsel %vm1689_vm4, %v2296_v11, 0.0 }
 0x37d   : > { %v4905_v34 = vpop.f32.mrf.mxu3 }
 0x37e   : > { %2199 = vst.msk [vmem:[%s4685_s29 + $0xd8] sm:$0xff] %vm1689_vm4, %v4905_v34  ;;  %v2302_v50 = vmul.f32 %v4905_v34, %v4905_v34 }
 0x380   : > { %v2121_v13 = vpop.f32.mrf.mxu1  ;;  %v2360_v55 = vsel %vm1689_vm4, %v2302_v50, 0.0 }
 0x381   : > { %2187 = vst.msk [vmem:[%s4685_s29 + $0x78] sm:$0xff] %vm1689_vm4, %v2121_v13  ;;  %v2233_v29 = vsel %vm1689_vm4, %v2121_v13, 0.0  ;;  %v2290_v43 = vmul.f32 %v2121_v13, %v2121_v13 }
 0x382   : > { %v2234_v28 = vadd.f32 %v2233_v29, %v2232_v7  ;;  %v2255_v7 = vsel %vm1689_vm4, %v4895_v59, 0.0 }
 0x383   : > { %v2336_v14 = vsel %vm1689_vm4, %v2290_v43, 0.0 }
 0x384   : > { %v2236_v61 = vadd.f32 %v2235_v48, %v2234_v28  ;;  %v2337_v44 = vadd.f32 %v2336_v14, %v2335_v47  ;;  %v2257_v47 = vsel %vm1689_vm4, %v4905_v34, 0.0 }
 0x386   : > { %v2238_v45 = vadd.f32 %v2237_v6, %v2236_v61  ;;  %v2339_v5 = vadd.f32 %v2338_v49, %v2337_v44 }
 0x388   : > { %v2240_v1 = vadd.f32 %v2239_v15, %v2238_v45  ;;  %v2341_v12 = vadd.f32 %v2340_v23, %v2339_v5 }
 0x38a   : > { %v2343_v25 = vadd.f32 %v2342_v21, %v2341_v12  ;;  %v2242_v33 = vadd.f32 %v2241_v22, %v2240_v1 }
 0x38c   : > { %v2244_v42 = vadd.f32 %v2243_v31, %v2242_v33  ;;  %v2345_v20 = vadd.f32 %v2344_v53, %v2343_v25 }
 0x38e   : > { %v2142_v54 = vpop.f32.mrf.mxu2  ;;  %v2347_v36 = vadd.f32 %v2346_v56, %v2345_v20  ;;  %v2246_v3 = vadd.f32 %v2245_v38, %v2244_v42 }
 0x38f   : > { %2194 = vst.msk [vmem:[%s4685_s29 + $0xb0] sm:$0xff] %vm1689_vm4, %v2142_v54  ;;  %v2297_v41 = vmul.f32 %v2142_v54, %v2142_v54  ;;  %v2247_v63 = vsel %vm1689_vm4, %v2142_v54, 0.0 }
 0x390   : > { %v2349_v40 = vadd.f32 %v2348_v19, %v2347_v36  ;;  %v2248_v16 = vadd.f32 %v2247_v63, %v2246_v3 }
 0x391   : > { %v2350_v52 = vsel %vm1689_vm4, %v2297_v41, 0.0 }
 0x392   : > { %v2351_v51 = vadd.f32 %v2350_v52, %v2349_v40 }
 0x395   : > { %v2160_v8 = vpop.f32.mrf.mxu3 }
 0x396   : > { %2200 = vst.msk [vmem:[%s4685_s29 + $0xe0] sm:$0xff] %vm1689_vm4, %v2160_v8  ;;  %v2303_v14 = vmul.f32 %v2160_v8, %v2160_v8  ;;  %v2259_v61 = vsel %vm1689_vm4, %v2160_v8, 0.0 }
 0x398   : > { %v2362_v6 = vsel %vm1689_vm4, %v2303_v14, 0.0 }
 0x39e   : > { %v2145_v60 = vpop.f32.mrf.mxu2 }
 0x39f   : > { %2195 = vst.msk [vmem:[%s4685_s29 + $0xb8] sm:$0xff] %vm1689_vm4, %v2145_v60  ;;  %v2249_v18 = vsel %vm1689_vm4, %v2145_v60, 0.0  ;;  %v2298_v35 = vmul.f32 %v2145_v60, %v2145_v60 }
 0x3a0   : > { %v2250_v9 = vadd.f32 %v2249_v18, %v2248_v16 }
 0x3a1   : > { %v2352_v57 = vsel %vm1689_vm4, %v2298_v35, 0.0 }
 0x3a2   : > { %v2252_v62 = vadd.f32 %v2251_v26, %v2250_v9  ;;  %v2353_v0 = vadd.f32 %v2352_v57, %v2351_v51 }
 0x3a4   : > { %v2254_v24 = vadd.f32 %v2253_v10, %v2252_v62  ;;  %v2355_v37 = vadd.f32 %v2354_v39, %v2353_v0 }
 0x3a5   : > { %v2163_v13 = vpop.f32.mrf.mxu3 }
 0x3a6   : > { %v2256_v29 = vadd.f32 %v2255_v7, %v2254_v24  ;;  %v2357_v43 = vadd.f32 %v2356_v17, %v2355_v37  ;;  %2201 = vst.msk [vmem:[%s4685_s29 + $0xe8] sm:$0xff] %vm1689_vm4, %v2163_v13  ;;  %v2304_v4 = vmul.f32 %v2163_v13, %v2163_v13  ;;  %v2261_v5 = vsel %vm1689_vm4, %v2163_v13, 0.0 }
 0x3a8   : > { %v2359_v28 = vadd.f32 %v2358_v32, %v2357_v43  ;;  %v2258_v48 = vadd.f32 %v2257_v47, %v2256_v29  ;;  %v2364_v15 = vsel %vm1689_vm4, %v2304_v4, 0.0 }
 0x3aa   : > { %v2361_v59 = vadd.f32 %v2360_v55, %v2359_v28  ;;  %v2260_v44 = vadd.f32 %v2259_v61, %v2258_v48 }
 0x3ac   : > { %v2363_v45 = vadd.f32 %v2362_v6, %v2361_v59  ;;  %v2262_v23 = vadd.f32 %v2261_v5, %v2260_v44 }
 0x3ad   : > { %v2166_v49 = vpop.f32.mrf.mxu3 }
 0x3ae   : > { %2202 = vst.msk [vmem:[%s4685_s29 + $0xf0] sm:$0xff] %vm1689_vm4, %v2166_v49  ;;  %v2305_v34 = vmul.f32 %v2166_v49, %v2166_v49  ;;  %v2263_v46 = vsel %vm1689_vm4, %v2166_v49, 0.0  ;;  %v2365_v1 = vadd.f32 %v2364_v15, %v2363_v45 }
 0x3af   : > { %v2264_v21 = vadd.f32 %v2263_v46, %v2262_v23 }
 0x3b0   : > { %v2366_v12 = vsel %vm1689_vm4, %v2305_v34, 0.0 }
 0x3b1   : > { %v2367_v33 = vadd.f32 %v2366_v12, %v2365_v1 }
 0x3b5   : > { %v2169_v22 = vpop.f32.mrf.mxu3 }
 0x3b6   : > { %2203 = vst.msk [vmem:[%s4685_s29 + $0xf8] sm:$0xff] %vm1689_vm4, %v2169_v22  ;;  %v2265_v58 = vsel %vm1689_vm4, %v2169_v22, 0.0  ;;  %v2306_v25 = vmul.f32 %v2169_v22, %v2169_v22 }
 0x3b7   : > { %v2266_v53 = vadd.f32 %v2265_v58, %v2264_v21 }
 0x3b8   : > { %v2368_v31 = vsel %vm1689_vm4, %v2306_v25, 0.0 }
 0x3b9   : > { %v2267_v42 = vrot.slane %v2266_v53, 4  ;;  %v2369_v20 = vadd.f32 %v2368_v31, %v2367_v33 }
 0x3bb   : > { %v2268_v56 = vadd.f32 %v2267_v42, %v2266_v53  ;;  %v2370_v54 = vrot.slane %v2369_v20, 4 }
 0x3bd   : > { %v2269_v36 = vrot.slane %v2268_v56, 2  ;;  %v2371_v8 = vadd.f32 %v2370_v54, %v2369_v20 }
 0x3bf   : > { %v2270_v11 = vadd.f32 %v2269_v36, %v2268_v56  ;;  %v2372_v38 = vrot.slane %v2371_v8, 2 }
 0x3c1   : > { %v2271_v41 = vrot.slane %v2270_v11, 1  ;;  %v2373_v3 = vadd.f32 %v2372_v38, %v2371_v8 }
 0x3c3   : > { %v2272_v19 = vadd.f32 %v2271_v41, %v2270_v11  ;;  %v2374_v63 = vrot.slane %v2373_v3, 1 }
 0x3c5   : > { %2274 = vst.msk [vmem:[%s365_s20] sm:$0x1] %vm2273_vm13, %v2272_v19  ;;  %v2375_v40 = vadd.f32 %v2374_v63, %v2373_v3 }
 0x3c7   : > { %2376 = vst.msk [vmem:[%s372_s8] sm:$0x1] %vm2273_vm13, %v2375_v40 }
 0x3c8 PF: > { %s17_s23 = sadd.s32 1, %s2734_s23   ;;  %s5526_s21 = smov %s2730_s22 }
 0x3c9   : > { %p14_p5 = scmp.ge.s32.totalorder %s17_s23, 4   ;;  %s5527_s22 = smov %s5529_s24 }
 0x3cb   :  { %16 = sbr.rel (!%p14_p5) target bundleno = 2 (0x2), region = 99 }

</bundles_post_ra>
